<compile_context>
chip_gen: v7x
topology: tpu7x:2x2x1
jax: 0.10.0
libtpu: 0.0.40
codegen_flags: <defaults>
</compile_context>

<pallas_src>
import functools

import jax
import jax.numpy as jnp
from jax.experimental import pallas as pl
from jax.experimental.pallas import tpu as pltpu


# ----------------------------------------------------------------------------
# Kernel
# ----------------------------------------------------------------------------
def encoder_kernel(y_ref, w1_ref, b1_ref, w2_ref, b2_ref, wz_ref, bz_ref,
                   eps_ref, out_ref, *, n_latent):
    L = n_latent

    # Layer 1: Linear(D, 1024) + ReLU   (bf16 operands, f32 MXU accumulation)
    y = y_ref[...].astype(jnp.bfloat16)
    h = jnp.dot(y, w1_ref[...], preferred_element_type=jnp.float32) + b1_ref[...]
    h = jnp.maximum(h, 0.0)

    # Layer 2: Linear(1024, D) + ReLU
    y2 = jnp.dot(h.astype(jnp.bfloat16), w2_ref[...],
                 preferred_element_type=jnp.float32) + b2_ref[...]
    y2 = jnp.maximum(y2, 0.0)

    # Fused heads: one [TB, 2L] matmul containing  mu | logvar
    heads = jnp.dot(y2.astype(jnp.bfloat16), wz_ref[...],
                    preferred_element_type=jnp.float32) + bz_ref[...]
    mu = heads[:, :L]
    lv = heads[:, L:]

    # Reparameterization: z = mu + exp(0.5*logvar) * eps   (EUP handles exp)
    z = mu + jnp.exp(0.5 * lv) * eps_ref[...]

    # Single packed output buffer: [ mu | logvar | z ]  -> one writeback DMA.
    out_ref[:, : 2 * L] = heads
    out_ref[:, 2 * L:] = z


# ----------------------------------------------------------------------------
# Wrapper
# ----------------------------------------------------------------------------
def _pick_batch_tile(B):
    for tb in (128, 64, 32, 16, 8):
        if B % tb == 0:
            return tb
    return B


def encoder_forward(y, kparams, eps):
    """Encoder forward in one Pallas kernel.

    y: [B, n_input] f32; eps: [B, n_latent] f32 (standard-normal noise).
    kparams: packed kernel params from `to_kernel_params`.
    Returns (mu, logvar, z_sample), each [B, n_latent] f32.
    """
    B, D = y.shape
    L = eps.shape[-1]
    H = kparams["w1"].shape[-1]

    TB = _pick_batch_tile(B)
    grid = (B // TB,)

    w1, b1 = kparams["w1"], kparams["b1"]
    w2, b2 = kparams["w2"], kparams["b2"]
    wz, bz = kparams["wz"], kparams["bz"]

    # Weights/biases: full-block, constant index_map -> stay VMEM-resident.
    bcast = lambda shape: pl.BlockSpec(shape, lambda i: (0, 0))

    weight_bytes = (w1.size + w2.size + wz.size) * 2        # bf16
    bias_bytes = (b1.size + b2.size + bz.size) * 4           # f32
    act_bytes = (y.size + eps.size + B * 3 * L) * 4          # f32
    cost = pl.CostEstimate(
        flops=2 * B * (D * H + H * D + D * 2 * L),
        transcendentals=B * L,
        bytes_accessed=weight_bytes + bias_bytes + act_bytes,
    )

    packed = pl.pallas_call(
        functools.partial(encoder_kernel, n_latent=L),
        out_shape=jax.ShapeDtypeStruct((B, 3 * L), jnp.float32),
        grid=grid,
        in_specs=[
            pl.BlockSpec((TB, D), lambda i: (i, 0)),   # y (tiled over batch)
            bcast(w1.shape), bcast(b1.shape),
            bcast(w2.shape), bcast(b2.shape),
            bcast(wz.shape), bcast(bz.shape),
            pl.BlockSpec((TB, L), lambda i: (i, 0)),   # eps (tiled over batch)
        ],
        out_specs=pl.BlockSpec((TB, 3 * L), lambda i: (i, 0)),
        compiler_params=pltpu.CompilerParams(
            dimension_semantics=("parallel",)),
        cost_estimate=cost,
    )(y, w1, b1, w2, b2, wz, bz, eps)

    mu = packed[:, :L]
    lv = packed[:, L:2 * L]
    z = packed[:, 2 * L:]
    return mu, lv, z


# ----------------------------------------------------------------------------
# Params
# ----------------------------------------------------------------------------
def init_params(key, n_input, n_latent, hidden=1024, std=0.01):
    """Matches weight_init: weights ~ N(0, 0.01), biases 0.
    Weights stored as [in, out] (transposed vs. PyTorch's [out, in])."""
    k1, k2, k3, k4 = jax.random.split(key, 4)
    return {
        "w1":  (std * jax.random.normal(k1, (n_input, hidden))).astype(jnp.float32),
        "b1":  jnp.zeros((1, hidden), jnp.float32),
        "w2":  (std * jax.random.normal(k2, (hidden, n_input))).astype(jnp.float32),
        "b2":  jnp.zeros((1, n_input), jnp.float32),
        "wz1": (std * jax.random.normal(k3, (n_input, n_latent))).astype(jnp.float32),
        "bz1": jnp.zeros((1, n_latent), jnp.float32),
        "wz2": (std * jax.random.normal(k4, (n_input, n_latent))).astype(jnp.float32),
        "bz2": jnp.zeros((1, n_latent), jnp.float32),
    }


def to_kernel_params(p):
    """Kernel-side packing: bf16 weights (halve HBM traffic, native MXU path),
    head weights fused to [D, 2L] and biases to [1, 2L]; biases stay f32."""
    return {
        "w1": p["w1"].astype(jnp.bfloat16),
        "b1": p["b1"],
        "w2": p["w2"].astype(jnp.bfloat16),
        "b2": p["b2"],
        "wz": jnp.concatenate([p["wz1"], p["wz2"]], axis=-1).astype(jnp.bfloat16),
        "bz": jnp.concatenate([p["bz1"], p["bz2"]], axis=-1),
    }


# ----------------------------------------------------------------------------
# References
# ----------------------------------------------------------------------------
def encoder_forward_ref_f32(y, p, eps):
    """Plain-JAX f32 reference (same math as the PyTorch module)."""
    h = jnp.maximum(y @ p["w1"] + p["b1"], 0.0)
    y2 = jnp.maximum(h @ p["w2"] + p["b2"], 0.0)
    mu = y2 @ p["wz1"] + p["bz1"]
    lv = y2 @ p["wz2"] + p["bz2"]
    z = mu + jnp.exp(0.5 * lv) * eps
    return mu, lv, z


def encoder_forward_ref_bf16(y, kp, eps, n_latent):
    """Reference using the same bf16-weight / f32-accumulate recipe as the kernel."""
    dot = lambda a, b: jnp.dot(a.astype(jnp.bfloat16), b,
                               preferred_element_type=jnp.float32)
    h = jnp.maximum(dot(y, kp["w1"]) + kp["b1"], 0.0)
    y2 = jnp.maximum(dot(h, kp["w2"]) + kp["b2"], 0.0)
    heads = dot(y2, kp["wz"]) + kp["bz"]
    mu = heads[:, :n_latent]
    lv = heads[:, n_latent:]
    z = mu + jnp.exp(0.5 * lv) * eps
    return mu, lv, z


# ----------------------------------------------------------------------------
# Demo / self-test
# ----------------------------------------------------------------------------
if __name__ == "__main__":
    key = jax.random.PRNGKey(0)
    k_param, k_y, k_eps = jax.random.split(key, 3)

    B = 128        # batch (multiple of the 64-row tile -> 2 parallel grid steps)
    n_input = 256  # input features (genes)
    n_latent = 32  # latent dim

    params = init_params(k_param, n_input, n_latent)
    kparams = to_kernel_params(params)

    y = jax.random.normal(k_y, (B, n_input), dtype=jnp.float32)
    # randn_like noise for the reparameterization trick, generated host-side
    # so the kernel is deterministic.
    eps = jax.random.normal(k_eps, (B, n_latent), dtype=jnp.float32)

    mu, logvar, z = encoder_forward(y, kparams, eps)
    jax.block_until_ready((mu, logvar, z))

    # Exact-recipe check (bf16 weights, f32 accumulation) — tight tolerance.
    mu_b, lv_b, z_b = encoder_forward_ref_bf16(y, kparams, eps, n_latent)
    assert jnp.allclose(mu, mu_b, atol=1e-4, rtol=1e-3)
    assert jnp.allclose(logvar, lv_b, atol=1e-4, rtol=1e-3)
    assert jnp.allclose(z, z_b, atol=1e-4, rtol=1e-3)

    # Original f32 semantics check — tolerance loosened for bf16 weights.
    mu_r, lv_r, z_r = encoder_forward_ref_f32(y, params, eps)
    assert jnp.allclose(mu, mu_r, atol=5e-3, rtol=5e-2)
    assert jnp.allclose(logvar, lv_r, atol=5e-3, rtol=5e-2)
    assert jnp.allclose(z, z_r, atol=5e-3, rtol=5e-2)

    print("KERNEL_OK")
</pallas_src>

<mosaic_0001>
module attributes {stable_mosaic.version = 11 : i64} {
  func.func @encoder_kernel(%arg0: i32, %arg1: memref<128x256xf32, #tpu.memory_space<vmem>>, %arg2: memref<256x1024xbf16, #tpu.memory_space<vmem>>, %arg3: memref<1x1024xf32, #tpu.memory_space<vmem>>, %arg4: memref<1024x256xbf16, #tpu.memory_space<vmem>>, %arg5: memref<1x256xf32, #tpu.memory_space<vmem>>, %arg6: memref<256x64xbf16, #tpu.memory_space<vmem>>, %arg7: memref<1x64xf32, #tpu.memory_space<vmem>>, %arg8: memref<128x32xf32, #tpu.memory_space<vmem>>, %arg9: memref<128x96xf32, #tpu.memory_space<vmem>>) attributes {dimension_semantics = [#tpu.dimension_semantics<parallel>], iteration_bounds = array<i64: 1>, scalar_prefetch = 0 : i64, scratch_operands = 0 : i64, tpu.core_type = #tpu.core_type<tc>, window_params = [{transform_indices = @transform_0, window_bounds = array<i64: 128, 256>}, {pipeline_mode = #tpu.pipeline_mode<synchronous>, transform_indices = @transform_1, window_bounds = array<i64: 256, 1024>}, {pipeline_mode = #tpu.pipeline_mode<synchronous>, transform_indices = @transform_2, window_bounds = array<i64: 1, 1024>}, {pipeline_mode = #tpu.pipeline_mode<synchronous>, transform_indices = @transform_3, window_bounds = array<i64: 1024, 256>}, {pipeline_mode = #tpu.pipeline_mode<synchronous>, transform_indices = @transform_4, window_bounds = array<i64: 1, 256>}, {pipeline_mode = #tpu.pipeline_mode<synchronous>, transform_indices = @transform_5, window_bounds = array<i64: 256, 64>}, {pipeline_mode = #tpu.pipeline_mode<synchronous>, transform_indices = @transform_6, window_bounds = array<i64: 1, 64>}, {transform_indices = @transform_7, window_bounds = array<i64: 128, 32>}, {transform_indices = @transform_8, window_bounds = array<i64: 128, 96>}]} {
    %c0 = arith.constant 0 : index
    %c0_0 = arith.constant 0 : index
    %0 = vector.load %arg1[%c0, %c0_0] : memref<128x256xf32, #tpu.memory_space<vmem>>, vector<128x256xf32>
    %1 = arith.truncf %0 : vector<128x256xf32> to vector<128x256xbf16>
    %c0_1 = arith.constant 0 : index
    %c0_2 = arith.constant 0 : index
    %2 = vector.load %arg2[%c0_1, %c0_2] : memref<256x1024xbf16, #tpu.memory_space<vmem>>, vector<256x1024xbf16>
    %cst = arith.constant dense<0.000000e+00> : vector<128x1024xf32>
    %3 = tpu.matmul %1, %2, %cst {dimension_numbers = #tpu.dot_dimension_numbers<[1], [0], [0], [1], [0, 0, 1, 1], [], []>} : vector<128x256xbf16>, vector<256x1024xbf16>, vector<128x1024xf32> -> vector<128x1024xf32>
    %c0_3 = arith.constant 0 : index
    %c0_4 = arith.constant 0 : index
    %4 = vector.load %arg3[%c0_3, %c0_4] : memref<1x1024xf32, #tpu.memory_space<vmem>>, vector<1x1024xf32>
    %5 = vector.broadcast %4 : vector<1x1024xf32> to vector<128x1024xf32>
    %6 = arith.addf %3, %5 : vector<128x1024xf32>
    %cst_5 = arith.constant 0.000000e+00 : f32
    %7 = vector.broadcast %cst_5 : f32 to vector<128x1024xf32>
    %8 = arith.maximumf %6, %7 : vector<128x1024xf32>
    %9 = arith.truncf %8 : vector<128x1024xf32> to vector<128x1024xbf16>
    %c0_6 = arith.constant 0 : index
    %c0_7 = arith.constant 0 : index
    %10 = vector.load %arg4[%c0_6, %c0_7] : memref<1024x256xbf16, #tpu.memory_space<vmem>>, vector<1024x256xbf16>
    %cst_8 = arith.constant dense<0.000000e+00> : vector<128x256xf32>
    %11 = tpu.matmul %9, %10, %cst_8 {dimension_numbers = #tpu.dot_dimension_numbers<[1], [0], [0], [1], [0, 0, 1, 1], [], []>} : vector<128x1024xbf16>, vector<1024x256xbf16>, vector<128x256xf32> -> vector<128x256xf32>
    %c0_9 = arith.constant 0 : index
    %c0_10 = arith.constant 0 : index
    %12 = vector.load %arg5[%c0_9, %c0_10] : memref<1x256xf32, #tpu.memory_space<vmem>>, vector<1x256xf32>
    %13 = vector.broadcast %12 : vector<1x256xf32> to vector<128x256xf32>
    %14 = arith.addf %11, %13 : vector<128x256xf32>
    %cst_11 = arith.constant 0.000000e+00 : f32
    %15 = vector.broadcast %cst_11 : f32 to vector<128x256xf32>
    %16 = arith.maximumf %14, %15 : vector<128x256xf32>
    %17 = arith.truncf %16 : vector<128x256xf32> to vector<128x256xbf16>
    %c0_12 = arith.constant 0 : index
    %c0_13 = arith.constant 0 : index
    %18 = vector.load %arg6[%c0_12, %c0_13] : memref<256x64xbf16, #tpu.memory_space<vmem>>, vector<256x64xbf16>
    %cst_14 = arith.constant dense<0.000000e+00> : vector<128x64xf32>
    %19 = tpu.matmul %17, %18, %cst_14 {dimension_numbers = #tpu.dot_dimension_numbers<[1], [0], [0], [1], [0, 0, 1, 1], [], []>} : vector<128x256xbf16>, vector<256x64xbf16>, vector<128x64xf32> -> vector<128x64xf32>
    %c0_15 = arith.constant 0 : index
    %c0_16 = arith.constant 0 : index
    %20 = vector.load %arg7[%c0_15, %c0_16] : memref<1x64xf32, #tpu.memory_space<vmem>>, vector<1x64xf32>
    %21 = vector.broadcast %20 : vector<1x64xf32> to vector<128x64xf32>
    %22 = arith.addf %19, %21 : vector<128x64xf32>
    %23 = vector.extract_strided_slice %22 {offsets = [0, 0], sizes = [128, 32], strides = [1, 1]} : vector<128x64xf32> to vector<128x32xf32>
    %24 = vector.extract_strided_slice %22 {offsets = [0, 32], sizes = [128, 32], strides = [1, 1]} : vector<128x64xf32> to vector<128x32xf32>
    %cst_17 = arith.constant 5.000000e-01 : f32
    %25 = vector.broadcast %cst_17 : f32 to vector<128x32xf32>
    %26 = arith.mulf %25, %24 : vector<128x32xf32>
    %27 = math.exp %26 : vector<128x32xf32>
    %c0_18 = arith.constant 0 : index
    %c0_19 = arith.constant 0 : index
    %28 = vector.load %arg8[%c0_18, %c0_19] : memref<128x32xf32, #tpu.memory_space<vmem>>, vector<128x32xf32>
    %29 = arith.mulf %27, %28 : vector<128x32xf32>
    %30 = arith.addf %23, %29 : vector<128x32xf32>
    %c0_20 = arith.constant 0 : index
    %c0_21 = arith.constant 0 : index
    %31 = vector.load %arg9[%c0_20, %c0_21] : memref<128x96xf32, #tpu.memory_space<vmem>>, vector<128x64xf32>
    tpu.vector_store %arg9[%c0_20, %c0_21], %22 {strides = array<i32>} : memref<128x96xf32, #tpu.memory_space<vmem>>, vector<128x64xf32>,
    %c0_22 = arith.constant 0 : index
    %c64 = arith.constant 64 : index
    %32 = vector.load %arg9[%c0_22, %c64] : memref<128x96xf32, #tpu.memory_space<vmem>>, vector<128x32xf32>
    tpu.vector_store %arg9[%c0_22, %c64], %30 {strides = array<i32>} : memref<128x96xf32, #tpu.memory_space<vmem>>, vector<128x32xf32>,
    return
  }
  func.func @transform_0(%arg0: i32) -> (i32, i32) {
    %c0_i32 = arith.constant 0 : i32
    %c0_i32_0 = arith.constant 0 : i32
    return %arg0, %c0_i32 : i32, i32
  }
  func.func @transform_1(%arg0: i32) -> (i32, i32) {
    %c0_i32 = arith.constant 0 : i32
    %c0_i32_0 = arith.constant 0 : i32
    %c0_i32_1 = arith.constant 0 : i32
    return %c0_i32, %c0_i32_0 : i32, i32
  }
  func.func @transform_2(%arg0: i32) -> (i32, i32) {
    %c0_i32 = arith.constant 0 : i32
    %c0_i32_0 = arith.constant 0 : i32
    %c0_i32_1 = arith.constant 0 : i32
    return %c0_i32, %c0_i32_0 : i32, i32
  }
  func.func @transform_3(%arg0: i32) -> (i32, i32) {
    %c0_i32 = arith.constant 0 : i32
    %c0_i32_0 = arith.constant 0 : i32
    %c0_i32_1 = arith.constant 0 : i32
    return %c0_i32, %c0_i32_0 : i32, i32
  }
  func.func @transform_4(%arg0: i32) -> (i32, i32) {
    %c0_i32 = arith.constant 0 : i32
    %c0_i32_0 = arith.constant 0 : i32
    %c0_i32_1 = arith.constant 0 : i32
    return %c0_i32, %c0_i32_0 : i32, i32
  }
  func.func @transform_5(%arg0: i32) -> (i32, i32) {
    %c0_i32 = arith.constant 0 : i32
    %c0_i32_0 = arith.constant 0 : i32
    %c0_i32_1 = arith.constant 0 : i32
    return %c0_i32, %c0_i32_0 : i32, i32
  }
  func.func @transform_6(%arg0: i32) -> (i32, i32) {
    %c0_i32 = arith.constant 0 : i32
    %c0_i32_0 = arith.constant 0 : i32
    %c0_i32_1 = arith.constant 0 : i32
    return %c0_i32, %c0_i32_0 : i32, i32
  }
  func.func @transform_7(%arg0: i32) -> (i32, i32) {
    %c0_i32 = arith.constant 0 : i32
    %c0_i32_0 = arith.constant 0 : i32
    return %arg0, %c0_i32 : i32, i32
  }
  func.func @transform_8(%arg0: i32) -> (i32, i32) {
    %c0_i32 = arith.constant 0 : i32
    %c0_i32_0 = arith.constant 0 : i32
    return %arg0, %c0_i32 : i32, i32
  }
}

</mosaic_0001>

<bundles_post_ra>
// kernel: tpu_custom_call.1
= control target key start
LH: loop header
LB: loop body
LE: loop exit
PB: predicated region body
PF: predicated region fallthrough
CT: control target
= control target key end

     0   :  { %13 = vsyncpa [#allocation3], 0  ;;  %s5180_s0 = inlined_call_operand.vmem [shape: f32[128,256], index: 0, kind: input, shape index: {}]   ;;  %s5181_s1 = inlined_call_operand.hbm [shape: bf16[256,1024], index: 1, kind: input, shape index: {}]   ;;  %s5182_s2 = inlined_call_operand.vmem [shape: f32[1,1024], index: 2, kind: input, shape index: {}]   ;;  %s5183_s3 = inlined_call_operand.hbm [shape: bf16[1024,256], index: 3, kind: input, shape index: {}]   ;;  %s5184_s4 = inlined_call_operand.vmem [shape: f32[1,256], index: 4, kind: input, shape index: {}]   ;;  %s5185_s5 = inlined_call_operand.vmem [shape: bf16[256,64], index: 5, kind: input, shape index: {}]   ;;  %s5186_s6 = inlined_call_operand.vmem [shape: f32[1,64], index: 6, kind: input, shape index: {}]   ;;  %s5187_s7 = inlined_call_operand.vmem [shape: f32[128,32], index: 7, kind: input, shape index: {}]   ;;  %s5188_s8 = inlined_call_operand.vmem [shape: f32[128,96], index: 8, kind: output, shape index: {}]  }
   0x1   :  { %14 = vsyncpa [#allocation5], 0  ;;  %s4226_s27 = smov [#allocation2]   ;;  %s4178_s9 = scalar_lea.hbm %s5181_s1, 16384 }
   0x2   :  { %s22_s28 = sshll.u32 %s4226_s27, 4  ;;  %p4179_p0 = scmp.ne.s32.totalorder %s5181_s1, %s4178_s9  ;;  %s23_s28 = int_to_ptr.vmem [resolvable:$true] %s22_s28 }
   0x3   :  { %p4182_p1 = scmp.lt.u32.totalorder %s4178_s9, %s5181_s1 }
   0x5   :  { %p4184_p2 = pnand %p4182_p1, %p4179_p0 }
   0x7   :  { %4187 = shalt.err (!%p4184_p2)
}
   0x8   :  { %s4188_s14 = scalar_lea.vmem %s23_s28, 16384  ;;  %p4193_p4 = scmp.lt.s32.totalorder %s23_s28, %s23_s28 }
   0x9   :  { %p4189_p3 = scmp.ne.s32.totalorder %s23_s28, %s4188_s14  ;;  %p4194_p5 = scmp.lt.s32.totalorder %s4188_s14, %s4188_s14 }
   0xb   :  { %p4195_p6 = por %p4194_p5, %p4193_p4 }
   0xd   :  { %p4196_p7 = pnand %p4195_p6, %p4189_p3 }
   0xf   :  { %4199 = shalt.err (!%p4196_p7)
}
  0x10   :  { %s4227_s15 = smov 512   ;;  %s4228_s16 = smov 32  }
  0x11   :  { %28 = dma.hbm_to_vmem [thread:$0]  %s5181_s1, 16384, %s23_s28, [#allocation3], %s4227_s15, %s4227_s15, %s4228_s16  }
  0x12   :  { %s4229_s19 = smov [#allocation4]   ;;  %s4200_s23 = scalar_lea.hbm %s5183_s3, 16384 }
  0x13   :  { %s36_s20 = sshll.u32 %s4229_s19, 4  ;;  %p4201_p8 = scmp.ne.s32.totalorder %s5183_s3, %s4200_s23  ;;  %s37_s20 = int_to_ptr.vmem [resolvable:$true] %s36_s20 }
  0x14   :  { %p4204_p9 = scmp.lt.u32.totalorder %s4200_s23, %s5183_s3 }
  0x16   :  { %p4206_p10 = pnand %p4204_p9, %p4201_p8 }
  0x18   :  { %4209 = shalt.err (!%p4206_p10)
}
  0x19   :  { %s4210_s29 = scalar_lea.vmem %s37_s20, 16384  ;;  %p4215_p12 = scmp.lt.s32.totalorder %s37_s20, %s37_s20 }
  0x1a   :  { %p4211_p11 = scmp.ne.s32.totalorder %s37_s20, %s4210_s29  ;;  %p4216_p13 = scmp.lt.s32.totalorder %s4210_s29, %s4210_s29 }
  0x1c   :  { %p4217_p0 = por %p4216_p13, %p4215_p12 }
  0x1e   :  { %p4218_p1 = pnand %p4217_p0, %p4211_p11 }
  0x20   :  { %4221 = shalt.err (!%p4218_p1)
}
  0x21   :  { %s4230_s1 = smov 128   ;;  %s4231_s28 = smov 8  }
  0x22   :  { %42 = dma.hbm_to_vmem [thread:$0]  %s5183_s3, 16384, %s37_s20, [#allocation5], %s4230_s1, %s4230_s1, %s4231_s28  }
  0x23   :  { %4222 = dma.done.wait [#allocation3], 16384  }
  0x24   :  { %4223 = vsyncadd [#allocation3], 4294950912 }
  0x25   :  { %4224 = dma.done.wait [#allocation5], 16384  }
  0x26   :  { %4225 = vsyncadd [#allocation5], 4294950912  ;;  %v106_v0 = vld [vmem:[#allocation2] sm:$0xff]  ;;  %v59_v17 = vld [vmem:[%s5180_s0 + $0x8] sm:$0xff]  ;;  %vm3296_vm0 = vcmask 523264   ;;  %s4232_s29 = smov 96  }
  0x27   :  { %v110_v1 = vld [vmem:[#allocation2 + $0x20] sm:$0xff]  ;;  %v61_v18 = vld [vmem:[%s5180_s0 + $0x18] sm:$0xff]  ;;  %v108_v41 = vld [vmem:[#allocation2 + $0x10] sm:$0xff]  ;;  %s4233_s22 = smov 64   ;;  %vm3377_vm1 = vcmask 785920  }
  0x28   :  { %v114_v2 = vld [vmem:[#allocation2 + $0x40] sm:$0xff]  ;;  %v3401_v3 = vcombine.high %v106_v0, %v110_v1  ;;  %v3400_v4 = vcombine.low %v106_v0, %v110_v1  ;;  %v4310_v20 = vpack.c.bf16 %v61_v18, %v59_v17  ;;  %v112_v42 = vld [vmem:[#allocation2 + $0x30] sm:$0xff] }
  0x29   :  { %v118_v5 = vld [vmem:[#allocation2 + $0x60] sm:$0xff]  ;;  %v116_v43 = vld [vmem:[#allocation2 + $0x50] sm:$0xff]  ;;  %v3405_v46 = vcombine.high %v108_v41, %v112_v42  ;;  %v3404_v47 = vcombine.low %v108_v41, %v112_v42  ;;  %v115_v41 = vld [vmem:[#allocation2 + $0x48] sm:$0xff] }
  0x2a   :  { %v3409_v6 = vcombine.high %v114_v2, %v118_v5  ;;  %v122_v7 = vld [vmem:[#allocation2 + $0x80] sm:$0xff]  ;;  %916 = vmatprep.subr.bf16.mxu1 %v3401_v3  ;;  %v3408_v9 = vcombine.low %v114_v2, %v118_v5  ;;  %948 = vmatprep.mubr.bf16.mxu1 %v4310_v20  ;;  %v120_v48 = vld [vmem:[#allocation2 + $0x70] sm:$0xff]  ;;  %v119_v42 = vld [vmem:[#allocation2 + $0x68] sm:$0xff] }
  0x2b   :  { %v126_v8 = vld [vmem:[#allocation2 + $0xa0] sm:$0xff]  ;;  %917 = vmatpush1.bf16.msra.mxu1 %v3400_v4  ;;  %1174 = vmatprep.mubr.bf16.mxu0 %v4310_v20  ;;  %v3413_v50 = vcombine.high %v116_v43, %v120_v48  ;;  %v124_v51 = vld [vmem:[#allocation2 + $0x90] sm:$0xff]  ;;  %v3412_v54 = vcombine.low %v116_v43, %v120_v48  ;;  %v63_v43 = vld [vmem:[%s5180_s0 + $0x28] sm:$0xff] }
  0x2c   :  { %918 = vmatprep.subr.bf16.mxu1 %v3409_v6  ;;  %v3417_v10 = vcombine.high %v122_v7, %v126_v8  ;;  %v130_v11 = vld [vmem:[#allocation2 + $0xc0] sm:$0xff]  ;;  %v3416_v13 = vcombine.low %v122_v7, %v126_v8  ;;  %v128_v52 = vld [vmem:[#allocation2 + $0xb0] sm:$0xff]  ;;  %1142 = vmatprep.subr.bf16.mxu0 %v3405_v46 }
  0x2d   :  { %v134_v12 = vld [vmem:[#allocation2 + $0xe0] sm:$0xff]  ;;  %1143 = vmatpush1.bf16.msra.mxu0 %v3404_v47  ;;  %v3421_v57 = vcombine.high %v124_v51, %v128_v52  ;;  %v132_v59 = vld [vmem:[#allocation2 + $0xd0] sm:$0xff]  ;;  %v3420_v62 = vcombine.low %v124_v51, %v128_v52 }
  0x2e   :  { %v3425_v14 = vcombine.high %v130_v11, %v134_v12  ;;  %v138_v15 = vld [vmem:[#allocation2 + $0x100] sm:$0xff]  ;;  %v3424_v19 = vcombine.low %v130_v11, %v134_v12  ;;  %1144 = vmatprep.subr.bf16.mxu0 %v3413_v50  ;;  %v136_v60 = vld [vmem:[#allocation2 + $0xf0] sm:$0xff] }
  0x2f   :  { %919 = vmatpush1.bf16.msra.mxu1 %v3408_v9  ;;  %v142_v16 = vld [vmem:[#allocation2 + $0x120] sm:$0xff]  ;;  %v3429_v1 = vcombine.high %v132_v59, %v136_v60  ;;  %v140_v3 = vld [vmem:[#allocation2 + $0x110] sm:$0xff]  ;;  %v3428_v6 = vcombine.low %v132_v59, %v136_v60 }
  0x30   :  { %920 = vmatprep.subr.bf16.mxu1 %v3417_v10  ;;  %v3433_v21 = vcombine.high %v138_v15, %v142_v16  ;;  %v146_v22 = vld [vmem:[#allocation2 + $0x140] sm:$0xff]  ;;  %v3432_v24 = vcombine.low %v138_v15, %v142_v16  ;;  %v144_v4 = vld [vmem:[#allocation2 + $0x130] sm:$0xff] }
  0x31   :  { %v150_v23 = vld [vmem:[#allocation2 + $0x160] sm:$0xff]  ;;  %1145 = vmatpush1.bf16.msra.mxu0 %v3412_v54  ;;  %v3437_v9 = vcombine.high %v140_v3, %v144_v4  ;;  %v148_v11 = vld [vmem:[#allocation2 + $0x150] sm:$0xff]  ;;  %v127_v54 = vld [vmem:[#allocation2 + $0xa8] sm:$0xff] }
  0x32   :  { %v3441_v25 = vcombine.high %v146_v22, %v150_v23  ;;  %v154_v26 = vld [vmem:[#allocation2 + $0x180] sm:$0xff]  ;;  %v3440_v28 = vcombine.low %v146_v22, %v150_v23  ;;  %1146 = vmatprep.subr.bf16.mxu0 %v3421_v57  ;;  %v152_v12 = vld [vmem:[#allocation2 + $0x170] sm:$0xff] }
  0x33   :  { %921 = vmatpush1.bf16.msra.mxu1 %v3416_v13  ;;  %v158_v27 = vld [vmem:[#allocation2 + $0x1a0] sm:$0xff]  ;;  %v3445_v18 = vcombine.high %v148_v11, %v152_v12  ;;  %v180_v48 = vld [vmem:[#allocation2 + $0x250] sm:$0xff] }
  0x34   :  { %922 = vmatprep.subr.bf16.mxu1 %v3425_v14  ;;  %v3449_v29 = vcombine.high %v154_v26, %v158_v27  ;;  %v162_v30 = vld [vmem:[#allocation2 + $0x1c0] sm:$0xff]  ;;  %v3448_v32 = vcombine.low %v154_v26, %v158_v27  ;;  %v3436_v14 = vcombine.low %v140_v3, %v144_v4  ;;  %v164_v26 = vld [vmem:[#allocation2 + $0x1d0] sm:$0xff] }
  0x35   :  { %v166_v31 = vld [vmem:[#allocation2 + $0x1e0] sm:$0xff]  ;;  %1147 = vmatpush1.bf16.msra.mxu0 %v3420_v62  ;;  %v188_v57 = vld [vmem:[#allocation2 + $0x290] sm:$0xff]  ;;  %v67_v62 = vld [vmem:[%s5180_s0 + $0x48] sm:$0xff] }
  0x36   :  { %v3457_v33 = vcombine.high %v162_v30, %v166_v31  ;;  %v170_v34 = vld [vmem:[#allocation2 + $0x200] sm:$0xff]  ;;  %v3456_v36 = vcombine.low %v162_v30, %v166_v31  ;;  %1148 = vmatprep.subr.bf16.mxu0 %v3429_v1  ;;  %v64_v60 = vld [vmem:[%s5180_s0 + $0x30] sm:$0xff]  ;;  %v131_v1 = vld [vmem:[#allocation2 + $0xc8] sm:$0xff] }
  0x37   :  { %923 = vmatpush1.bf16.msra.mxu1 %v3424_v19  ;;  %v174_v35 = vld [vmem:[#allocation2 + $0x220] sm:$0xff]  ;;  %v156_v19 = vld [vmem:[#allocation2 + $0x190] sm:$0xff] }
  0x38   :  { %924 = vmatprep.subr.bf16.mxu1 %v3433_v21  ;;  %v3465_v37 = vcombine.high %v170_v34, %v174_v35  ;;  %v178_v38 = vld [vmem:[#allocation2 + $0x240] sm:$0xff]  ;;  %v3464_v40 = vcombine.low %v170_v34, %v174_v35  ;;  %v160_v21 = vld [vmem:[#allocation2 + $0x1b0] sm:$0xff]  ;;  %v111_v34 = vld [vmem:[#allocation2 + $0x28] sm:$0xff] }
  0x39   :  { %v182_v39 = vld [vmem:[#allocation2 + $0x260] sm:$0xff]  ;;  %1149 = vmatpush1.bf16.msra.mxu0 %v3428_v6  ;;  %v3452_v31 = vcombine.low %v156_v19, %v160_v21  ;;  %v200_v6 = vld [vmem:[#allocation2 + $0x2f0] sm:$0xff] }
  0x3a   :  { %v3473_v44 = vcombine.high %v178_v38, %v182_v39  ;;  %v186_v45 = vld [vmem:[#allocation2 + $0x280] sm:$0xff]  ;;  %v3472_v53 = vcombine.low %v178_v38, %v182_v39  ;;  %1150 = vmatprep.subr.bf16.mxu0 %v3437_v9  ;;  %v172_v38 = vld [vmem:[#allocation2 + $0x210] sm:$0xff] }
  0x3b   :  { %925 = vmatpush1.bf16.msra.mxu1 %v3432_v24  ;;  %v190_v49 = vld [vmem:[#allocation2 + $0x2a0] sm:$0xff]  ;;  %v176_v39 = vld [vmem:[#allocation2 + $0x230] sm:$0xff] }
  0x3c   :  { %926 = vmatprep.subr.bf16.mxu1 %v3441_v25  ;;  %v3481_v55 = vcombine.high %v186_v45, %v190_v49  ;;  %v194_v56 = vld [vmem:[#allocation2 + $0x2c0] sm:$0xff]  ;;  %v3480_v61 = vcombine.low %v186_v45, %v190_v49  ;;  %v3444_v25 = vcombine.low %v148_v11, %v152_v12  ;;  %v3469_v47 = vcombine.high %v172_v38, %v176_v39  ;;  %v184_v49 = vld [vmem:[#allocation2 + $0x270] sm:$0xff]  ;;  %v139_v11 = vld [vmem:[#allocation2 + $0x108] sm:$0xff] }
  0x3d   :  { %v198_v58 = vld [vmem:[#allocation2 + $0x2e0] sm:$0xff]  ;;  %1151 = vmatpush1.bf16.msra.mxu0 %v3436_v14  ;;  %v3476_v4 = vcombine.low %v180_v48, %v184_v49  ;;  %v143_v12 = vld [vmem:[#allocation2 + $0x128] sm:$0xff] }
  0x3e   :  { %v3489_v63 = vcombine.high %v194_v56, %v198_v58  ;;  %v202_v0 = vld [vmem:[#allocation2 + $0x300] sm:$0xff]  ;;  %v3488_v5 = vcombine.low %v194_v56, %v198_v58  ;;  %1152 = vmatprep.subr.bf16.mxu0 %v3445_v18  ;;  %v3468_v56 = vcombine.low %v172_v38, %v176_v39  ;;  %v192_v58 = vld [vmem:[#allocation2 + $0x2b0] sm:$0xff] }
  0x3f   :  { %927 = vmatpush1.bf16.msra.mxu1 %v3440_v28  ;;  %v206_v2 = vld [vmem:[#allocation2 + $0x320] sm:$0xff]  ;;  %v3453_v28 = vcombine.high %v156_v19, %v160_v21  ;;  %v3484_v14 = vcombine.low %v188_v57, %v192_v58  ;;  %v68_v18 = vld [vmem:[%s5180_s0 + $0x50] sm:$0xff]  ;;  %v71_v21 = vld [vmem:[%s5180_s0 + $0x68] sm:$0xff] }
  0x40   :  { %928 = vmatprep.subr.bf16.mxu1 %v3449_v29  ;;  %v3497_v7 = vcombine.high %v202_v0, %v206_v2  ;;  %v210_v8 = vld [vmem:[#allocation2 + $0x340] sm:$0xff]  ;;  %v3496_v13 = vcombine.low %v202_v0, %v206_v2  ;;  %v168_v29 = vld [vmem:[#allocation2 + $0x1f0] sm:$0xff]  ;;  %v3410_v0 = vcombine.low %v115_v41, %v119_v42  ;;  %v135_v2 = vld [vmem:[#allocation2 + $0xe8] sm:$0xff] }
  0x41   :  { %v214_v10 = vld [vmem:[#allocation2 + $0x360] sm:$0xff]  ;;  %1153 = vmatpush1.bf16.msra.mxu0 %v3444_v25  ;;  %v3461_v35 = vcombine.high %v164_v26, %v168_v29  ;;  %v3460_v45 = vcombine.low %v164_v26, %v168_v29  ;;  %v151_v25 = vld [vmem:[#allocation2 + $0x168] sm:$0xff]  ;;  %v3435_v26 = vcombine.high %v139_v11, %v143_v12  ;;  %v216_v29 = vld [vmem:[#allocation2 + $0x370] sm:$0xff] }
  0x42   :  { %v3505_v15 = vcombine.high %v210_v8, %v214_v10  ;;  %v218_v16 = vld [vmem:[#allocation2 + $0x380] sm:$0xff]  ;;  %v3504_v22 = vcombine.low %v210_v8, %v214_v10  ;;  %1154 = vmatprep.subr.bf16.mxu0 %v3453_v28  ;;  %v212_v28 = vld [vmem:[#allocation2 + $0x350] sm:$0xff] }
  0x43   :  { %929 = vmatpush1.bf16.msra.mxu1 %v3448_v32  ;;  %v222_v17 = vld [vmem:[#allocation2 + $0x3a0] sm:$0xff]  ;;  %v220_v38 = vld [vmem:[#allocation2 + $0x390] sm:$0xff] }
  0x44   :  { %930 = vmatprep.subr.bf16.mxu1 %v3457_v33  ;;  %v226_v23 = vld [vmem:[#allocation2 + $0x3c0] sm:$0xff]  ;;  %v3513_v27 = vcombine.high %v218_v16, %v222_v17  ;;  %v3512_v30 = vcombine.low %v218_v16, %v222_v17  ;;  %v107_v33 = vld [vmem:[#allocation2 + $0x8] sm:$0xff]  ;;  %v208_v16 = vld [vmem:[#allocation2 + $0x330] sm:$0xff] }
  0x45   :  { %v230_v24 = vld [vmem:[#allocation2 + $0x3e0] sm:$0xff]  ;;  %1155 = vmatpush1.bf16.msra.mxu0 %v3452_v31  ;;  %v3403_v46 = vcombine.high %v107_v33, %v111_v34  ;;  %v3402_v51 = vcombine.low %v107_v33, %v111_v34  ;;  %v155_v34 = vld [vmem:[#allocation2 + $0x188] sm:$0xff]  ;;  %v224_v39 = vld [vmem:[#allocation2 + $0x3b0] sm:$0xff] }
  0x46   :  { %v3521_v32 = vcombine.high %v226_v23, %v230_v24  ;;  %1156 = vmatprep.subr.bf16.mxu0 %v3461_v35  ;;  %v62_v59 = vld [vmem:[%s5180_s0 + $0x20] sm:$0xff]  ;;  %v159_v35 = vld [vmem:[#allocation2 + $0x1a8] sm:$0xff] }
  0x47   :  { %931 = vmatpush1.bf16.msra.mxu1 %v3456_v36  ;;  %v58_v36 = vld [vmem:[%s5180_s0] sm:$0xff]  ;;  %v4344_v8 = vpack.c.bf16 %v64_v60, %v62_v59  ;;  %v175_v59 = vld [vmem:[#allocation2 + $0x228] sm:$0xff] }
  0x48   :  { %932 = vmatprep.subr.bf16.mxu1 %v3465_v37  ;;  %v60_v37 = vld [vmem:[%s5180_s0 + $0x10] sm:$0xff]  ;;  %v66_v17 = vld [vmem:[%s5180_s0 + $0x40] sm:$0xff] }
  0x49   :  { %v4326_v50 = vpack.c.bf16 %v60_v37, %v58_v36  ;;  %1157 = vmatpush1.bf16.msra.mxu0 %v3460_v45  ;;  %v4362_v31 = vpack.c.bf16 %v68_v18, %v66_v17  ;;  %v78_v18 = vld [vmem:[%s5180_s0 + $0xa0] sm:$0xff] }
  0x4a   :  { %1158 = vmatprep.subr.bf16.mxu0 %v3469_v47  ;;  %v167_v47 = vld [vmem:[#allocation2 + $0x1e8] sm:$0xff] }
  0x4b   :  { %933 = vmatpush1.bf16.msra.mxu1 %v3464_v40  ;;  %v3520_v40 = vcombine.low %v226_v23, %v230_v24  ;;  %v3426_v23 = vcombine.low %v131_v1, %v135_v2  ;;  %v147_v24 = vld [vmem:[#allocation2 + $0x148] sm:$0xff] }
  0x4c   :  { %934 = vmatprep.subr.bf16.mxu1 %v3473_v44  ;;  %v65_v44 = vld [vmem:[%s5180_s0 + $0x38] sm:$0xff]  ;;  %v3443_v36 = vcombine.high %v147_v24, %v151_v25  ;;  %v3442_v45 = vcombine.low %v147_v24, %v151_v25  ;;  %v195_v25 = vld [vmem:[#allocation2 + $0x2c8] sm:$0xff] }
  0x4d   :  { %v4328_v52 = vpack.c.bf16 %v65_v44, %v63_v43  ;;  %1159 = vmatpush1.bf16.msra.mxu0 %v3468_v56  ;;  %v75_v43 = vld [vmem:[%s5180_s0 + $0x88] sm:$0xff]  ;;  %v77_v44 = vld [vmem:[%s5180_s0 + $0x98] sm:$0xff]  ;;  %v3450_v56 = vcombine.low %v155_v34, %v159_v35 }
  0x4f   :  { %935 = vmatpush1.bf16.msra.mxu1 %v3472_v53  ;;  %v123_v53 = vld [vmem:[#allocation2 + $0x88] sm:$0xff] }
  0x50   :  { %936 = vmatprep.subr.bf16.mxu1 %v3481_v55  ;;  %v3411_v55 = vcombine.high %v115_v41, %v119_v42  ;;  %v3419_v3 = vcombine.high %v123_v53, %v127_v54  ;;  %v3418_v9 = vcombine.low %v123_v53, %v127_v54  ;;  %v72_v41 = vld [vmem:[%s5180_s0 + $0x70] sm:$0xff]  ;;  %v3509_v42 = vcombine.high %v212_v28, %v216_v29 }
  0x51   :  { %v232_v53 = vld [vmem:[#allocation2 + $0x3f0] sm:$0xff]  ;;  %v3517_v54 = vcombine.high %v220_v38, %v224_v39 }
  0x53   :  { %937 = vmatpush1.bf16.msra.mxu1 %v3480_v61  ;;  %v3477_v61 = vcombine.high %v180_v48, %v184_v49  ;;  %v3451_v48 = vcombine.high %v155_v34, %v159_v35  ;;  %v3508_v49 = vcombine.low %v212_v28, %v216_v29  ;;  %v3913_v29 = vld [vmem:[#allocation4 + $0x24] ss:$8 sps:$4 sm:$0xff]  }
  0x54   :  { %938 = vmatprep.subr.bf16.mxu1 %v3489_v63  ;;  %v69_v63 = vld [vmem:[%s5180_s0 + $0x58] sm:$0xff]  ;;  %v203_v35 = vld [vmem:[#allocation2 + $0x308] sm:$0xff] }
  0x55   :  { %1160 = vmatprep.subr.bf16.mxu0 %v3477_v61  ;;  %v4346_v10 = vpack.c.bf16 %v69_v63, %v67_v62  ;;  %v3516_v61 = vcombine.low %v220_v38, %v224_v39  ;;  %v74_v62 = vld [vmem:[%s5180_s0 + $0x80] sm:$0xff]  ;;  %v76_v63 = vld [vmem:[%s5180_s0 + $0x90] sm:$0xff] }
  0x56   :  { %1161 = vmatpush1.bf16.msra.mxu0 %v3476_v4  ;;  %v179_v4 = vld [vmem:[#allocation2 + $0x248] sm:$0xff]  ;;  %v82_v39 = vld [vmem:[%s5180_s0 + $0xc0] sm:$0xff] }
  0x57   :  { %939 = vmatpush1.bf16.msra.mxu1 %v3488_v5  ;;  %v196_v5 = vld [vmem:[#allocation2 + $0x2d0] sm:$0xff] }
  0x58   :  { %940 = vmatprep.subr.bf16.mxu1 %v3497_v7  ;;  %v3485_v7 = vcombine.high %v188_v57, %v192_v58  ;;  %v3493_v19 = vcombine.high %v196_v5, %v200_v6  ;;  %v4382_v57 = vpack.c.bf16 %v77_v44, %v75_v43  ;;  %v171_v58 = vld [vmem:[#allocation2 + $0x208] sm:$0xff]  ;;  %v89_v44 = vld [vmem:[%s5180_s0 + $0xf8] sm:$0xff] }
  0x5a   :  { %1162 = vmatprep.subr.bf16.mxu0 %v3485_v7  ;;  %v3467_v7 = vcombine.high %v171_v58, %v175_v59 }
  0x5b   :  { %941 = vmatpush1.bf16.msra.mxu1 %v3496_v13  ;;  %v3427_v13 = vcombine.high %v131_v1, %v135_v2  ;;  %1163 = vmatpush1.bf16.msra.mxu0 %v3484_v14  ;;  %v79_v1 = vld [vmem:[%s5180_s0 + $0xa8] sm:$0xff]  ;;  %v81_v2 = vld [vmem:[%s5180_s0 + $0xb8] sm:$0xff] }
  0x5c   :  { %942 = vmatprep.subr.bf16.mxu1 %v3505_v15  ;;  %v204_v15 = vld [vmem:[#allocation2 + $0x310] sm:$0xff]  ;;  %1164 = vmatprep.subr.bf16.mxu0 %v3493_v19  ;;  %v187_v14 = vld [vmem:[#allocation2 + $0x288] sm:$0xff] }
  0x5d   :  { %v3500_v37 = vcombine.low %v204_v15, %v208_v16  ;;  %v80_v19 = vld [vmem:[%s5180_s0 + $0xb0] sm:$0xff] }
  0x5f   :  { %943 = vmatpush1.bf16.msra.mxu1 %v3504_v22  ;;  %v73_v22 = vld [vmem:[%s5180_s0 + $0x78] sm:$0xff] }
  0x60   :  { %944 = vmatprep.subr.bf16.mxu1 %v3513_v27  ;;  %v3492_v27 = vcombine.low %v196_v5, %v200_v6  ;;  %v4364_v33 = vpack.c.bf16 %v73_v22, %v71_v21  ;;  %v183_v5 = vld [vmem:[#allocation2 + $0x268] sm:$0xff]  ;;  %v85_v22 = vld [vmem:[%s5180_s0 + $0xd8] sm:$0xff] }
  0x61   :  { %v3907_v6 = vld [vmem:[#allocation4 + $0x4] ss:$8 sps:$4 sm:$0xff]   ;;  %v3475_v17 = vcombine.high %v179_v4, %v183_v5  ;;  %v3474_v24 = vcombine.low %v179_v4, %v183_v5  ;;  %v3920_v4 = vld [vmem:[#allocation4 + $0x50] ss:$8 sps:$4 sm:$0xff]  }
  0x62   :  { %1165 = vmatpush1.bf16.msra.mxu0 %v3492_v27  ;;  %v83_v21 = vld [vmem:[%s5180_s0 + $0xc8] sm:$0xff]  ;;  %v3908_v27 = vld [vmem:[#allocation4 + $0x10] ss:$8 sps:$4 sm:$0xff]  }
  0x63   :  { %945 = vmatpush1.bf16.msra.mxu1 %v3512_v30  ;;  %v3501_v30 = vcombine.high %v204_v15, %v208_v16  ;;  %v191_v15 = vld [vmem:[#allocation2 + $0x2a8] sm:$0xff]  ;;  %v4420_v34 = vpack.c.bf16 %v85_v22, %v83_v21  ;;  %v121_v21 = vld [vmem:[#allocation2 + $0x78] sm:$0xff] }
  0x64   :  { %946 = vmatprep.subr.bf16.mxu1 %v3521_v32  ;;  %v3434_v32 = vcombine.low %v139_v11, %v143_v12  ;;  %v4398_v11 = vpack.c.bf16 %v76_v63, %v74_v62  ;;  %v3466_v12 = vcombine.low %v171_v58, %v175_v59  ;;  %v3905_v16 = vld [vmem:[#allocation4] ss:$8 sps:$4 sm:$0xff]   ;;  %v3483_v28 = vcombine.high %v187_v14, %v191_v15  ;;  %v3926_v22 = vld [vmem:[#allocation4 + $0x70] ss:$8 sps:$4 sm:$0xff]  }
  0x65   :  { %1166 = vmatprep.subr.bf16.mxu0 %v3501_v30  ;;  %v4418_v30 = vpack.c.bf16 %v80_v19, %v78_v18  ;;  %v219_v58 = vld [vmem:[#allocation2 + $0x388] sm:$0xff]  ;;  %v86_v63 = vld [vmem:[%s5180_s0 + $0xe0] sm:$0xff]  ;;  %v117_v19 = vld [vmem:[#allocation2 + $0x58] sm:$0xff] }
  0x66   :  { %1167 = vmatpush1.bf16.msra.mxu0 %v3500_v37  ;;  %v3911_v37 = vld [vmem:[#allocation4 + $0x20] ss:$8 sps:$4 sm:$0xff]  }
  0x67   :  { %947 = vmatpush1.bf16.msra.mxu1 %v3520_v40  ;;  %v70_v40 = vld [vmem:[%s5180_s0 + $0x60] sm:$0xff]  ;;  %1168 = vmatprep.subr.bf16.mxu0 %v3509_v42  ;;  %v3916_v42 = vld [vmem:[#allocation4 + $0x34] ss:$8 sps:$4 sm:$0xff]   ;;  %v223_v59 = vld [vmem:[#allocation2 + $0x3a8] sm:$0xff] }
  0x68   :  { %1029 = vmatprep.subr.bf16.mxu1 %v3403_v46  ;;  %v163_v46 = vld [vmem:[#allocation2 + $0x1c8] sm:$0xff] }
  0x69   :  { %v3459_v60 = vcombine.high %v163_v46, %v167_v47 }
  0x6a   :  { %949 = vmatmul.mubr.bf16.vlgmr.msra.gmra.mrb[0].mxu1 %v4326_v50  ;;  %1169 = vmatpush1.bf16.msra.mxu0 %v3508_v49 }
  0x6b   :  { %1030 = vmatpush1.bf16.msra.mxu1 %v3402_v51  ;;  %958 = vmatprep.mubr.bf16.mxu1 %v4328_v52  ;;  %v228_v51 = vld [vmem:[#allocation2 + $0x3d0] sm:$0xff] }
  0x6c   :  { %1031 = vmatprep.subr.bf16.mxu1 %v3411_v55  ;;  %v4380_v55 = vpack.c.bf16 %v72_v41, %v70_v40  ;;  %1170 = vmatprep.subr.bf16.mxu0 %v3517_v54  ;;  %v84_v40 = vld [vmem:[%s5180_s0 + $0xd0] sm:$0xff]  ;;  %v87_v41 = vld [vmem:[%s5180_s0 + $0xe8] sm:$0xff] }
  0x6d   :  { %v4438_v49 = vpack.c.bf16 %v84_v40, %v82_v39  ;;  %v4440_v54 = vpack.c.bf16 %v89_v44, %v87_v41  ;;  %v3937_v39 = vld [vmem:[#allocation4 + $0xa4] ss:$8 sps:$4 sm:$0xff]   ;;  %v3935_v44 = vld [vmem:[#allocation4 + $0xa0] ss:$8 sps:$4 sm:$0xff]  }
  0x6e   :  { %1171 = vmatpush1.bf16.msra.mxu0 %v3516_v61  ;;  %v3922_v61 = vld [vmem:[#allocation4 + $0x54] ss:$8 sps:$4 sm:$0xff]  }
  0x6f   :  { %1032 = vmatpush1.bf16.msra.mxu1 %v3410_v0  ;;  %v3525_v0 = vcombine.high %v228_v51, %v232_v53 }
  0x70   :  { %1033 = vmatprep.subr.bf16.mxu1 %v3419_v3  ;;  %v3458_v3 = vcombine.low %v163_v46, %v167_v47  ;;  %v211_v46 = vld [vmem:[#allocation2 + $0x348] sm:$0xff] }
  0x71   :  { %1172 = vmatprep.subr.bf16.mxu0 %v3525_v0  ;;  %v215_v47 = vld [vmem:[#allocation2 + $0x368] sm:$0xff]  ;;  %v88_v0 = vld [vmem:[%s5180_s0 + $0xf0] sm:$0xff] }
  0x72   :  { %959 = vmatmul.mubr.bf16.gmra.mrb[4].mxu1 %v4344_v8  ;;  %v3506_v62 = vcombine.low %v211_v46, %v215_v47  ;;  %v4452_v5 = vpack.c.bf16 %v88_v0, %v86_v63  ;;  %v3946_v63 = vld [vmem:[#allocation4 + $0xd4] ss:$8 sps:$4 sm:$0xff]  }
  0x73   :  { %1034 = vmatpush1.bf16.msra.mxu1 %v3418_v9  ;;  %968 = vmatprep.mubr.bf16.mxu1 %v4346_v10  ;;  %v3524_v9 = vcombine.low %v228_v51, %v232_v53  ;;  %v3919_v51 = vld [vmem:[#allocation4 + $0x44] ss:$8 sps:$4 sm:$0xff]  }
  0x74   :  { %1035 = vmatprep.subr.bf16.mxu1 %v3427_v13  ;;  %v4400_v13 = vpack.c.bf16 %v81_v2, %v79_v1  ;;  %v3515_v1 = vcombine.high %v219_v58, %v223_v59  ;;  %v227_v2 = vld [vmem:[#allocation2 + $0x3c8] sm:$0xff] }
  0x75   :  { %1173 = vmatpush1.bf16.msra.mxu0 %v3524_v9 }
  0x76   :  { %2340 = vmatprep.subr.bf16.mxu0 %v3907_v6  ;;  %v3925_v6 = vld [vmem:[#allocation4 + $0x64] ss:$8 sps:$4 sm:$0xff]  }
  0x77   :  { %1036 = vmatpush1.bf16.msra.mxu1 %v3426_v23  ;;  %v3910_v23 = vld [vmem:[#allocation4 + $0x14] ss:$8 sps:$4 sm:$0xff]  }
  0x78   :  { %1037 = vmatprep.subr.bf16.mxu1 %v3435_v26  ;;  %v199_v26 = vld [vmem:[#allocation2 + $0x2e8] sm:$0xff]  ;;  %1175 = vmatmul.mubr.bf16.vlgmr.msra.gmra.mrb[0].mxu0 %v4326_v50 }
  0x79   :  { %1184 = vmatprep.mubr.bf16.mxu0 %v4328_v52  ;;  %2341 = vmatpush1.bf16.msra.mxu0 %v3905_v16  ;;  %v3491_v38 = vcombine.high %v195_v25, %v199_v26  ;;  %v3490_v43 = vcombine.low %v195_v25, %v199_v26  ;;  %v3928_v16 = vld [vmem:[#allocation4 + $0x74] ss:$8 sps:$4 sm:$0xff]   ;;  %v3415_v25 = vcombine.high %v117_v19, %v121_v21 }
  0x7a   :  { %969 = vmatmul.mubr.bf16.gmra.mrb[8].mxu1 %v4362_v31  ;;  %2342 = vmatprep.subr.bf16.mxu0 %v3910_v23  ;;  %v3931_v23 = vld [vmem:[#allocation4 + $0x84] ss:$8 sps:$4 sm:$0xff]   ;;  %v125_v26 = vld [vmem:[#allocation2 + $0x98] sm:$0xff] }
  0x7b   :  { %1038 = vmatpush1.bf16.msra.mxu1 %v3434_v32  ;;  %978 = vmatprep.mubr.bf16.mxu1 %v4364_v33  ;;  %v3482_v32 = vcombine.low %v187_v14, %v191_v15  ;;  %v113_v14 = vld [vmem:[#allocation2 + $0x38] sm:$0xff]  ;;  %v3923_v15 = vld [vmem:[#allocation4 + $0x60] ss:$8 sps:$4 sm:$0xff]  }
  0x7c   :  { %1039 = vmatprep.subr.bf16.mxu1 %v3443_v36  ;;  %v207_v36 = vld [vmem:[#allocation2 + $0x328] sm:$0xff] }
  0x7d   :  { %2343 = vmatpush1.bf16.msra.mxu0 %v3908_v27  ;;  %v3498_v53 = vcombine.low %v203_v35, %v207_v36  ;;  %v129_v27 = vld [vmem:[#allocation2 + $0xb8] sm:$0xff] }
  0x7e   :  { %2344 = vmatprep.subr.bf16.mxu0 %v3913_v29  ;;  %v3934_v29 = vld [vmem:[#allocation4 + $0x94] ss:$8 sps:$4 sm:$0xff]   ;;  %v3422_v40 = vcombine.low %v125_v26, %v129_v27 }
  0x7f   :  { %1040 = vmatpush1.bf16.msra.mxu1 %v3442_v45  ;;  %v3499_v45 = vcombine.high %v203_v35, %v207_v36  ;;  %v3423_v35 = vcombine.high %v125_v26, %v129_v27  ;;  %v133_v36 = vld [vmem:[#allocation2 + $0xd8] sm:$0xff] }
  0x80   :  { %1041 = vmatprep.subr.bf16.mxu1 %v3451_v48  ;;  %1185 = vmatmul.mubr.bf16.gmra.mrb[4].mxu0 %v4344_v8  ;;  %v3914_v48 = vld [vmem:[#allocation4 + $0x30] ss:$8 sps:$4 sm:$0xff]  }
  0x81   :  { %1194 = vmatprep.mubr.bf16.mxu0 %v4346_v10  ;;  %2345 = vmatpush1.bf16.msra.mxu0 %v3911_v37  ;;  %v137_v37 = vld [vmem:[#allocation2 + $0xf8] sm:$0xff] }
  0x82   :  { %979 = vmatmul.mubr.bf16.gmra.mrb[12].mxu1 %v4380_v55  ;;  %2346 = vmatprep.subr.bf16.mxu0 %v3916_v42  ;;  %v3431_v41 = vcombine.high %v133_v36, %v137_v37  ;;  %v141_v42 = vld [vmem:[#allocation2 + $0x118] sm:$0xff] }
  0x83   :  { %1042 = vmatpush1.bf16.msra.mxu1 %v3450_v56  ;;  %988 = vmatprep.mubr.bf16.mxu1 %v4382_v57  ;;  %v3507_v56 = vcombine.high %v211_v46, %v215_v47  ;;  %v3430_v46 = vcombine.low %v133_v36, %v137_v37  ;;  %v189_v26 = vld [vmem:[#allocation2 + $0x298] sm:$0xff] }
  0x84   :  { %1043 = vmatprep.subr.bf16.mxu1 %v3459_v60  ;;  %v3917_v60 = vld [vmem:[#allocation4 + $0x40] ss:$8 sps:$4 sm:$0xff]   ;;  %v193_v27 = vld [vmem:[#allocation2 + $0x2b8] sm:$0xff] }
  0x85   :  { %2347 = vmatpush1.bf16.msra.mxu0 %v3914_v48  ;;  %v149_v48 = vld [vmem:[#allocation2 + $0x158] sm:$0xff]  ;;  %v3486_v36 = vcombine.low %v189_v26, %v193_v27 }
  0x86   :  { %2348 = vmatprep.subr.bf16.mxu0 %v3919_v51  ;;  %v153_v51 = vld [vmem:[#allocation2 + $0x178] sm:$0xff] }
  0x87   :  { %1044 = vmatpush1.bf16.msra.mxu1 %v3458_v3  ;;  %v231_v3 = vld [vmem:[#allocation2 + $0x3e8] sm:$0xff]  ;;  %v3446_v0 = vcombine.low %v149_v48, %v153_v51 }
  0x88   :  { %1045 = vmatprep.subr.bf16.mxu1 %v3467_v7  ;;  %1195 = vmatmul.mubr.bf16.gmra.mrb[8].mxu0 %v4362_v31  ;;  %v3514_v7 = vcombine.low %v219_v58, %v223_v59  ;;  %v3523_v9 = vcombine.high %v227_v2, %v231_v3  ;;  %v3447_v59 = vcombine.high %v149_v48, %v153_v51 }
  0x89   :  { %1204 = vmatprep.mubr.bf16.mxu0 %v4364_v33  ;;  %2349 = vmatpush1.bf16.msra.mxu0 %v3917_v60  ;;  %v157_v60 = vld [vmem:[#allocation2 + $0x198] sm:$0xff] }
  0x8a   :  { %989 = vmatmul.mubr.bf16.gmra.mrb[16].mxu1 %v4398_v11  ;;  %2350 = vmatprep.subr.bf16.mxu0 %v3922_v61  ;;  %v161_v61 = vld [vmem:[#allocation2 + $0x1b8] sm:$0xff] }
  0x8b   :  { %1046 = vmatpush1.bf16.msra.mxu1 %v3466_v12  ;;  %998 = vmatprep.mubr.bf16.mxu1 %v4400_v13  ;;  %v109_v12 = vld [vmem:[#allocation2 + $0x18] sm:$0xff] }
  0x8c   :  { %1047 = vmatprep.subr.bf16.mxu1 %v3475_v17  ;;  %v3522_v17 = vcombine.low %v227_v2, %v231_v3  ;;  %v3407_v18 = vcombine.high %v109_v12, %v113_v14  ;;  %v165_v2 = vld [vmem:[#allocation2 + $0x1d8] sm:$0xff] }
  0x8d   :  { %2351 = vmatpush1.bf16.msra.mxu0 %v3920_v4  ;;  %v169_v3 = vld [vmem:[#allocation2 + $0x1f8] sm:$0xff] }
  0x8e   :  { %2352 = vmatprep.subr.bf16.mxu0 %v3925_v6  ;;  %v3944_v4 = vld [vmem:[#allocation4 + $0xd0] ss:$8 sps:$4 sm:$0xff]   ;;  %v3949_v6 = vld [vmem:[#allocation4 + $0xe4] ss:$8 sps:$4 sm:$0xff]  }
  0x8f   :  { %1048 = vmatpush1.bf16.msra.mxu1 %v3474_v24  ;;  %v3406_v24 = vcombine.low %v109_v12, %v113_v14  ;;  %v173_v12 = vld [vmem:[#allocation2 + $0x218] sm:$0xff] }
  0x90   :  { %1049 = vmatprep.subr.bf16.mxu1 %v3483_v28  ;;  %1205 = vmatmul.mubr.bf16.gmra.mrb[12].mxu0 %v4380_v55  ;;  %v3929_v28 = vld [vmem:[#allocation4 + $0x80] ss:$8 sps:$4 sm:$0xff]   ;;  %v177_v14 = vld [vmem:[#allocation2 + $0x238] sm:$0xff] }
  0x91   :  { %1214 = vmatprep.mubr.bf16.mxu0 %v4382_v57  ;;  %2353 = vmatpush1.bf16.msra.mxu0 %v3923_v15  ;;  %v3947_v15 = vld [vmem:[#allocation4 + $0xe0] ss:$8 sps:$4 sm:$0xff]  }
  0x92   :  { %999 = vmatmul.mubr.bf16.gmra.mrb[20].mxu1 %v4418_v30  ;;  %2354 = vmatprep.subr.bf16.mxu0 %v3928_v16  ;;  %v3952_v16 = vld [vmem:[#allocation4 + $0xf4] ss:$8 sps:$4 sm:$0xff]  }
  0x93   :  { %1050 = vmatpush1.bf16.msra.mxu1 %v3482_v32  ;;  %1008 = vmatprep.mubr.bf16.mxu1 %v4420_v34  ;;  %v3414_v32 = vcombine.low %v117_v19, %v121_v21  ;;  %v181_v19 = vld [vmem:[#allocation2 + $0x258] sm:$0xff] }
  0x94   :  { %1051 = vmatprep.subr.bf16.mxu1 %v3491_v38  ;;  %v3932_v38 = vld [vmem:[#allocation4 + $0x90] ss:$8 sps:$4 sm:$0xff]  }
  0x95   :  { %2355 = vmatpush1.bf16.msra.mxu0 %v3926_v22  ;;  %v185_v21 = vld [vmem:[#allocation2 + $0x278] sm:$0xff] }
  0x96   :  { %2356 = vmatprep.subr.bf16.mxu0 %v3931_v23  ;;  %v3950_v22 = vld [vmem:[#allocation4 + $0xf0] ss:$8 sps:$4 sm:$0xff]   ;;  %v3955_v23 = vld [vmem:[#allocation4 + $0x104] ss:$8 sps:$4 sm:$0xff]  }
  0x97   :  { %1052 = vmatpush1.bf16.msra.mxu1 %v3490_v43  ;;  %v145_v43 = vld [vmem:[#allocation2 + $0x138] sm:$0xff] }
  0x98   :  { %1053 = vmatprep.subr.bf16.mxu1 %v3499_v45  ;;  %1215 = vmatmul.mubr.bf16.gmra.mrb[16].mxu0 %v4398_v11  ;;  %v3940_v45 = vld [vmem:[#allocation4 + $0xb4] ss:$8 sps:$4 sm:$0xff]   ;;  %v3439_v47 = vcombine.high %v141_v42, %v145_v43  ;;  %v3438_v58 = vcombine.low %v141_v42, %v145_v43 }
  0x99   :  { %1224 = vmatprep.mubr.bf16.mxu0 %v4400_v13  ;;  %2357 = vmatpush1.bf16.msra.mxu0 %v3929_v28  ;;  %v3478_v28 = vcombine.low %v181_v19, %v185_v21  ;;  %v213_v42 = vld [vmem:[#allocation2 + $0x358] sm:$0xff] }
  0x9a   :  { %1009 = vmatmul.mubr.bf16.gmra.mrb[24].mxu1 %v4438_v49  ;;  %2358 = vmatprep.subr.bf16.mxu0 %v3934_v29  ;;  %v3487_v29 = vcombine.high %v189_v26, %v193_v27  ;;  %v217_v43 = vld [vmem:[#allocation2 + $0x378] sm:$0xff] }
  0x9b   :  { %1054 = vmatpush1.bf16.msra.mxu1 %v3498_v53  ;;  %1018 = vmatprep.mubr.bf16.mxu1 %v4440_v54  ;;  %v3938_v53 = vld [vmem:[#allocation4 + $0xb0] ss:$8 sps:$4 sm:$0xff]   ;;  %v3510_v48 = vcombine.low %v213_v42, %v217_v43 }
  0x9c   :  { %1055 = vmatprep.subr.bf16.mxu1 %v3507_v56  ;;  %v3943_v56 = vld [vmem:[#allocation4 + $0xc4] ss:$8 sps:$4 sm:$0xff]  }
  0x9d   :  { %2359 = vmatpush1.bf16.msra.mxu0 %v3932_v38  ;;  %v205_v38 = vld [vmem:[#allocation2 + $0x318] sm:$0xff] }
  0x9e   :  { %2360 = vmatprep.subr.bf16.mxu0 %v3937_v39  ;;  %v209_v39 = vld [vmem:[#allocation2 + $0x338] sm:$0xff] }
  0x9f   :  { %1056 = vmatpush1.bf16.msra.mxu1 %v3506_v62  ;;  %v3941_v62 = vld [vmem:[#allocation4 + $0xc0] ss:$8 sps:$4 sm:$0xff]  }
  0xa0   :  { %1057 = vmatprep.subr.bf16.mxu1 %v3515_v1  ;;  %1225 = vmatmul.mubr.bf16.gmra.mrb[20].mxu0 %v4418_v30  ;;  %v3455_v1 = vcombine.high %v157_v60, %v161_v61 }
  0xa1   :  { %1234 = vmatprep.mubr.bf16.mxu0 %v4420_v34  ;;  %2361 = vmatpush1.bf16.msra.mxu0 %v3935_v44  ;;  %v3502_v44 = vcombine.low %v205_v38, %v209_v39 }
  0xa2   :  { %1019 = vmatmul.mubr.bf16.gmra.mrb[28].mxu1 %v4452_v5  ;;  %2362 = vmatprep.subr.bf16.mxu0 %v3940_v45  ;;  %v3511_v45 = vcombine.high %v213_v42, %v217_v43  ;;  %v3961_v43 = vld [vmem:[#allocation4 + $0x124] ss:$8 sps:$4 sm:$0xff]  }
  0xa3   :  { %1058 = vmatpush1.bf16.msra.mxu1 %v3514_v7  ;;  %1061 = vmatprep.mubr.bf16.mxu1 %v4310_v20  ;;  %v3454_v7 = vcombine.low %v157_v60, %v161_v61 }
  0xa4   :  { %1059 = vmatprep.subr.bf16.mxu1 %v3523_v9  ;;  %v3463_v9 = vcombine.high %v165_v2, %v169_v3 }
  0xa5   :  { %2363 = vmatpush1.bf16.msra.mxu0 %v3938_v53  ;;  %v229_v53 = vld [vmem:[#allocation2 + $0x3d8] sm:$0xff] }
  0xa6   :  { %2364 = vmatprep.subr.bf16.mxu0 %v3943_v56  ;;  %v233_v56 = vld [vmem:[#allocation2 + $0x3f8] sm:$0xff] }
  0xa7   :  { %1060 = vmatpush1.bf16.msra.mxu1 %v3522_v17  ;;  %v3462_v17 = vcombine.low %v165_v2, %v169_v3  ;;  %v3526_v60 = vcombine.low %v229_v53, %v233_v56 }
  0xa8   :  { %1255 = vmatprep.subr.bf16.mxu1 %v3407_v18  ;;  %1235 = vmatmul.mubr.bf16.gmra.mrb[24].mxu0 %v4438_v49  ;;  %v3471_v18 = vcombine.high %v173_v12, %v177_v14 }
  0xa9   :  { %1244 = vmatprep.mubr.bf16.mxu0 %v4440_v54  ;;  %2365 = vmatpush1.bf16.msra.mxu0 %v3941_v62  ;;  %v4060_v62 = vld [vmem:[#allocation4 + $0x354] ss:$8 sps:$4 sm:$0xff]  }
  0xaa   :  { %1062 = vmatmul.mubr.bf16.vlgmr.msra.gmra.mrb[32].mxu1 %v4326_v50  ;;  %2366 = vmatprep.subr.bf16.mxu0 %v3946_v63 }
  0xab   :  { %1256 = vmatpush1.bf16.msra.mxu1 %v3406_v24  ;;  %1071 = vmatprep.mubr.bf16.mxu1 %v4328_v52  ;;  %v3470_v24 = vcombine.low %v173_v12, %v177_v14  ;;  %v4064_v14 = vld [vmem:[#allocation4 + $0x360] ss:$8 sps:$4 sm:$0xff]  }
  0xac   :  { %1257 = vmatprep.subr.bf16.mxu1 %v3415_v25  ;;  %v3479_v25 = vcombine.high %v181_v19, %v185_v21  ;;  %v4072_v21 = vld [vmem:[#allocation4 + $0x374] ss:$8 sps:$4 sm:$0xff]  }
  0xad   :  { %2367 = vmatpush1.bf16.msra.mxu0 %v3944_v4 }
  0xae   :  { %2368 = vmatprep.subr.bf16.mxu0 %v3949_v6 }
  0xaf   :  { %1258 = vmatpush1.bf16.msra.mxu1 %v3414_v32  ;;  %v197_v32 = vld [vmem:[#allocation2 + $0x2d8] sm:$0xff] }
  0xb0   :  { %1259 = vmatprep.subr.bf16.mxu1 %v3423_v35  ;;  %1245 = vmatmul.mubr.bf16.gmra.mrb[28].mxu0 %v4452_v5  ;;  %v201_v35 = vld [vmem:[#allocation2 + $0x2f8] sm:$0xff] }
  0xb1   :  { %2369 = vmatpush1.bf16.msra.mxu0 %v3947_v15  ;;  %v3495_v37 = vcombine.high %v197_v32, %v201_v35 }
  0xb2   :  { %1072 = vmatmul.mubr.bf16.gmra.mrb[36].mxu1 %v4344_v8  ;;  %2370 = vmatprep.subr.bf16.mxu0 %v3952_v16 }
  0xb3   :  { %1260 = vmatpush1.bf16.msra.mxu1 %v3422_v40  ;;  %1081 = vmatprep.mubr.bf16.mxu1 %v4346_v10  ;;  %v3494_v40 = vcombine.low %v197_v32, %v201_v35 }
  0xb4   :  { %1261 = vmatprep.subr.bf16.mxu1 %v3431_v41  ;;  %v3503_v41 = vcombine.high %v205_v38, %v209_v39  ;;  %v3956_v39 = vld [vmem:[#allocation4 + $0x110] ss:$8 sps:$4 sm:$0xff]  }
  0xb5   :  { %2371 = vmatpush1.bf16.msra.mxu0 %v3950_v22 }
  0xb6   :  { %2453 = vmatprep.subr.bf16.mxu0 %v3955_v23 }
  0xb7   :  { %1262 = vmatpush1.bf16.msra.mxu1 %v3430_v46  ;;  %v221_v46 = vld [vmem:[#allocation2 + $0x398] sm:$0xff] }
  0xb8   :  { %1263 = vmatprep.subr.bf16.mxu1 %v3439_v47  ;;  %v225_v47 = vld [vmem:[#allocation2 + $0x3b8] sm:$0xff] }
  0xb9   :  { %v3519_v51 = vcombine.high %v221_v46, %v225_v47 }
  0xba   :  { %1082 = vmatmul.mubr.bf16.gmra.mrb[40].mxu1 %v4362_v31 }
  0xbb   :  { %1264 = vmatpush1.bf16.msra.mxu1 %v3438_v58  ;;  %1091 = vmatprep.mubr.bf16.mxu1 %v4364_v33  ;;  %v3518_v58 = vcombine.low %v221_v46, %v225_v47  ;;  %v4078_v47 = vld [vmem:[#allocation4 + $0x394] ss:$8 sps:$4 sm:$0xff]  }
  0xbc   :  { %1265 = vmatprep.subr.bf16.mxu1 %v3447_v59  ;;  %v3527_v59 = vcombine.high %v229_v53, %v233_v56  ;;  %v3959_v53 = vld [vmem:[#allocation4 + $0x120] ss:$8 sps:$4 sm:$0xff]   ;;  %v4076_v56 = vld [vmem:[#allocation4 + $0x390] ss:$8 sps:$4 sm:$0xff]  }
  0xbf   :  { %1266 = vmatpush1.bf16.msra.mxu1 %v3446_v0  ;;  %v4058_v0 = vld [vmem:[#allocation4 + $0x350] ss:$8 sps:$4 sm:$0xff]  }
  0xc0   :  { %1267 = vmatprep.subr.bf16.mxu1 %v3455_v1 }
  0xc2   :  { %1092 = vmatmul.mubr.bf16.gmra.mrb[44].mxu1 %v4380_v55 }
  0xc3   :  { %1268 = vmatpush1.bf16.msra.mxu1 %v3454_v7  ;;  %1101 = vmatprep.mubr.bf16.mxu1 %v4382_v57 }
  0xc4   :  { %1269 = vmatprep.subr.bf16.mxu1 %v3463_v9  ;;  %v4066_v9 = vld [vmem:[#allocation4 + $0x364] ss:$8 sps:$4 sm:$0xff]  }
  0xc7   :  { %1270 = vmatpush1.bf16.msra.mxu1 %v3462_v17 }
  0xc8   :  { %1271 = vmatprep.subr.bf16.mxu1 %v3471_v18 }
  0xca   :  { %1102 = vmatmul.mubr.bf16.gmra.mrb[48].mxu1 %v4398_v11 }
  0xcb   :  { %1272 = vmatpush1.bf16.msra.mxu1 %v3470_v24  ;;  %1111 = vmatprep.mubr.bf16.mxu1 %v4400_v13  ;;  %v3953_v24 = vld [vmem:[#allocation4 + $0x100] ss:$8 sps:$4 sm:$0xff]  }
  0xcc   :  { %1273 = vmatprep.subr.bf16.mxu1 %v3479_v25  ;;  %v4070_v25 = vld [vmem:[#allocation4 + $0x370] ss:$8 sps:$4 sm:$0xff]  }
  0xcf   :  { %1274 = vmatpush1.bf16.msra.mxu1 %v3478_v28  ;;  %v3958_v28 = vld [vmem:[#allocation4 + $0x114] ss:$8 sps:$4 sm:$0xff]  }
  0xd0   :  { %1275 = vmatprep.subr.bf16.mxu1 %v3487_v29 }
  0xd2   :  { %1112 = vmatmul.mubr.bf16.gmra.mrb[52].mxu1 %v4418_v30 }
  0xd3   :  { %1276 = vmatpush1.bf16.msra.mxu1 %v3486_v36  ;;  %1121 = vmatprep.mubr.bf16.mxu1 %v4420_v34 }
  0xd4   :  { %1277 = vmatprep.subr.bf16.mxu1 %v3495_v37  ;;  %v4075_v37 = vld [vmem:[#allocation4 + $0x384] ss:$8 sps:$4 sm:$0xff]  }
  0xd7   :  { %1278 = vmatpush1.bf16.msra.mxu1 %v3494_v40  ;;  %v4073_v40 = vld [vmem:[#allocation4 + $0x380] ss:$8 sps:$4 sm:$0xff]  }
  0xd8   :  { %1279 = vmatprep.subr.bf16.mxu1 %v3503_v41 }
  0xda   :  { %1122 = vmatmul.mubr.bf16.gmra.mrb[56].mxu1 %v4438_v49 }
  0xdb   :  { %1280 = vmatpush1.bf16.msra.mxu1 %v3502_v44  ;;  %1131 = vmatprep.mubr.bf16.mxu1 %v4440_v54 }
  0xdc   :  { %1281 = vmatprep.subr.bf16.mxu1 %v3511_v45 }
  0xdf   :  { %1282 = vmatpush1.bf16.msra.mxu1 %v3510_v48 }
  0xe0   :  { %1283 = vmatprep.subr.bf16.mxu1 %v3519_v51 }
  0xe2   :  { %1132 = vmatmul.mubr.bf16.gmra.mrb[60].mxu1 %v4452_v5 }
  0xe3   :  { %1284 = vmatpush1.bf16.msra.mxu1 %v3518_v58  ;;  %1287 = vmatprep.mubr.bf16.mxu1 %v4310_v20  ;;  %v4030_v20 = vld [vmem:[#allocation4 + $0x304] ss:$8 sps:$4 sm:$0xff]  }
  0xe4   :  { %1285 = vmatprep.subr.bf16.mxu1 %v3527_v59 }
  0xe7   :  { %1286 = vmatpush1.bf16.msra.mxu1 %v3526_v60  ;;  %v3964_v60 = vld [vmem:[#allocation4 + $0x134] ss:$8 sps:$4 sm:$0xff]  }
  0xe8   :  { %3737 = vmatprep.subr.bf16.mxu1 %v4030_v20 }
  0xea   :  { %1288 = vmatmul.mubr.bf16.vlgmr.msra.gmra.mrb[64].mxu1 %v4326_v50  ;;  %v4028_v50 = vld [vmem:[#allocation4 + $0x300] ss:$8 sps:$4 sm:$0xff]  }
  0xeb   :  { %1297 = vmatprep.mubr.bf16.mxu1 %v4328_v52  ;;  %3753 = vmatpush1.bf16.msra.mxu1 %v4028_v50  ;;  %v4036_v52 = vld [vmem:[#allocation4 + $0x314] ss:$8 sps:$4 sm:$0xff]  }
  0xec   :  { %3738 = vmatprep.subr.bf16.mxu1 %v4036_v52 }
  0xf2   :  { %1298 = vmatmul.mubr.bf16.gmra.mrb[68].mxu1 %v4344_v8  ;;  %v4034_v8 = vld [vmem:[#allocation4 + $0x310] ss:$8 sps:$4 sm:$0xff]  }
  0xf3   :  { %1307 = vmatprep.mubr.bf16.mxu1 %v4346_v10  ;;  %v236_v10 = vlaneseq  ;;  %3754 = vmatpush1.bf16.msra.mxu1 %v4034_v8 }
  0xfa   :  { %1308 = vmatmul.mubr.bf16.gmra.mrb[72].mxu1 %v4362_v31  ;;  %v4042_v31 = vld [vmem:[#allocation4 + $0x324] ss:$8 sps:$4 sm:$0xff]  }
  0xfb   :  { %1317 = vmatprep.mubr.bf16.mxu1 %v4364_v33  ;;  %v4040_v33 = vld [vmem:[#allocation4 + $0x320] ss:$8 sps:$4 sm:$0xff]   ;;  %3739 = vmatprep.subr.bf16.mxu1 %v4042_v31 }
  0xfc   :  { %3755 = vmatpush1.bf16.msra.mxu1 %v4040_v33  ;;  %v3962_v33 = vld [vmem:[#allocation4 + $0x130] ss:$8 sps:$4 sm:$0xff]  }
 0x102   :  { %1318 = vmatmul.mubr.bf16.gmra.mrb[76].mxu1 %v4380_v55  ;;  %v4496_v55 = vshrl.u32 %v236_v10, 7  ;;  %v4081_v10 = vld [vmem:[#allocation4 + $0x3a4] ss:$8 sps:$4 sm:$0xff]  }
 0x103   :  { %1327 = vmatprep.mubr.bf16.mxu1 %v4382_v57  ;;  %v4048_v57 = vld [vmem:[#allocation4 + $0x334] ss:$8 sps:$4 sm:$0xff]  }
 0x104   :  { %3740 = vmatprep.subr.bf16.mxu1 %v4048_v57  ;;  %v4079_v57 = vld [vmem:[#allocation4 + $0x3a0] ss:$8 sps:$4 sm:$0xff]  }
 0x10a   :  { %1328 = vmatmul.mubr.bf16.gmra.mrb[80].mxu1 %v4398_v11  ;;  %v4046_v11 = vld [vmem:[#allocation4 + $0x330] ss:$8 sps:$4 sm:$0xff]  }
 0x10b   :  { %1337 = vmatprep.mubr.bf16.mxu1 %v4400_v13  ;;  %v238_v13 = vsub.s32 0, %v4496_v55  ;;  %3756 = vmatpush1.bf16.msra.mxu1 %v4046_v11 }
 0x112   :  { %1338 = vmatmul.mubr.bf16.gmra.mrb[84].mxu1 %v4418_v30  ;;  %v4502_v30 = vld [vmem:[%s5182_s2] sm:$0xff] }
 0x113   :  { %1347 = vmatprep.mubr.bf16.mxu1 %v4420_v34  ;;  %v242_v34 = vsub.s32 1, %v4496_v55 }
 0x115   :  { %v4513_v61 = vrot.slane %v4502_v30, %v242_v34 }
 0x11a   :  { %1348 = vmatmul.mubr.bf16.gmra.mrb[88].mxu1 %v4438_v49  ;;  %v4054_v49 = vld [vmem:[#allocation4 + $0x344] ss:$8 sps:$4 sm:$0xff]  }
 0x11b   :  { %1357 = vmatprep.mubr.bf16.mxu1 %v4440_v54  ;;  %v4052_v54 = vld [vmem:[#allocation4 + $0x340] ss:$8 sps:$4 sm:$0xff]   ;;  %3741 = vmatprep.subr.bf16.mxu1 %v4054_v49 }
 0x11c   :  { %3757 = vmatpush1.bf16.msra.mxu1 %v4052_v54  ;;  %v3967_v54 = vld [vmem:[#allocation4 + $0x144] ss:$8 sps:$4 sm:$0xff]  }
 0x11d   :  { %3742 = vmatprep.subr.bf16.mxu1 %v4060_v62 }
 0x120   :  { %3758 = vmatpush1.bf16.msra.mxu1 %v4058_v0 }
 0x121   :  { %3743 = vmatprep.subr.bf16.mxu1 %v4066_v9 }
 0x122   :  { %1358 = vmatmul.mubr.bf16.gmra.mrb[92].mxu1 %v4452_v5  ;;  %v4508_v5 = vrot.slane %v4502_v30, %v238_v13 }
 0x124   :  { %3759 = vmatpush1.bf16.msra.mxu1 %v4064_v14 }
 0x125   :  { %3744 = vmatprep.subr.bf16.mxu1 %v4072_v21 }
 0x128   :  { %3760 = vmatpush1.bf16.msra.mxu1 %v4070_v25 }
 0x129   :  { %3745 = vmatprep.subr.bf16.mxu1 %v4075_v37 }
 0x12c   :  { %3761 = vmatpush1.bf16.msra.mxu1 %v4073_v40 }
 0x12d   :  { %3746 = vmatprep.subr.bf16.mxu1 %v4078_v47 }
 0x130   :  { %3762 = vmatpush1.bf16.msra.mxu1 %v4076_v56 }
 0x131   :  { %3747 = vmatprep.subr.bf16.mxu1 %v4081_v10 }
 0x134   :  { %3763 = vmatpush1.bf16.msra.mxu1 %v4079_v57 }
 0x13d   :  { %v950_v63 = vpop.f32.mrb[0].mxu1 }
 0x13e   :  { %v951_v1 = vadd.f32 %v950_v63, %v4508_v5  ;;  %v952_v2 = vpop.f32.mrb[1].mxu1 }
 0x13f   :  { %v953_v3 = vadd.f32 %v952_v2, %v4513_v61  ;;  %v954_v4 = vpop.f32.mrb[2].mxu1 }
 0x140   :  { %v955_v6 = vadd.f32 %v954_v4, %v4508_v5  ;;  %v956_v7 = vpop.f32.mrb[3].mxu1  ;;  %v1368_v15 = vmax.f32 %v951_v1, 0.0  ;;  %v4084_v1 = vld [vmem:[#allocation4 + $0x3b4] ss:$8 sps:$4 sm:$0xff]   ;;  %v3965_v4 = vld [vmem:[#allocation4 + $0x140] ss:$8 sps:$4 sm:$0xff]  }
 0x141   :  { %v957_v12 = vadd.f32 %v956_v7, %v4513_v61  ;;  %v1369_v17 = vmax.f32 %v953_v3, 0.0  ;;  %3748 = vmatprep.subr.bf16.mxu1 %v4084_v1 }
 0x142   :  { %v1376_v16 = vmax.f32 %v955_v6, 0.0  ;;  %v4082_v6 = vld [vmem:[#allocation4 + $0x3b0] ss:$8 sps:$4 sm:$0xff]  }
 0x143   :  { %v1377_v18 = vmax.f32 %v957_v12, 0.0  ;;  %v3970_v12 = vld [vmem:[#allocation4 + $0x154] ss:$8 sps:$4 sm:$0xff]   ;;  %3764 = vmatpush1.bf16.msra.mxu1 %v4082_v6  ;;  %v3977_v6 = vld [vmem:[#allocation4 + $0x180] ss:$8 sps:$4 sm:$0xff]  }
 0x144   :  { %v1496_v19 = vpack.c.bf16 %v1376_v16, %v1368_v15 }
 0x145   :  { %v1497_v22 = vpack.c.bf16 %v1377_v18, %v1369_v17  ;;  %v960_v23 = vpop.f32.mrb[4].mxu1  ;;  %v254_v18 = vsub.s32 4, %v4496_v55 }
 0x146   :  { %v961_v26 = vadd.f32 %v960_v23, %v4508_v5  ;;  %v962_v27 = vpop.f32.mrb[5].mxu1  ;;  %v258_v23 = vsub.s32 5, %v4496_v55 }
 0x147   :  { %v963_v29 = vadd.f32 %v962_v27, %v4513_v61  ;;  %v964_v32 = vpop.f32.mrb[6].mxu1  ;;  %2372 = vmatprep.mubr.bf16.mxu0 %v1497_v22  ;;  %v3968_v22 = vld [vmem:[#allocation4 + $0x150] ss:$8 sps:$4 sm:$0xff]   ;;  %v3973_v27 = vld [vmem:[#allocation4 + $0x164] ss:$8 sps:$4 sm:$0xff]  }
 0x148   :  { %v965_v35 = vadd.f32 %v964_v32, %v4508_v5  ;;  %v966_v36 = vpop.f32.mrb[7].mxu1  ;;  %2373 = vmatmul.mubr.bf16.vlgmr.msra.gmra.mrb[32].mxu0 %v1496_v19  ;;  %v1384_v41 = vmax.f32 %v961_v26, 0.0  ;;  %v4087_v19 = vld [vmem:[#allocation4 + $0x3c4] ss:$8 sps:$4 sm:$0xff]   ;;  %v4537_v40 = vrot.slane %v4502_v30, %v258_v23 }
 0x149   :  { %v967_v38 = vadd.f32 %v966_v36, %v4513_v61  ;;  %2454 = vmatpush1.bf16.msra.mxu0 %v3953_v24  ;;  %v1385_v44 = vmax.f32 %v963_v29, 0.0  ;;  %v4085_v24 = vld [vmem:[#allocation4 + $0x3c0] ss:$8 sps:$4 sm:$0xff]   ;;  %3749 = vmatprep.subr.bf16.mxu1 %v4087_v19  ;;  %v4090_v36 = vld [vmem:[#allocation4 + $0x3d4] ss:$8 sps:$4 sm:$0xff]  }
 0x14a   :  { %v1392_v42 = vmax.f32 %v965_v35, 0.0  ;;  %2455 = vmatprep.subr.bf16.mxu0 %v3958_v28  ;;  %3765 = vmatpush1.bf16.msra.mxu1 %v4085_v24  ;;  %v4534_v35 = vrot.slane %v4502_v30, %v254_v18 }
 0x14b   :  { %v1393_v45 = vmax.f32 %v967_v38, 0.0  ;;  %3750 = vmatprep.subr.bf16.mxu1 %v4090_v36  ;;  %v1176_v47 = vpop.f32.mrb[0].mxu0 }
 0x14c   :  { %v1504_v46 = vpack.c.bf16 %v1392_v42, %v1384_v41  ;;  %v4088_v41 = vld [vmem:[#allocation4 + $0x3d0] ss:$8 sps:$4 sm:$0xff]   ;;  %v1178_v56 = vpop.f32.mrb[1].mxu0 }
 0x14d   :  { %v1505_v48 = vpack.c.bf16 %v1393_v45, %v1385_v44  ;;  %v970_v51 = vpop.f32.mrb[8].mxu1  ;;  %2456 = vmatpush1.bf16.msra.mxu0 %v3956_v39  ;;  %v3971_v39 = vld [vmem:[#allocation4 + $0x160] ss:$8 sps:$4 sm:$0xff]   ;;  %v3976_v44 = vld [vmem:[#allocation4 + $0x174] ss:$8 sps:$4 sm:$0xff]  }
 0x14e   :  { %v971_v58 = vadd.f32 %v970_v51, %v4508_v5  ;;  %v972_v59 = vpop.f32.mrb[9].mxu1  ;;  %2457 = vmatprep.subr.bf16.mxu0 %v3961_v43  ;;  %3766 = vmatpush1.bf16.msra.mxu1 %v4088_v41 }
 0x14f   :  { %v973_v20 = vadd.f32 %v972_v59, %v4513_v61  ;;  %v974_v50 = vpop.f32.mrb[10].mxu1  ;;  %2382 = vmatprep.mubr.bf16.mxu0 %v1505_v48 }
 0x150   :  { %v975_v52 = vadd.f32 %v974_v50, %v4508_v5  ;;  %v976_v8 = vpop.f32.mrb[11].mxu1  ;;  %2383 = vmatmul.mubr.bf16.gmra.mrb[36].mxu0 %v1504_v46  ;;  %v1400_v11 = vmax.f32 %v971_v58, 0.0  ;;  %v4093_v58 = vld [vmem:[#allocation4 + $0x3e4] ss:$8 sps:$4 sm:$0xff]   ;;  %v1180_v50 = vpop.f32.mrb[2].mxu0 }
 0x151   :  { %v977_v31 = vadd.f32 %v976_v8, %v4513_v61  ;;  %2458 = vmatpush1.bf16.msra.mxu0 %v3959_v53  ;;  %v1401_v62 = vmax.f32 %v973_v20, 0.0  ;;  %v1177_v53 = vadd.f32 %v1176_v47, %v4534_v35  ;;  %v1179_v20 = vadd.f32 %v1178_v56, %v4537_v40  ;;  %3751 = vmatprep.subr.bf16.mxu1 %v4093_v58 }
 0x152   :  { %v1408_v49 = vmax.f32 %v975_v52, 0.0  ;;  %2459 = vmatprep.subr.bf16.mxu0 %v3964_v60  ;;  %v3974_v60 = vld [vmem:[#allocation4 + $0x170] ss:$8 sps:$4 sm:$0xff]   ;;  %v4091_v52 = vld [vmem:[#allocation4 + $0x3e0] ss:$8 sps:$4 sm:$0xff]   ;;  %v1181_v57 = vadd.f32 %v1180_v50, %v4534_v35 }
 0x153   :  { %v1409_v63 = vmax.f32 %v977_v31, 0.0  ;;  %v3979_v31 = vld [vmem:[#allocation4 + $0x184] ss:$8 sps:$4 sm:$0xff]   ;;  %3767 = vmatpush1.bf16.msra.mxu1 %v4091_v52 }
 0x154   :  { %v1512_v0 = vpack.c.bf16 %v1408_v49, %v1400_v11  ;;  %v1182_v11 = vpop.f32.mrb[3].mxu0  ;;  %v1380_v1 = vmax.f32 %v1181_v57, 0.0 }
 0x155   :  { %v1513_v2 = vpack.c.bf16 %v1409_v63, %v1401_v62  ;;  %v980_v3 = vpop.f32.mrb[12].mxu1  ;;  %2460 = vmatpush1.bf16.msra.mxu0 %v3962_v33  ;;  %v1372_v33 = vmax.f32 %v1177_v53, 0.0  ;;  %v1373_v62 = vmax.f32 %v1179_v20, 0.0  ;;  %v1183_v63 = vadd.f32 %v1182_v11, %v4537_v40  ;;  %v3983_v53 = vld [vmem:[#allocation4 + $0x1a0] ss:$8 sps:$4 sm:$0xff]  }
 0x156   :  { %v981_v7 = vadd.f32 %v980_v3, %v4508_v5  ;;  %v982_v9 = vpop.f32.mrb[13].mxu1  ;;  %2461 = vmatprep.subr.bf16.mxu0 %v3967_v54 }
 0x157   :  { %v983_v14 = vadd.f32 %v982_v9, %v4513_v61  ;;  %v984_v15 = vpop.f32.mrb[14].mxu1  ;;  %2392 = vmatprep.mubr.bf16.mxu0 %v1513_v2  ;;  %v4096_v2 = vld [vmem:[#allocation4 + $0x3f4] ss:$8 sps:$4 sm:$0xff]   ;;  %v4094_v9 = vld [vmem:[#allocation4 + $0x3f0] ss:$8 sps:$4 sm:$0xff]  }
 0x158   :  { %v985_v16 = vadd.f32 %v984_v15, %v4508_v5  ;;  %v986_v17 = vpop.f32.mrb[15].mxu1  ;;  %2393 = vmatmul.mubr.bf16.gmra.mrb[40].mxu0 %v1512_v0  ;;  %v1416_v25 = vmax.f32 %v981_v7, 0.0  ;;  %v1381_v7 = vmax.f32 %v1183_v63, 0.0  ;;  %v3982_v15 = vld [vmem:[#allocation4 + $0x194] ss:$8 sps:$4 sm:$0xff]   ;;  %3752 = vmatprep.subr.bf16.mxu1 %v4096_v2 }
 0x159   :  { %v987_v21 = vadd.f32 %v986_v17, %v4513_v61  ;;  %2462 = vmatpush1.bf16.msra.mxu0 %v3965_v4  ;;  %v1417_v28 = vmax.f32 %v983_v14, 0.0  ;;  %3768 = vmatpush1.bf16.msra.mxu1 %v4094_v9  ;;  %v3991_v2 = vld [vmem:[#allocation4 + $0x1c4] ss:$8 sps:$4 sm:$0xff]  }
 0x15a   :  { %v1424_v26 = vmax.f32 %v985_v16, 0.0  ;;  %2463 = vmatprep.subr.bf16.mxu0 %v3970_v12  ;;  %v4548_v16 = vpack.c.bf16 %v1380_v1, %v1372_v33  ;;  %v4551_v19 = vpack.c.bf16 %v1381_v7, %v1373_v62 }
 0x15b   :  { %v1425_v29 = vmax.f32 %v987_v21, 0.0  ;;  %v1186_v21 = vpop.f32.mrb[4].mxu0 }
 0x15c   :  { %v1520_v32 = vpack.c.bf16 %v1424_v26, %v1416_v25  ;;  %v1187_v24 = vadd.f32 %v1186_v21, %v4534_v35  ;;  %v1188_v25 = vpop.f32.mrb[5].mxu0 }
 0x15d   :  { %v1521_v37 = vpack.c.bf16 %v1425_v29, %v1417_v28  ;;  %v990_v38 = vpop.f32.mrb[16].mxu1  ;;  %2464 = vmatpush1.bf16.msra.mxu0 %v3968_v22  ;;  %v1189_v28 = vadd.f32 %v1188_v25, %v4537_v40  ;;  %v1190_v29 = vpop.f32.mrb[6].mxu0 }
 0x15e   :  { %v991_v42 = vadd.f32 %v990_v38, %v4508_v5  ;;  %v992_v43 = vpop.f32.mrb[17].mxu1  ;;  %2465 = vmatprep.subr.bf16.mxu0 %v3973_v27  ;;  %v3980_v27 = vld [vmem:[#allocation4 + $0x190] ss:$8 sps:$4 sm:$0xff]   ;;  %v1388_v38 = vmax.f32 %v1187_v24, 0.0  ;;  %v1192_v41 = vpop.f32.mrb[7].mxu0  ;;  %v250_v24 = vsub.s32 3, %v4496_v55 }
 0x15f   :  { %v993_v45 = vadd.f32 %v992_v43, %v4513_v61  ;;  %v994_v46 = vpop.f32.mrb[18].mxu1  ;;  %2402 = vmatprep.mubr.bf16.mxu0 %v1521_v37  ;;  %v3985_v37 = vld [vmem:[#allocation4 + $0x1a4] ss:$8 sps:$4 sm:$0xff]  }
 0x160   :  { %v995_v48 = vadd.f32 %v994_v46, %v4508_v5  ;;  %v996_v51 = vpop.f32.mrb[19].mxu1  ;;  %2403 = vmatmul.mubr.bf16.gmra.mrb[44].mxu0 %v1520_v32  ;;  %v1432_v8 = vmax.f32 %v991_v42, 0.0 }
 0x161   :  { %v997_v59 = vadd.f32 %v996_v51, %v4513_v61  ;;  %2466 = vmatpush1.bf16.msra.mxu0 %v3971_v39  ;;  %v1433_v49 = vmax.f32 %v993_v45, 0.0  ;;  %v1191_v39 = vadd.f32 %v1190_v29, %v4534_v35  ;;  %v1193_v45 = vadd.f32 %v1192_v41, %v4537_v40 }
 0x162   :  { %v1440_v10 = vmax.f32 %v995_v48, 0.0  ;;  %2467 = vmatprep.subr.bf16.mxu0 %v3976_v44  ;;  %v1389_v44 = vmax.f32 %v1189_v28, 0.0  ;;  %v3994_v28 = vld [vmem:[#allocation4 + $0x1d4] ss:$8 sps:$4 sm:$0xff]  }
 0x163   :  { %v1441_v54 = vmax.f32 %v997_v59, 0.0  ;;  %v1396_v47 = vmax.f32 %v1191_v39, 0.0  ;;  %v1397_v56 = vmax.f32 %v1193_v45, 0.0  ;;  %v3992_v45 = vld [vmem:[#allocation4 + $0x1d0] ss:$8 sps:$4 sm:$0xff]  }
 0x164   :  { %v1528_v0 = vpack.c.bf16 %v1440_v10, %v1432_v8  ;;  %v1196_v10 = vpop.f32.mrb[8].mxu0 }
 0x165   :  { %v1529_v3 = vpack.c.bf16 %v1441_v54, %v1433_v49  ;;  %v1000_v4 = vpop.f32.mrb[20].mxu1  ;;  %2468 = vmatpush1.bf16.msra.mxu0 %v3974_v60  ;;  %v3988_v60 = vld [vmem:[#allocation4 + $0x1b4] ss:$8 sps:$4 sm:$0xff]   ;;  %v4560_v20 = vpack.c.bf16 %v1396_v47, %v1388_v38  ;;  %v4563_v8 = vpack.c.bf16 %v1397_v56, %v1389_v44  ;;  %v1197_v57 = vadd.f32 %v1196_v10, %v4534_v35  ;;  %v1198_v11 = vpop.f32.mrb[9].mxu0  ;;  %v3986_v54 = vld [vmem:[#allocation4 + $0x1b0] ss:$8 sps:$4 sm:$0xff]  }
 0x166   :  { %v1001_v12 = vadd.f32 %v1000_v4, %v4508_v5  ;;  %v1002_v14 = vpop.f32.mrb[21].mxu1  ;;  %2469 = vmatprep.subr.bf16.mxu0 %v3979_v31  ;;  %v1199_v62 = vadd.f32 %v1198_v11, %v4537_v40  ;;  %v1200_v63 = vpop.f32.mrb[10].mxu0  ;;  %v4586_v47 = vrot.slane %v4502_v30, %v250_v24  ;;  %v3997_v56 = vld [vmem:[#allocation4 + $0x1e4] ss:$8 sps:$4 sm:$0xff]   ;;  %v3995_v11 = vld [vmem:[#allocation4 + $0x1e0] ss:$8 sps:$4 sm:$0xff]  }
 0x167   :  { %v1003_v17 = vadd.f32 %v1002_v14, %v4513_v61  ;;  %v1004_v18 = vpop.f32.mrb[22].mxu1  ;;  %2412 = vmatprep.mubr.bf16.mxu0 %v1529_v3  ;;  %v1404_v3 = vmax.f32 %v1197_v57, 0.0  ;;  %v1201_v4 = vadd.f32 %v1200_v63, %v4534_v35  ;;  %v4000_v63 = vld [vmem:[#allocation4 + $0x1f4] ss:$8 sps:$4 sm:$0xff]  }
 0x168   :  { %v1005_v22 = vadd.f32 %v1004_v18, %v4508_v5  ;;  %v1006_v23 = vpop.f32.mrb[23].mxu1  ;;  %2413 = vmatmul.mubr.bf16.gmra.mrb[48].mxu0 %v1528_v0  ;;  %v1448_v32 = vmax.f32 %v1001_v12, 0.0  ;;  %v1405_v12 = vmax.f32 %v1199_v62, 0.0 }
 0x169   :  { %v1007_v26 = vadd.f32 %v1006_v23, %v4513_v61  ;;  %2470 = vmatpush1.bf16.msra.mxu0 %v3977_v6  ;;  %v1449_v42 = vmax.f32 %v1003_v17, 0.0  ;;  %v1202_v6 = vpop.f32.mrb[11].mxu0  ;;  %v1412_v17 = vmax.f32 %v1201_v4, 0.0  ;;  %v246_v23 = vsub.s32 2, %v4496_v55 }
 0x16a   :  { %v1456_v36 = vmax.f32 %v1005_v22, 0.0  ;;  %2471 = vmatprep.subr.bf16.mxu0 %v3982_v15  ;;  %v1203_v14 = vadd.f32 %v1202_v6, %v4537_v40  ;;  %v3989_v22 = vld [vmem:[#allocation4 + $0x1c0] ss:$8 sps:$4 sm:$0xff]   ;;  %v1206_v38 = vpop.f32.mrb[12].mxu0 }
 0x16b   :  { %v1457_v43 = vmax.f32 %v1007_v26, 0.0  ;;  %v4574_v29 = vpack.c.bf16 %v1412_v17, %v1404_v3 }
 0x16c   :  { %v1536_v46 = vpack.c.bf16 %v1456_v36, %v1448_v32  ;;  %v1413_v25 = vmax.f32 %v1203_v14, 0.0 }
 0x16d   :  { %v1537_v48 = vpack.c.bf16 %v1457_v43, %v1449_v42  ;;  %v1010_v51 = vpop.f32.mrb[24].mxu1  ;;  %2472 = vmatpush1.bf16.msra.mxu0 %v3980_v27  ;;  %v1207_v42 = vadd.f32 %v1206_v38, %v4534_v35  ;;  %v1208_v43 = vpop.f32.mrb[13].mxu0 }
 0x16e   :  { %v1011_v58 = vadd.f32 %v1010_v51, %v4508_v5  ;;  %v1012_v59 = vpop.f32.mrb[25].mxu1  ;;  %2473 = vmatprep.subr.bf16.mxu0 %v3985_v37  ;;  %v4577_v37 = vpack.c.bf16 %v1413_v25, %v1405_v12  ;;  %v1210_v51 = vpop.f32.mrb[14].mxu0 }
 0x16f   :  { %v1013_v50 = vadd.f32 %v1012_v59, %v4513_v61  ;;  %v1014_v52 = vpop.f32.mrb[26].mxu1  ;;  %2422 = vmatprep.mubr.bf16.mxu0 %v1537_v48  ;;  %v1209_v48 = vadd.f32 %v1208_v43, %v4537_v40  ;;  %v1211_v59 = vadd.f32 %v1210_v51, %v4534_v35  ;;  %v4001_v43 = vld [vmem:[#allocation4 + $0x200] ss:$8 sps:$4 sm:$0xff]   ;;  %v4006_v51 = vld [vmem:[#allocation4 + $0x214] ss:$8 sps:$4 sm:$0xff]  }
 0x170   :  { %v1015_v31 = vadd.f32 %v1014_v52, %v4508_v5  ;;  %v1016_v33 = vpop.f32.mrb[27].mxu1  ;;  %2423 = vmatmul.mubr.bf16.gmra.mrb[52].mxu0 %v1536_v46  ;;  %v1464_v0 = vmax.f32 %v1011_v58, 0.0  ;;  %v4583_v46 = vrot.slane %v4502_v30, %v246_v23  ;;  %v1420_v58 = vmax.f32 %v1207_v42, 0.0  ;;  %v4003_v23 = vld [vmem:[#allocation4 + $0x204] ss:$8 sps:$4 sm:$0xff]  }
 0x171   :  { %v1017_v49 = vadd.f32 %v1016_v33, %v4513_v61  ;;  %2474 = vmatpush1.bf16.msra.mxu0 %v3983_v53  ;;  %v1465_v7 = vmax.f32 %v1013_v50, 0.0  ;;  %v1421_v52 = vmax.f32 %v1209_v48, 0.0  ;;  %v1428_v33 = vmax.f32 %v1211_v59, 0.0 }
 0x172   :  { %v1472_v1 = vmax.f32 %v1015_v31, 0.0  ;;  %2475 = vmatprep.subr.bf16.mxu0 %v3988_v60  ;;  %v1212_v60 = vpop.f32.mrb[15].mxu0 }
 0x173   :  { %v1473_v9 = vmax.f32 %v1017_v49, 0.0  ;;  %v1213_v10 = vadd.f32 %v1212_v60, %v4537_v40  ;;  %v1216_v4 = vpop.f32.mrb[16].mxu0 }
 0x174   :  { %v1544_v15 = vpack.c.bf16 %v1472_v1, %v1464_v0  ;;  %v4592_v0 = vpack.c.bf16 %v1428_v33, %v1420_v58  ;;  %v1218_v12 = vpop.f32.mrb[17].mxu0 }
 0x175   :  { %v1545_v18 = vpack.c.bf16 %v1473_v9, %v1465_v7  ;;  %v1020_v21 = vpop.f32.mrb[28].mxu1  ;;  %2476 = vmatpush1.bf16.msra.mxu0 %v3986_v54  ;;  %v1429_v49 = vmax.f32 %v1213_v10, 0.0  ;;  %v1217_v9 = vadd.f32 %v1216_v4, %v4534_v35  ;;  %v1219_v17 = vadd.f32 %v1218_v12, %v4537_v40 }
 0x176   :  { %v1021_v26 = vadd.f32 %v1020_v21, %v4508_v5  ;;  %v1022_v27 = vpop.f32.mrb[29].mxu1  ;;  %2477 = vmatprep.subr.bf16.mxu0 %v3991_v2 }
 0x177   :  { %v1023_v32 = vadd.f32 %v1022_v27, %v4513_v61  ;;  %v1024_v36 = vpop.f32.mrb[30].mxu1  ;;  %2432 = vmatprep.mubr.bf16.mxu0 %v1545_v18  ;;  %v4595_v3 = vpack.c.bf16 %v1429_v49, %v1421_v52  ;;  %v1220_v18 = vpop.f32.mrb[18].mxu0  ;;  %v1436_v24 = vmax.f32 %v1217_v9, 0.0  ;;  %v4009_v49 = vld [vmem:[#allocation4 + $0x224] ss:$8 sps:$4 sm:$0xff]  }
 0x178   :  { %v1025_v39 = vadd.f32 %v1024_v36, %v4508_v5  ;;  %v1026_v41 = vpop.f32.mrb[31].mxu1  ;;  %2433 = vmatmul.mubr.bf16.gmra.mrb[56].mxu0 %v1544_v15  ;;  %v1480_v53 = vmax.f32 %v1021_v26, 0.0  ;;  %v3998_v15 = vld [vmem:[#allocation4 + $0x1f0] ss:$8 sps:$4 sm:$0xff]   ;;  %v1221_v25 = vadd.f32 %v1220_v18, %v4534_v35  ;;  %v1222_v26 = vpop.f32.mrb[19].mxu0 }
 0x179   :  { %v1027_v44 = vadd.f32 %v1026_v41, %v4513_v61  ;;  %2478 = vmatpush1.bf16.msra.mxu0 %v3989_v22  ;;  %v1481_v61 = vmax.f32 %v1023_v32, 0.0  ;;  %v1437_v32 = vmax.f32 %v1219_v17, 0.0  ;;  %v1223_v36 = vadd.f32 %v1222_v26, %v4537_v40  ;;  %v1226_v59 = vpop.f32.mrb[20].mxu0 }
 0x17a   :  { %v1488_v5 = vmax.f32 %v1025_v39, 0.0  ;;  %2479 = vmatprep.subr.bf16.mxu0 %v3994_v28  ;;  %v1444_v39 = vmax.f32 %v1221_v25, 0.0  ;;  %v1228_v52 = vpop.f32.mrb[21].mxu0 }
 0x17b   :  { %v1489_v50 = vmax.f32 %v1027_v44, 0.0  ;;  %v1445_v44 = vmax.f32 %v1223_v36, 0.0  ;;  %v1229_v33 = vadd.f32 %v1228_v52, %v4537_v40 }
 0x17c   :  { %v1552_v31 = vpack.c.bf16 %v1488_v5, %v1480_v53  ;;  %v4604_v53 = vpack.c.bf16 %v1444_v39, %v1436_v24 }
 0x17d   :  { %v1553_v30 = vpack.c.bf16 %v1489_v50, %v1481_v61  ;;  %v1063_v57 = vpop.f32.mrb[32].mxu1  ;;  %2480 = vmatpush1.bf16.msra.mxu0 %v3992_v45  ;;  %v4607_v58 = vpack.c.bf16 %v1445_v44, %v1437_v32  ;;  %v1227_v50 = vadd.f32 %v1226_v59, %v4534_v35  ;;  %v1453_v4 = vmax.f32 %v1229_v33, 0.0 }
 0x17e   :  { %v1064_v54 = vadd.f32 %v1063_v57, %v4583_v46  ;;  %v1065_v62 = vpop.f32.mrb[33].mxu1  ;;  %2481 = vmatprep.subr.bf16.mxu0 %v3997_v56 }
 0x17f   :  { %v1066_v1 = vadd.f32 %v1065_v62, %v4586_v47  ;;  %v1067_v2 = vpop.f32.mrb[34].mxu1  ;;  %2442 = vmatprep.mubr.bf16.mxu0 %v1553_v30  ;;  %v1230_v30 = vpop.f32.mrb[22].mxu0 }
 0x180   :  { %v1068_v6 = vadd.f32 %v1067_v2, %v4583_v46  ;;  %v1069_v7 = vpop.f32.mrb[35].mxu1  ;;  %2443 = vmatmul.mubr.bf16.gmra.mrb[60].mxu0 %v1552_v31  ;;  %v1370_v21 = vmax.f32 %v1064_v54, 0.0  ;;  %v4004_v31 = vld [vmem:[#allocation4 + $0x210] ss:$8 sps:$4 sm:$0xff]   ;;  %v1452_v54 = vmax.f32 %v1227_v50, 0.0  ;;  %v1231_v62 = vadd.f32 %v1230_v30, %v4534_v35 }
 0x181   :  { %v1070_v14 = vadd.f32 %v1069_v7, %v4586_v47  ;;  %2482 = vmatpush1.bf16.msra.mxu0 %v3995_v11  ;;  %v1371_v27 = vmax.f32 %v1066_v1, 0.0  ;;  %v4013_v30 = vld [vmem:[#allocation4 + $0x240] ss:$8 sps:$4 sm:$0xff]  }
 0x182   :  { %v1378_v22 = vmax.f32 %v1068_v6, 0.0  ;;  %2483 = vmatprep.subr.bf16.mxu0 %v4000_v63  ;;  %v1232_v63 = vpop.f32.mrb[23].mxu0  ;;  %v1460_v9 = vmax.f32 %v1231_v62, 0.0 }
 0x183   :  { %v1379_v28 = vmax.f32 %v1070_v14, 0.0  ;;  %v1233_v6 = vadd.f32 %v1232_v63, %v4537_v40 }
 0x184   :  { %v1498_v38 = vpack.c.bf16 %v1378_v22, %v1370_v21  ;;  %v4012_v22 = vld [vmem:[#allocation4 + $0x234] ss:$8 sps:$4 sm:$0xff]  }
 0x185   :  { %v1499_v41 = vpack.c.bf16 %v1379_v28, %v1371_v27  ;;  %v1073_v42 = vpop.f32.mrb[36].mxu1  ;;  %2484 = vmatpush1.bf16.msra.mxu0 %v3998_v15  ;;  %v4007_v15 = vld [vmem:[#allocation4 + $0x220] ss:$8 sps:$4 sm:$0xff]   ;;  %v1461_v17 = vmax.f32 %v1233_v6, 0.0  ;;  %v1236_v27 = vpop.f32.mrb[24].mxu0 }
 0x186   :  { %v1074_v45 = vadd.f32 %v1073_v42, %v4583_v46  ;;  %v1075_v48 = vpop.f32.mrb[37].mxu1  ;;  %2566 = vmatprep.subr.bf16.mxu0 %v4003_v23  ;;  %v4616_v23 = vpack.c.bf16 %v1460_v9, %v1452_v54  ;;  %v1237_v36 = vadd.f32 %v1236_v27, %v4534_v35  ;;  %v4018_v54 = vld [vmem:[#allocation4 + $0x254] ss:$8 sps:$4 sm:$0xff]  }
 0x187   :  { %v1076_v5 = vadd.f32 %v1075_v48, %v4586_v47  ;;  %v1077_v56 = vpop.f32.mrb[38].mxu1  ;;  %2485 = vmatprep.mubr.bf16.mxu0 %v1499_v41  ;;  %v4619_v26 = vpack.c.bf16 %v1461_v17, %v1453_v4  ;;  %v4010_v41 = vld [vmem:[#allocation4 + $0x230] ss:$8 sps:$4 sm:$0xff]   ;;  %v4015_v48 = vld [vmem:[#allocation4 + $0x244] ss:$8 sps:$4 sm:$0xff]  }
 0x188   :  { %v1078_v60 = vadd.f32 %v1077_v56, %v4583_v46  ;;  %v1079_v61 = vpop.f32.mrb[39].mxu1  ;;  %2486 = vmatmul.mubr.bf16.vlgmr.msra.gmra.mrb[32].mxu0 %v1498_v38  ;;  %v1386_v57 = vmax.f32 %v1074_v45, 0.0  ;;  %v1238_v38 = vpop.f32.mrb[25].mxu0 }
 0x189   :  { %v1080_v10 = vadd.f32 %v1079_v61, %v4586_v47  ;;  %2567 = vmatpush1.bf16.msra.mxu0 %v4001_v43  ;;  %v1387_v1 = vmax.f32 %v1076_v5, 0.0  ;;  %v1239_v42 = vadd.f32 %v1238_v38, %v4537_v40  ;;  %v1240_v43 = vpop.f32.mrb[26].mxu0 }
 0x18a   :  { %v1394_v11 = vmax.f32 %v1078_v60, 0.0  ;;  %2568 = vmatprep.subr.bf16.mxu0 %v4006_v51  ;;  %v1468_v51 = vmax.f32 %v1237_v36, 0.0  ;;  %v1241_v5 = vadd.f32 %v1240_v43, %v4534_v35  ;;  %v1242_v56 = vpop.f32.mrb[27].mxu0 }
 0x18b   :  { %v1395_v2 = vmax.f32 %v1080_v10, 0.0  ;;  %v1469_v61 = vmax.f32 %v1239_v42, 0.0  ;;  %v1243_v50 = vadd.f32 %v1242_v56, %v4537_v40  ;;  %v1246_v4 = vpop.f32.mrb[28].mxu0  ;;  %v4024_v56 = vld [vmem:[#allocation4 + $0x274] ss:$8 sps:$4 sm:$0xff]  }
 0x18c   :  { %v1506_v7 = vpack.c.bf16 %v1394_v11, %v1386_v57  ;;  %v1476_v10 = vmax.f32 %v1241_v5, 0.0  ;;  %v1247_v9 = vadd.f32 %v1246_v4, %v4534_v35 }
 0x18d   :  { %v1507_v12 = vpack.c.bf16 %v1395_v2, %v1387_v1  ;;  %v1083_v14 = vpop.f32.mrb[40].mxu1  ;;  %2569 = vmatpush1.bf16.msra.mxu0 %v4004_v31  ;;  %v1477_v57 = vmax.f32 %v1243_v50, 0.0 }
 0x18e   :  { %v1084_v18 = vadd.f32 %v1083_v14, %v4583_v46  ;;  %v1085_v21 = vpop.f32.mrb[41].mxu1  ;;  %2570 = vmatprep.subr.bf16.mxu0 %v4009_v49  ;;  %v4628_v62 = vpack.c.bf16 %v1476_v10, %v1468_v51  ;;  %v4022_v10 = vld [vmem:[#allocation4 + $0x270] ss:$8 sps:$4 sm:$0xff]  }
 0x18f   :  { %v1086_v24 = vadd.f32 %v1085_v21, %v4586_v47  ;;  %v1087_v25 = vpop.f32.mrb[42].mxu1  ;;  %2495 = vmatprep.mubr.bf16.mxu0 %v1507_v12  ;;  %v4631_v2 = vpack.c.bf16 %v1477_v57, %v1469_v61  ;;  %v1248_v12 = vpop.f32.mrb[29].mxu0 }
 0x190   :  { %v1088_v28 = vadd.f32 %v1087_v25, %v4583_v46  ;;  %v1089_v32 = vpop.f32.mrb[43].mxu1  ;;  %2496 = vmatmul.mubr.bf16.gmra.mrb[36].mxu0 %v1506_v7  ;;  %v1402_v44 = vmax.f32 %v1084_v18, 0.0  ;;  %v1249_v17 = vadd.f32 %v1248_v12, %v4537_v40  ;;  %v1250_v18 = vpop.f32.mrb[30].mxu0  ;;  %v1484_v25 = vmax.f32 %v1247_v9, 0.0 }
 0x191   :  { %v1090_v39 = vadd.f32 %v1089_v32, %v4586_v47  ;;  %2571 = vmatpush1.bf16.msra.mxu0 %v4007_v15  ;;  %v1403_v59 = vmax.f32 %v1086_v24, 0.0  ;;  %v4016_v15 = vld [vmem:[#allocation4 + $0x250] ss:$8 sps:$4 sm:$0xff]   ;;  %v4021_v24 = vld [vmem:[#allocation4 + $0x264] ss:$8 sps:$4 sm:$0xff]   ;;  %v1251_v27 = vadd.f32 %v1250_v18, %v4534_v35 }
 0x192   :  { %v1410_v45 = vmax.f32 %v1088_v28, 0.0  ;;  %2572 = vmatprep.subr.bf16.mxu0 %v4012_v22  ;;  %v1252_v28 = vpop.f32.mrb[31].mxu0  ;;  %v1485_v38 = vmax.f32 %v1249_v17, 0.0  ;;  %v4031_v18 = vld [vmem:[#allocation4 + $0x290] ss:$8 sps:$4 sm:$0xff]  }
 0x193   :  { %v1411_v60 = vmax.f32 %v1090_v39, 0.0  ;;  %v1253_v39 = vadd.f32 %v1252_v28, %v4537_v40  ;;  %v1492_v42 = vmax.f32 %v1251_v27, 0.0 }
 0x194   :  { %v1514_v52 = vpack.c.bf16 %v1410_v45, %v1402_v44  ;;  %v4019_v45 = vld [vmem:[#allocation4 + $0x260] ss:$8 sps:$4 sm:$0xff]  }
 0x195   :  { %v1515_v31 = vpack.c.bf16 %v1411_v60, %v1403_v59  ;;  %v1093_v33 = vpop.f32.mrb[44].mxu1  ;;  %2573 = vmatpush1.bf16.msra.mxu0 %v4010_v41  ;;  %v4640_v59 = vpack.c.bf16 %v1492_v42, %v1484_v25  ;;  %v4045_v42 = vld [vmem:[#allocation4 + $0x2b4] ss:$8 sps:$4 sm:$0xff]  }
 0x196   :  { %v1094_v11 = vadd.f32 %v1093_v33, %v4583_v46  ;;  %v1095_v49 = vpop.f32.mrb[45].mxu1  ;;  %2574 = vmatprep.subr.bf16.mxu0 %v4015_v48  ;;  %v1493_v48 = vmax.f32 %v1253_v39, 0.0 }
 0x197   :  { %v1096_v63 = vadd.f32 %v1095_v49, %v4586_v47  ;;  %v1097_v1 = vpop.f32.mrb[46].mxu1  ;;  %2505 = vmatprep.mubr.bf16.mxu0 %v1515_v31 }
 0x198   :  { %v1098_v6 = vadd.f32 %v1097_v1, %v4583_v46  ;;  %v1099_v7 = vpop.f32.mrb[47].mxu1  ;;  %2506 = vmatmul.mubr.bf16.gmra.mrb[40].mxu0 %v1514_v52  ;;  %v1418_v21 = vmax.f32 %v1094_v11, 0.0  ;;  %v4643_v61 = vpack.c.bf16 %v1493_v48, %v1485_v38  ;;  %v4025_v1 = vld [vmem:[#allocation4 + $0x280] ss:$8 sps:$4 sm:$0xff]  }
 0x199   :  { %v1100_v14 = vadd.f32 %v1099_v7, %v4586_v47  ;;  %2575 = vmatpush1.bf16.msra.mxu0 %v4013_v30  ;;  %v1419_v32 = vmax.f32 %v1096_v63, 0.0  ;;  %v4027_v30 = vld [vmem:[#allocation4 + $0x284] ss:$8 sps:$4 sm:$0xff]   ;;  %v4033_v7 = vld [vmem:[#allocation4 + $0x294] ss:$8 sps:$4 sm:$0xff]  }
 0x19a   :  { %v1426_v22 = vmax.f32 %v1098_v6, 0.0  ;;  %2576 = vmatprep.subr.bf16.mxu0 %v4018_v54  ;;  %v4037_v38 = vld [vmem:[#allocation4 + $0x2a0] ss:$8 sps:$4 sm:$0xff]  }
 0x19b   :  { %v1427_v36 = vmax.f32 %v1100_v14, 0.0 }
 0x19c   :  { %v1522_v41 = vpack.c.bf16 %v1426_v22, %v1418_v21 }
 0x19d   :  { %v1523_v43 = vpack.c.bf16 %v1427_v36, %v1419_v32  ;;  %v1103_v44 = vpop.f32.mrb[48].mxu1  ;;  %2577 = vmatpush1.bf16.msra.mxu0 %v4016_v15 }
 0x19e   :  { %v1104_v51 = vadd.f32 %v1103_v44, %v4583_v46  ;;  %v1105_v5 = vpop.f32.mrb[49].mxu1  ;;  %2578 = vmatprep.subr.bf16.mxu0 %v4021_v24  ;;  %v4039_v24 = vld [vmem:[#allocation4 + $0x2a4] ss:$8 sps:$4 sm:$0xff]  }
 0x19f   :  { %v1106_v35 = vadd.f32 %v1105_v5, %v4586_v47  ;;  %v1107_v60 = vpop.f32.mrb[50].mxu1  ;;  %2515 = vmatprep.mubr.bf16.mxu0 %v1523_v43  ;;  %v4043_v5 = vld [vmem:[#allocation4 + $0x2b0] ss:$8 sps:$4 sm:$0xff]  }
 0x1a0   :  { %v1108_v40 = vadd.f32 %v1107_v60, %v4583_v46  ;;  %v1109_v50 = vpop.f32.mrb[51].mxu1  ;;  %2516 = vmatmul.mubr.bf16.gmra.mrb[44].mxu0 %v1522_v41  ;;  %v1434_v31 = vmax.f32 %v1104_v51, 0.0  ;;  %v4051_v60 = vld [vmem:[#allocation4 + $0x2c4] ss:$8 sps:$4 sm:$0xff]  }
 0x1a1   :  { %v1110_v52 = vadd.f32 %v1109_v50, %v4586_v47  ;;  %2579 = vmatpush1.bf16.msra.mxu0 %v4019_v45  ;;  %v1435_v57 = vmax.f32 %v1106_v35, 0.0 }
 0x1a2   :  { %v1442_v33 = vmax.f32 %v1108_v40, 0.0  ;;  %2580 = vmatprep.subr.bf16.mxu0 %v4024_v56 }
 0x1a3   :  { %v1443_v11 = vmax.f32 %v1110_v52, 0.0 }
 0x1a4   :  { %v1530_v49 = vpack.c.bf16 %v1442_v33, %v1434_v31  ;;  %v4049_v33 = vld [vmem:[#allocation4 + $0x2c0] ss:$8 sps:$4 sm:$0xff]  }
 0x1a5   :  { %v1531_v54 = vpack.c.bf16 %v1443_v11, %v1435_v57  ;;  %v1113_v63 = vpop.f32.mrb[52].mxu1  ;;  %2581 = vmatpush1.bf16.msra.mxu0 %v4022_v10  ;;  %v4057_v11 = vld [vmem:[#allocation4 + $0x2d4] ss:$8 sps:$4 sm:$0xff]  }
 0x1a6   :  { %v1114_v4 = vadd.f32 %v1113_v63, %v4583_v46  ;;  %v1115_v6 = vpop.f32.mrb[53].mxu1  ;;  %2582 = vmatprep.subr.bf16.mxu0 %v4027_v30 }
 0x1a7   :  { %v1116_v9 = vadd.f32 %v1115_v6, %v4586_v47  ;;  %v1117_v12 = vpop.f32.mrb[54].mxu1  ;;  %2525 = vmatprep.mubr.bf16.mxu0 %v1531_v54 }
 0x1a8   :  { %v1118_v14 = vadd.f32 %v1117_v12, %v4583_v46  ;;  %v1119_v15 = vpop.f32.mrb[55].mxu1  ;;  %2526 = vmatmul.mubr.bf16.gmra.mrb[48].mxu0 %v1530_v49  ;;  %v1450_v21 = vmax.f32 %v1114_v4, 0.0  ;;  %v262_v4 = vsub.s32 6, %v4496_v55 }
 0x1a9   :  { %v1120_v17 = vadd.f32 %v1119_v15, %v4586_v47  ;;  %2583 = vmatpush1.bf16.msra.mxu0 %v4025_v1  ;;  %v1451_v25 = vmax.f32 %v1116_v9, 0.0  ;;  %v266_v9 = vsub.s32 7, %v4496_v55  ;;  %v4063_v15 = vld [vmem:[#allocation4 + $0x2e4] ss:$8 sps:$4 sm:$0xff]  }
 0x1aa   :  { %v1458_v22 = vmax.f32 %v1118_v14, 0.0  ;;  %2584 = vmatprep.subr.bf16.mxu0 %v4033_v7  ;;  %v4055_v7 = vld [vmem:[#allocation4 + $0x2d0] ss:$8 sps:$4 sm:$0xff]  }
 0x1ab   :  { %v1459_v27 = vmax.f32 %v1120_v17, 0.0 }
 0x1ac   :  { %v1538_v28 = vpack.c.bf16 %v1458_v22, %v1450_v21 }
 0x1ad   :  { %v1539_v32 = vpack.c.bf16 %v1459_v27, %v1451_v25  ;;  %v1123_v36 = vpop.f32.mrb[56].mxu1  ;;  %2585 = vmatpush1.bf16.msra.mxu0 %v4031_v18 }
 0x1ae   :  { %v1124_v39 = vadd.f32 %v1123_v36, %v4583_v46  ;;  %v1125_v41 = vpop.f32.mrb[57].mxu1  ;;  %2586 = vmatprep.subr.bf16.mxu0 %v4039_v24 }
 0x1af   :  { %v1126_v43 = vadd.f32 %v1125_v41, %v4586_v47  ;;  %v1127_v44 = vpop.f32.mrb[58].mxu1  ;;  %2535 = vmatprep.mubr.bf16.mxu0 %v1539_v32 }
 0x1b0   :  { %v1128_v45 = vadd.f32 %v1127_v44, %v4583_v46  ;;  %v1129_v48 = vpop.f32.mrb[59].mxu1  ;;  %2536 = vmatmul.mubr.bf16.gmra.mrb[52].mxu0 %v1538_v28  ;;  %v1466_v56 = vmax.f32 %v1124_v39, 0.0  ;;  %v4069_v28 = vld [vmem:[#allocation4 + $0x2f4] ss:$8 sps:$4 sm:$0xff]   ;;  %v4067_v44 = vld [vmem:[#allocation4 + $0x2f0] ss:$8 sps:$4 sm:$0xff]  }
 0x1b1   :  { %v1130_v51 = vadd.f32 %v1129_v48, %v4586_v47  ;;  %2587 = vmatpush1.bf16.msra.mxu0 %v4037_v38  ;;  %v1467_v40 = vmax.f32 %v1126_v43, 0.0 }
 0x1b2   :  { %v1474_v35 = vmax.f32 %v1128_v45, 0.0  ;;  %2588 = vmatprep.subr.bf16.mxu0 %v4045_v42 }
 0x1b3   :  { %v1475_v50 = vmax.f32 %v1130_v51, 0.0 }
 0x1b4   :  { %v1546_v52 = vpack.c.bf16 %v1474_v35, %v1466_v56 }
 0x1b5   :  { %v1547_v10 = vpack.c.bf16 %v1475_v50, %v1467_v40  ;;  %v1133_v31 = vpop.f32.mrb[60].mxu1  ;;  %2589 = vmatpush1.bf16.msra.mxu0 %v4043_v5  ;;  %v4146_v40 = vld [vmem:[#allocation4 + $0x304] ss:$8 sps:$4 sm:$0xff]  }
 0x1b6   :  { %v1134_v30 = vadd.f32 %v1133_v31, %v4583_v46  ;;  %v1135_v57 = vpop.f32.mrb[61].mxu1  ;;  %2590 = vmatprep.subr.bf16.mxu0 %v4051_v60 }
 0x1b7   :  { %v1136_v49 = vadd.f32 %v1135_v57, %v4586_v47  ;;  %v1137_v54 = vpop.f32.mrb[62].mxu1  ;;  %2545 = vmatprep.mubr.bf16.mxu0 %v1547_v10  ;;  %v4147_v57 = vld [vmem:[#allocation4 + $0x300] ss:$8 sps:$4 sm:$0xff]  }
 0x1b8   :  { %v1138_v63 = vadd.f32 %v1137_v54, %v4583_v46  ;;  %v1139_v1 = vpop.f32.mrb[63].mxu1  ;;  %2546 = vmatmul.mubr.bf16.gmra.mrb[56].mxu0 %v1546_v52  ;;  %v1482_v12 = vmax.f32 %v1134_v30, 0.0  ;;  %v4145_v46 = vld [vmem:[%s5182_s2] sm:$0xff]  ;;  %v4148_v54 = vld [vmem:[#allocation4 + $0x314] ss:$8 sps:$4 sm:$0xff]  }
 0x1b9   :  { %v1140_v6 = vadd.f32 %v1139_v1, %v4586_v47  ;;  %2591 = vmatpush1.bf16.msra.mxu0 %v4049_v33  ;;  %v1483_v17 = vmax.f32 %v1136_v49, 0.0  ;;  %v4664_v22 = vrot.slane %v4145_v46, %v262_v4  ;;  %v4061_v47 = vld [vmem:[#allocation4 + $0x2e0] ss:$8 sps:$4 sm:$0xff]   ;;  %v4666_v27 = vrot.slane %v4145_v46, %v266_v9  ;;  %v4150_v9 = vld [vmem:[#allocation4 + $0x324] ss:$8 sps:$4 sm:$0xff]  }
 0x1ba   :  { %v1490_v14 = vmax.f32 %v1138_v63, 0.0  ;;  %2592 = vmatprep.subr.bf16.mxu0 %v4057_v11  ;;  %v4151_v46 = vld [vmem:[#allocation4 + $0x320] ss:$8 sps:$4 sm:$0xff]  }
 0x1bb   :  { %v1491_v18 = vmax.f32 %v1140_v6, 0.0  ;;  %v4149_v6 = vld [vmem:[#allocation4 + $0x310] ss:$8 sps:$4 sm:$0xff]  }
 0x1bc   :  { %v1554_v21 = vpack.c.bf16 %v1490_v14, %v1482_v12 }
 0x1bd   :  { %v1555_v24 = vpack.c.bf16 %v1491_v18, %v1483_v17  ;;  %2593 = vmatpush1.bf16.msra.mxu0 %v4055_v7  ;;  %v1289_v25 = vpop.f32.mrb[64].mxu1 }
 0x1be   :  { %2594 = vmatprep.subr.bf16.mxu0 %v4063_v15  ;;  %v1290_v32 = vadd.f32 %v1289_v25, %v4664_v22  ;;  %v1291_v36 = vpop.f32.mrb[65].mxu1  ;;  %v4152_v25 = vld [vmem:[#allocation4 + $0x334] ss:$8 sps:$4 sm:$0xff]  }
 0x1bf   :  { %2555 = vmatprep.mubr.bf16.mxu0 %v1555_v24  ;;  %v1292_v38 = vadd.f32 %v1291_v36, %v4666_v27  ;;  %v1293_v39 = vpop.f32.mrb[66].mxu1 }
 0x1c0   :  { %2556 = vmatmul.mubr.bf16.gmra.mrb[60].mxu0 %v1554_v21  ;;  %v1374_v41 = vmax.f32 %v1290_v32, 0.0  ;;  %v1294_v42 = vadd.f32 %v1293_v39, %v4664_v22  ;;  %v1295_v43 = vpop.f32.mrb[67].mxu1 }
 0x1c1   :  { %2595 = vmatpush1.bf16.msra.mxu0 %v4061_v47  ;;  %2598 = vmatprep.mubr.bf16.mxu0 %v4551_v19  ;;  %v1375_v45 = vmax.f32 %v1292_v38, 0.0  ;;  %v1296_v48 = vadd.f32 %v1295_v43, %v4666_v27  ;;  %v4153_v38 = vld [vmem:[#allocation4 + $0x330] ss:$8 sps:$4 sm:$0xff]  }
 0x1c2   :  { %2596 = vmatprep.subr.bf16.mxu0 %v4069_v28  ;;  %v1382_v51 = vmax.f32 %v1294_v42, 0.0 }
 0x1c3   :  { %v1383_v5 = vmax.f32 %v1296_v48, 0.0 }
 0x1c4   :  { %v4673_v56 = vpack.c.bf16 %v1382_v51, %v1374_v41  ;;  %v4154_v41 = vld [vmem:[#allocation4 + $0x344] ss:$8 sps:$4 sm:$0xff]  }
 0x1c5   :  { %2597 = vmatpush1.bf16.msra.mxu0 %v4067_v44  ;;  %v4675_v35 = vpack.c.bf16 %v1383_v5, %v1375_v45  ;;  %v1299_v60 = vpop.f32.mrb[68].mxu1  ;;  %v4155_v5 = vld [vmem:[#allocation4 + $0x340] ss:$8 sps:$4 sm:$0xff]  }
 0x1c6   :  { %2679 = vmatprep.subr.bf16.mxu0 %v4146_v40  ;;  %v1300_v50 = vadd.f32 %v1299_v60, %v4664_v22  ;;  %v1301_v52 = vpop.f32.mrb[69].mxu1 }
 0x1c7   :  { %v1302_v10 = vadd.f32 %v1301_v52, %v4666_v27  ;;  %v1303_v19 = vpop.f32.mrb[70].mxu1 }
 0x1c8   :  { %2599 = vmatmul.mubr.bf16.vlgmr.msra.gmra.mrb[32].mxu0 %v4548_v16  ;;  %v1390_v31 = vmax.f32 %v1300_v50, 0.0  ;;  %v1304_v33 = vadd.f32 %v1303_v19, %v4664_v22  ;;  %v1305_v30 = vpop.f32.mrb[71].mxu1  ;;  %v4156_v50 = vld [vmem:[#allocation4 + $0x354] ss:$8 sps:$4 sm:$0xff]  }
 0x1c9   :  { %2680 = vmatpush1.bf16.msra.mxu0 %v4147_v57  ;;  %2608 = vmatprep.mubr.bf16.mxu0 %v4563_v8  ;;  %v1391_v11 = vmax.f32 %v1302_v10, 0.0  ;;  %v1306_v49 = vadd.f32 %v1305_v30, %v4666_v27 }
 0x1ca   :  { %2681 = vmatprep.subr.bf16.mxu0 %v4148_v54  ;;  %v1398_v63 = vmax.f32 %v1304_v33, 0.0 }
 0x1cb   :  { %v1399_v1 = vmax.f32 %v1306_v49, 0.0 }
 0x1cc   :  { %v4683_v4 = vpack.c.bf16 %v1398_v63, %v1390_v31  ;;  %v4157_v31 = vld [vmem:[#allocation4 + $0x350] ss:$8 sps:$4 sm:$0xff]  }
 0x1cd   :  { %2682 = vmatpush1.bf16.msra.mxu0 %v4149_v6  ;;  %v4685_v16 = vpack.c.bf16 %v1399_v1, %v1391_v11  ;;  %v1309_v7 = vpop.f32.mrb[72].mxu1  ;;  %v4158_v11 = vld [vmem:[#allocation4 + $0x364] ss:$8 sps:$4 sm:$0xff]  }
 0x1ce   :  { %2683 = vmatprep.subr.bf16.mxu0 %v4150_v9  ;;  %v1310_v12 = vadd.f32 %v1309_v7, %v4664_v22  ;;  %v1311_v14 = vpop.f32.mrb[73].mxu1  ;;  %v4159_v7 = vld [vmem:[#allocation4 + $0x360] ss:$8 sps:$4 sm:$0xff]  }
 0x1cf   :  { %v1312_v8 = vadd.f32 %v1311_v14, %v4666_v27  ;;  %v1313_v15 = vpop.f32.mrb[74].mxu1  ;;  %v4160_v14 = vld [vmem:[#allocation4 + $0x374] ss:$8 sps:$4 sm:$0xff]  }
 0x1d0   :  { %2609 = vmatmul.mubr.bf16.gmra.mrb[36].mxu0 %v4560_v20  ;;  %v1406_v17 = vmax.f32 %v1310_v12, 0.0  ;;  %v1314_v18 = vadd.f32 %v1313_v15, %v4664_v22  ;;  %v1315_v21 = vpop.f32.mrb[75].mxu1 }
 0x1d1   :  { %2684 = vmatpush1.bf16.msra.mxu0 %v4151_v46  ;;  %2618 = vmatprep.mubr.bf16.mxu0 %v4577_v37  ;;  %v1407_v24 = vmax.f32 %v1312_v8, 0.0  ;;  %v1316_v47 = vadd.f32 %v1315_v21, %v4666_v27 }
 0x1d2   :  { %2685 = vmatprep.subr.bf16.mxu0 %v4152_v25  ;;  %v1414_v28 = vmax.f32 %v1314_v18, 0.0  ;;  %v4161_v18 = vld [vmem:[#allocation4 + $0x370] ss:$8 sps:$4 sm:$0xff]  }
 0x1d3   :  { %v1415_v32 = vmax.f32 %v1316_v47, 0.0 }
 0x1d4   :  { %v4693_v36 = vpack.c.bf16 %v1414_v28, %v1406_v17 }
 0x1d5   :  { %2686 = vmatpush1.bf16.msra.mxu0 %v4153_v38  ;;  %v4695_v20 = vpack.c.bf16 %v1415_v32, %v1407_v24  ;;  %v1319_v39 = vpop.f32.mrb[76].mxu1  ;;  %v4162_v24 = vld [vmem:[#allocation4 + $0x384] ss:$8 sps:$4 sm:$0xff]  }
 0x1d6   :  { %2687 = vmatprep.subr.bf16.mxu0 %v4154_v41  ;;  %v1320_v42 = vadd.f32 %v1319_v39, %v4664_v22  ;;  %v1321_v43 = vpop.f32.mrb[77].mxu1  ;;  %v4163_v39 = vld [vmem:[#allocation4 + $0x380] ss:$8 sps:$4 sm:$0xff]  }
 0x1d7   :  { %v1322_v37 = vadd.f32 %v1321_v43, %v4666_v27  ;;  %v1323_v44 = vpop.f32.mrb[78].mxu1  ;;  %v4164_v43 = vld [vmem:[#allocation4 + $0x394] ss:$8 sps:$4 sm:$0xff]  }
 0x1d8   :  { %2619 = vmatmul.mubr.bf16.gmra.mrb[40].mxu0 %v4574_v29  ;;  %v1422_v45 = vmax.f32 %v1320_v42, 0.0  ;;  %v1324_v48 = vadd.f32 %v1323_v44, %v4664_v22  ;;  %v1325_v51 = vpop.f32.mrb[79].mxu1 }
 0x1d9   :  { %2688 = vmatpush1.bf16.msra.mxu0 %v4155_v5  ;;  %v1423_v60 = vmax.f32 %v1322_v37, 0.0  ;;  %2628 = vmatprep.mubr.bf16.mxu0 %v4595_v3  ;;  %v1326_v40 = vadd.f32 %v1325_v51, %v4666_v27 }
 0x1da   :  { %2689 = vmatprep.subr.bf16.mxu0 %v4156_v50  ;;  %v1430_v52 = vmax.f32 %v1324_v48, 0.0  ;;  %v4165_v48 = vld [vmem:[#allocation4 + $0x390] ss:$8 sps:$4 sm:$0xff]  }
 0x1db   :  { %v1431_v10 = vmax.f32 %v1326_v40, 0.0 }
 0x1dc   :  { %v4703_v19 = vpack.c.bf16 %v1430_v52, %v1422_v45 }
 0x1dd   :  { %2690 = vmatpush1.bf16.msra.mxu0 %v4157_v31  ;;  %v4705_v29 = vpack.c.bf16 %v1431_v10, %v1423_v60  ;;  %v1329_v33 = vpop.f32.mrb[80].mxu1  ;;  %v4166_v60 = vld [vmem:[#allocation4 + $0x3a4] ss:$8 sps:$4 sm:$0xff]  }
 0x1de   :  { %v1330_v30 = vadd.f32 %v1329_v33, %v4664_v22  ;;  %v1331_v57 = vpop.f32.mrb[81].mxu1  ;;  %2691 = vmatprep.subr.bf16.mxu0 %v4158_v11  ;;  %v4167_v33 = vld [vmem:[#allocation4 + $0x3a0] ss:$8 sps:$4 sm:$0xff]   ;;  %v4168_v11 = vld [vmem:[#allocation4 + $0x3b4] ss:$8 sps:$4 sm:$0xff]  }
 0x1df   :  { %v1332_v3 = vadd.f32 %v1331_v57, %v4666_v27  ;;  %v1333_v49 = vpop.f32.mrb[82].mxu1 }
 0x1e0   :  { %v1438_v54 = vmax.f32 %v1330_v30, 0.0  ;;  %2629 = vmatmul.mubr.bf16.gmra.mrb[44].mxu0 %v4592_v0  ;;  %v1334_v63 = vadd.f32 %v1333_v49, %v4664_v22  ;;  %v1335_v1 = vpop.f32.mrb[83].mxu1 }
 0x1e1   :  { %v1439_v6 = vmax.f32 %v1332_v3, 0.0  ;;  %2692 = vmatpush1.bf16.msra.mxu0 %v4159_v7  ;;  %v1336_v9 = vadd.f32 %v1335_v1, %v4666_v27  ;;  %2638 = vmatprep.mubr.bf16.mxu0 %v4607_v58  ;;  %v4170_v7 = vld [vmem:[#allocation4 + $0x3c4] ss:$8 sps:$4 sm:$0xff]  }
 0x1e2   :  { %v1446_v12 = vmax.f32 %v1334_v63, 0.0  ;;  %2693 = vmatprep.subr.bf16.mxu0 %v4160_v14  ;;  %v4169_v63 = vld [vmem:[#allocation4 + $0x3b0] ss:$8 sps:$4 sm:$0xff]  }
 0x1e3   :  { %v1447_v8 = vmax.f32 %v1336_v9, 0.0 }
 0x1e4   :  { %v1534_v15 = vpack.c.bf16 %v1446_v12, %v1438_v54 }
 0x1e5   :  { %v1535_v17 = vpack.c.bf16 %v1447_v8, %v1439_v6  ;;  %2694 = vmatpush1.bf16.msra.mxu0 %v4161_v18  ;;  %v1339_v21 = vpop.f32.mrb[84].mxu1 }
 0x1e6   :  { %v1340_v0 = vadd.f32 %v1339_v21, %v4664_v22  ;;  %v1341_v46 = vpop.f32.mrb[85].mxu1  ;;  %2695 = vmatprep.subr.bf16.mxu0 %v4162_v24 }
 0x1e7   :  { %v1342_v47 = vadd.f32 %v1341_v46, %v4666_v27  ;;  %v1343_v25 = vpop.f32.mrb[86].mxu1  ;;  %2751 = vmatprep.mubr.bf16.mxu1 %v1535_v17  ;;  %v4171_v17 = vld [vmem:[#allocation4 + $0x3c0] ss:$8 sps:$4 sm:$0xff]  }
 0x1e8   :  { %v1454_v28 = vmax.f32 %v1340_v0, 0.0  ;;  %2639 = vmatmul.mubr.bf16.gmra.mrb[48].mxu0 %v4604_v53  ;;  %v1344_v58 = vadd.f32 %v1343_v25, %v4664_v22  ;;  %v1345_v32 = vpop.f32.mrb[87].mxu1  ;;  %2752 = vmatmul.mubr.bf16.vlgmr.msra.gmra.mrb[96].mxu1 %v1534_v15  ;;  %v4172_v0 = vld [vmem:[#allocation4 + $0x3d4] ss:$8 sps:$4 sm:$0xff]   ;;  %v4173_v25 = vld [vmem:[#allocation4 + $0x3d0] ss:$8 sps:$4 sm:$0xff]  }
 0x1e9   :  { %v1455_v38 = vmax.f32 %v1342_v47, 0.0  ;;  %2696 = vmatpush1.bf16.msra.mxu0 %v4163_v39  ;;  %v1346_v41 = vadd.f32 %v1345_v32, %v4666_v27  ;;  %2648 = vmatprep.mubr.bf16.mxu0 %v4619_v26  ;;  %v4108_v32 = vld [vmem:[%s5185_s5 + $0x28] sm:$0xff]   ;;  %v4110_v39 = vld [vmem:[%s5185_s5 + $0x30] sm:$0xff]  }
 0x1ea   :  { %v1462_v42 = vmax.f32 %v1344_v58, 0.0  ;;  %2697 = vmatprep.subr.bf16.mxu0 %v4164_v43  ;;  %v4107_v58 = vld [vmem:[%s5185_s5 + $0x68] sm:$0xff]   ;;  %v3120_v43 = vld [vmem:[%s5187_s7] sm:$0xff] }
 0x1eb   :  { %v1463_v37 = vmax.f32 %v1346_v41, 0.0  ;;  %v4111_v41 = vld [vmem:[%s5185_s5 + $0x78] sm:$0xff]   ;;  %3152 = vrot.lane.b32.xlu0 %v3120_v43, %s4228_s16 }
 0x1ec   :  { %v1542_v44 = vpack.c.bf16 %v1462_v42, %v1454_v28  ;;  %v4106_v28 = vld [vmem:[%s5185_s5 + $0x20] sm:$0xff]   ;;  %v4112_v42 = vld [vmem:[%s5185_s5 + $0x38] sm:$0xff]  }
 0x1ed   :  { %v1543_v45 = vpack.c.bf16 %v1463_v37, %v1455_v38  ;;  %2698 = vmatpush1.bf16.msra.mxu0 %v4165_v48  ;;  %v1349_v53 = vpop.f32.mrb[88].mxu1  ;;  %v4109_v38 = vld [vmem:[%s5185_s5 + $0x70] sm:$0xff]   ;;  %v3124_v48 = vld [vmem:[%s5187_s7 + $0x20] sm:$0xff] }
 0x1ee   :  { %v1350_v51 = vadd.f32 %v1349_v53, %v4664_v22  ;;  %v1351_v5 = vpop.f32.mrb[89].mxu1  ;;  %2699 = vmatprep.subr.bf16.mxu0 %v4166_v60  ;;  %v3122_v37 = vld [vmem:[%s5187_s7 + $0x10] sm:$0xff]  ;;  %v3125_v53 = vld [vmem:[%s5187_s7 + $0x28] sm:$0xff]  ;;  %v3128_v60 = vld [vmem:[%s5187_s7 + $0x40] sm:$0xff] }
 0x1ef   :  { %v1352_v40 = vadd.f32 %v1351_v5, %v4666_v27  ;;  %v1353_v50 = vpop.f32.mrb[90].mxu1  ;;  %2761 = vmatprep.mubr.bf16.mxu1 %v1543_v45  ;;  %3156 = vrot.lane.b32.xlu1 %v3122_v37, %s4228_s16  ;;  %v3123_v45 = vld [vmem:[%s5187_s7 + $0x18] sm:$0xff] }
 0x1f0   :  { %v1470_v52 = vmax.f32 %v1350_v51, 0.0  ;;  %2649 = vmatmul.mubr.bf16.gmra.mrb[52].mxu0 %v4616_v23  ;;  %v1354_v26 = vadd.f32 %v1353_v50, %v4664_v22  ;;  %v1355_v10 = vpop.f32.mrb[91].mxu1  ;;  %2762 = vmatmul.mubr.bf16.gmra.mrb[100].mxu1 %v1542_v44  ;;  %v3121_v44 = vld [vmem:[%s5187_s7 + $0x8] sm:$0xff]  ;;  %v3126_v51 = vld [vmem:[%s5187_s7 + $0x30] sm:$0xff]  ;;  %v3127_v5 = vld [vmem:[%s5187_s7 + $0x38] sm:$0xff] }
 0x1f1   :  { %v1471_v31 = vmax.f32 %v1352_v40, 0.0  ;;  %2700 = vmatpush1.bf16.msra.mxu0 %v4167_v33  ;;  %v1356_v30 = vadd.f32 %v1355_v10, %v4666_v27  ;;  %2658 = vmatprep.mubr.bf16.mxu0 %v4631_v2  ;;  %v3129_v40 = vld [vmem:[%s5187_s7 + $0x48] sm:$0xff]  ;;  %v3130_v50 = vld [vmem:[%s5187_s7 + $0x50] sm:$0xff] }
 0x1f2   :  { %v1478_v57 = vmax.f32 %v1354_v26, 0.0  ;;  %2701 = vmatprep.subr.bf16.mxu0 %v4168_v11  ;;  %3154 = vrot.lane.b32.xlu0 %v3121_v44, %s4228_s16  ;;  %v3132_v26 = vld [vmem:[%s5187_s7 + $0x60] sm:$0xff]  ;;  %v3133_v10 = vld [vmem:[%s5187_s7 + $0x68] sm:$0xff] }
 0x1f3   :  { %v1479_v3 = vmax.f32 %v1356_v30, 0.0  ;;  %3158 = vrot.lane.b32.xlu1 %v3123_v45, %s4228_s16  ;;  %v3134_v30 = vld [vmem:[%s5187_s7 + $0x70] sm:$0xff] }
 0x1f4   :  { %v1550_v49 = vpack.c.bf16 %v1478_v57, %v1470_v52  ;;  %v3131_v52 = vld [vmem:[%s5187_s7 + $0x58] sm:$0xff] }
 0x1f5   :  { %v1551_v54 = vpack.c.bf16 %v1479_v3, %v1471_v31  ;;  %2702 = vmatpush1.bf16.msra.mxu0 %v4169_v63  ;;  %v1359_v23 = vpop.f32.mrb[92].mxu1  ;;  %v1688_v31 = vld [vmem:[%s5184_s4] sm:$0x3]  ;;  %v3135_v57 = vld [vmem:[%s5187_s7 + $0x78] sm:$0xff] }
 0x1f6   :  { %v1360_v1 = vadd.f32 %v1359_v23, %v4664_v22  ;;  %v1361_v6 = vpop.f32.mrb[93].mxu1  ;;  %2703 = vmatprep.subr.bf16.mxu0 %v4170_v7  ;;  %3160 = vrot.lane.b32.xlu0 %v3124_v48, %s4228_s16  ;;  %v4849_v33 = vrot.slane %v1688_v31, %v238_v13  ;;  %v4859_v11 = vrot.slane %v1688_v31, %v242_v34 }
 0x1f7   :  { %v1362_v9 = vadd.f32 %v1361_v6, %v4666_v27  ;;  %v1363_v12 = vpop.f32.mrb[94].mxu1  ;;  %2771 = vmatprep.mubr.bf16.mxu1 %v1551_v54  ;;  %3162 = vrot.lane.b32.xlu1 %v3125_v53, %s4228_s16 }
 0x1f8   :  { %v1486_v14 = vmax.f32 %v1360_v1, 0.0  ;;  %2659 = vmatmul.mubr.bf16.gmra.mrb[56].mxu0 %v4628_v62  ;;  %v1364_v2 = vadd.f32 %v1363_v12, %v4664_v22  ;;  %v1365_v8 = vpop.f32.mrb[95].mxu1  ;;  %2772 = vmatmul.mubr.bf16.gmra.mrb[104].mxu1 %v1550_v49  ;;  %v4174_v62 = vld [vmem:[#allocation4 + $0x3e4] ss:$8 sps:$4 sm:$0xff]   ;;  %v4175_v22 = vld [vmem:[#allocation4 + $0x3e0] ss:$8 sps:$4 sm:$0xff]  }
 0x1f9   :  { %v1487_v15 = vmax.f32 %v1362_v9, 0.0  ;;  %2704 = vmatpush1.bf16.msra.mxu0 %v4171_v17  ;;  %v1366_v18 = vadd.f32 %v1365_v8, %v4666_v27  ;;  %2668 = vmatprep.mubr.bf16.mxu0 %v4643_v61  ;;  %v4176_v27 = vld [vmem:[#allocation4 + $0x3f4] ss:$8 sps:$4 sm:$0xff]   ;;  %v4177_v61 = vld [vmem:[#allocation4 + $0x3f0] ss:$8 sps:$4 sm:$0xff]  }
 0x1fa   :  { %v1494_v21 = vmax.f32 %v1364_v2, 0.0  ;;  %2705 = vmatprep.subr.bf16.mxu0 %v4172_v0  ;;  %3164 = vrot.lane.b32.xlu0 %v3126_v51, %s4228_s16 }
 0x1fb   :  { %v1495_v46 = vmax.f32 %v1366_v18, 0.0  ;;  %3166 = vrot.lane.b32.xlu1 %v3127_v5, %s4228_s16 }
 0x1fc   :  { %v1558_v24 = vpack.c.bf16 %v1494_v21, %v1486_v14 }
 0x1fd   :  { %v1559_v47 = vpack.c.bf16 %v1495_v46, %v1487_v15  ;;  %2706 = vmatpush1.bf16.msra.mxu0 %v4173_v25 }
 0x1fe   :  { %2707 = vmatprep.subr.bf16.mxu0 %v4174_v62  ;;  %3168 = vrot.lane.b32.xlu0 %v3128_v60, %s4228_s16 }
 0x1ff   :  { %2781 = vmatprep.mubr.bf16.mxu1 %v1559_v47  ;;  %3170 = vrot.lane.b32.xlu1 %v3129_v40, %s4228_s16 }
 0x200   :  { %2669 = vmatmul.mubr.bf16.gmra.mrb[60].mxu0 %v4640_v59  ;;  %2782 = vmatmul.mubr.bf16.gmra.mrb[108].mxu1 %v1558_v24  ;;  %v4097_v59 = vld [vmem:[%s5185_s5 + $0x40] sm:$0xff]  }
 0x201   :  { %2708 = vmatpush1.bf16.msra.mxu0 %v4175_v22  ;;  %2711 = vmatprep.mubr.bf16.mxu0 %v4675_v35  ;;  %v4099_v35 = vld [vmem:[%s5185_s5 + $0x48] sm:$0xff]  }
 0x202   :  { %2709 = vmatprep.subr.bf16.mxu0 %v4176_v27  ;;  %3673 = vmatprep.subr.bf16.mxu1 %v4097_v59 }
 0x203   :  { %3172 = vrot.lane.b32.xlu0 %v3130_v50, %s4228_s16  ;;  %3174 = vrot.lane.b32.xlu1 %v3131_v52, %s4228_s16 }
 0x205   :  { %2710 = vmatpush1.bf16.msra.mxu0 %v4177_v61 }
 0x207   :  { %3176 = vrot.lane.b32.xlu0 %v3132_v26, %s4228_s16  ;;  %3178 = vrot.lane.b32.xlu1 %v3133_v10, %s4228_s16 }
 0x208   :  { %2712 = vmatmul.mubr.bf16.vlgmr.msra.gmra.mrb[32].mxu0 %v4673_v56  ;;  %v4098_v56 = vld [vmem:[%s5185_s5] sm:$0xff]  }
 0x209   :  { %2721 = vmatprep.mubr.bf16.mxu0 %v4685_v16  ;;  %3674 = vmatpush3.bf16.msra.mxu1 %v4098_v56  ;;  %v4101_v16 = vld [vmem:[%s5185_s5 + $0x50] sm:$0xff]  }
 0x20a   :  { %3675 = vmatprep.subr.bf16.mxu1 %v4099_v35 }
 0x20b   :  { %3180 = vrot.lane.b32.xlu0 %v3134_v30, %s4228_s16  ;;  %3182 = vrot.lane.b32.xlu1 %v3135_v57, %s4228_s16 }
 0x210   :  { %2722 = vmatmul.mubr.bf16.gmra.mrb[36].mxu0 %v4683_v4  ;;  %v4100_v4 = vld [vmem:[%s5185_s5 + $0x8] sm:$0xff]  }
 0x211   :  { %2731 = vmatprep.mubr.bf16.mxu0 %v4695_v20  ;;  %3676 = vmatpush3.bf16.msra.mxu1 %v4100_v4  ;;  %v4103_v20 = vld [vmem:[%s5185_s5 + $0x58] sm:$0xff]  }
 0x212   :  { %3677 = vmatprep.subr.bf16.mxu1 %v4101_v16 }
 0x218   :  { %2732 = vmatmul.mubr.bf16.gmra.mrb[40].mxu0 %v4693_v36  ;;  %v4102_v36 = vld [vmem:[%s5185_s5 + $0x10] sm:$0xff]  }
 0x219   :  { %2741 = vmatprep.mubr.bf16.mxu0 %v4705_v29  ;;  %3678 = vmatpush3.bf16.msra.mxu1 %v4102_v36  ;;  %v4105_v29 = vld [vmem:[%s5185_s5 + $0x60] sm:$0xff]  }
 0x21a   :  { %3679 = vmatprep.subr.bf16.mxu1 %v4103_v20 }
 0x220   :  { %2742 = vmatmul.mubr.bf16.gmra.mrb[44].mxu0 %v4703_v19  ;;  %v4104_v19 = vld [vmem:[%s5185_s5 + $0x18] sm:$0xff]  }
 0x221   :  { %3680 = vmatpush3.bf16.msra.mxu1 %v4104_v19 }
 0x222   :  { %3681 = vmatprep.subr.bf16.mxu1 %v4105_v29 }
 0x225   :  { %3682 = vmatpush3.bf16.msra.mxu1 %v4106_v28 }
 0x226   :  { %3683 = vmatprep.subr.bf16.mxu1 %v4107_v58 }
 0x229   :  { %3684 = vmatpush3.bf16.msra.mxu1 %v4108_v32 }
 0x22a   :  { %3685 = vmatprep.subr.bf16.mxu1 %v4109_v38 }
 0x22d   :  { %3686 = vmatpush3.bf16.msra.mxu1 %v4110_v39 }
 0x22e   :  { %3687 = vmatprep.subr.bf16.mxu1 %v4111_v41 }
 0x231   :  { %3688 = vmatpush3.bf16.msra.mxu1 %v4112_v42 }
 0x2bb   :  { %v2640_v3 = vpop.f32.mrb[48].mxu0  ;;  %v2753_v49 = vpop.f32.mrb[96].mxu1 }
 0x2bc   :  { %v3785_v13 = vadd.f32 %v2640_v3, %v4849_v33  ;;  %v2642_v54 = vpop.f32.mrb[49].mxu0  ;;  %v2755_v63 = vpop.f32.mrb[97].mxu1 }
 0x2bd   :  { %v3787_v23 = vadd.f32 %v2642_v54, %v4859_v11  ;;  %v2644_v1 = vpop.f32.mrb[50].mxu0  ;;  %v2757_v6 = vpop.f32.mrb[98].mxu1 }
 0x2be   :  { %v3789_v7 = vadd.f32 %v2644_v1, %v4849_v33  ;;  %v3786_v9 = vadd.f32 %v3785_v13, %v2753_v49  ;;  %v2646_v55 = vpop.f32.mrb[51].mxu0  ;;  %v2759_v34 = vpop.f32.mrb[99].mxu1 }
 0x2bf   :  { %v3791_v12 = vadd.f32 %v2646_v55, %v4859_v11  ;;  %v3788_v14 = vadd.f32 %v3787_v23, %v2755_v63 }
 0x2c0   :  { %v3790_v2 = vadd.f32 %v3789_v7, %v2757_v6  ;;  %v2808_v15 = vmax.f32 %v3786_v9, 0.0 }
 0x2c1   :  { %v3792_v8 = vadd.f32 %v3791_v12, %v2759_v34  ;;  %v2809_v18 = vmax.f32 %v3788_v14, 0.0 }
 0x2c2   :  { %v2810_v17 = vmax.f32 %v3790_v2, 0.0 }
 0x2c3   :  { %v2811_v21 = vmax.f32 %v3792_v8, 0.0  ;;  %v2650_v0 = vpop.f32.mrb[52].mxu0  ;;  %v2763_v46 = vpop.f32.mrb[100].mxu1 }
 0x2c4   :  { %v4867_v24 = vpack.c.bf16 %v2810_v17, %v2808_v15  ;;  %v3793_v47 = vadd.f32 %v2650_v0, %v4849_v33  ;;  %v2652_v25 = vpop.f32.mrb[53].mxu0  ;;  %v2765_v62 = vpop.f32.mrb[101].mxu1 }
 0x2c5   :  { %v4870_v22 = vpack.c.bf16 %v2811_v21, %v2809_v18  ;;  %v3795_v27 = vadd.f32 %v2652_v25, %v4859_v11  ;;  %v2654_v61 = vpop.f32.mrb[54].mxu0  ;;  %v2767_v59 = vpop.f32.mrb[102].mxu1 }
 0x2c6   :  { %v3797_v56 = vadd.f32 %v2654_v61, %v4849_v33  ;;  %v3794_v35 = vadd.f32 %v3793_v47, %v2763_v46  ;;  %v2656_v4 = vpop.f32.mrb[55].mxu0  ;;  %v2769_v16 = vpop.f32.mrb[103].mxu1 }
 0x2c7   :  { %v3799_v36 = vadd.f32 %v2656_v4, %v4859_v11  ;;  %v3796_v20 = vadd.f32 %v3795_v27, %v2765_v62 }
 0x2c8   :  { %v3798_v19 = vadd.f32 %v3797_v56, %v2767_v59  ;;  %v2812_v28 = vmax.f32 %v3794_v35, 0.0 }
 0x2c9   :  { %v3800_v29 = vadd.f32 %v3799_v36, %v2769_v16  ;;  %v2813_v32 = vmax.f32 %v3796_v20, 0.0 }
 0x2ca   :  { %v2814_v58 = vmax.f32 %v3798_v19, 0.0 }
 0x2cb   :  { %v2815_v38 = vmax.f32 %v3800_v29, 0.0  ;;  %v2660_v39 = vpop.f32.mrb[56].mxu0  ;;  %v2773_v41 = vpop.f32.mrb[104].mxu1 }
 0x2cc   :  { %v4875_v42 = vpack.c.bf16 %v2814_v58, %v2812_v28  ;;  %v3801_v43 = vadd.f32 %v2660_v39, %v4849_v33  ;;  %v2662_v37 = vpop.f32.mrb[57].mxu0  ;;  %v2775_v44 = vpop.f32.mrb[105].mxu1 }
 0x2cd   :  { %v4878_v45 = vpack.c.bf16 %v2815_v38, %v2813_v32  ;;  %v3803_v48 = vadd.f32 %v2662_v37, %v4859_v11  ;;  %v2664_v53 = vpop.f32.mrb[58].mxu0  ;;  %v2777_v51 = vpop.f32.mrb[106].mxu1 }
 0x2ce   :  { %v3805_v5 = vadd.f32 %v2664_v53, %v4849_v33  ;;  %v3802_v60 = vadd.f32 %v3801_v43, %v2773_v41  ;;  %v2666_v40 = vpop.f32.mrb[59].mxu0  ;;  %v2779_v50 = vpop.f32.mrb[107].mxu1 }
 0x2cf   :  { %v3807_v52 = vadd.f32 %v2666_v40, %v4859_v11  ;;  %v3804_v26 = vadd.f32 %v3803_v48, %v2775_v44 }
 0x2d0   :  { %v3806_v10 = vadd.f32 %v3805_v5, %v2777_v51  ;;  %v2816_v30 = vmax.f32 %v3802_v60, 0.0 }
 0x2d1   :  { %v3808_v31 = vadd.f32 %v3807_v52, %v2779_v50  ;;  %v2817_v3 = vmax.f32 %v3804_v26, 0.0 }
 0x2d2   :  { %v2818_v57 = vmax.f32 %v3806_v10, 0.0 }
 0x2d3   :  { %v2819_v49 = vmax.f32 %v3808_v31, 0.0  ;;  %v2670_v13 = vpop.f32.mrb[60].mxu0  ;;  %v2783_v54 = vpop.f32.mrb[108].mxu1 }
 0x2d4   :  { %v4883_v63 = vpack.c.bf16 %v2818_v57, %v2816_v30  ;;  %v3809_v23 = vadd.f32 %v2670_v13, %v4849_v33  ;;  %v2672_v1 = vpop.f32.mrb[61].mxu0  ;;  %v2785_v6 = vpop.f32.mrb[109].mxu1 }
 0x2d5   :  { %v4886_v7 = vpack.c.bf16 %v2819_v49, %v2817_v3  ;;  %v3811_v9 = vadd.f32 %v2672_v1, %v4859_v11  ;;  %v2674_v55 = vpop.f32.mrb[62].mxu0  ;;  %v2787_v34 = vpop.f32.mrb[110].mxu1 }
 0x2d6   :  { %v3813_v12 = vadd.f32 %v2674_v55, %v4849_v33  ;;  %v3810_v14 = vadd.f32 %v3809_v23, %v2783_v54  ;;  %v2676_v2 = vpop.f32.mrb[63].mxu0  ;;  %v2789_v8 = vpop.f32.mrb[111].mxu1 }
 0x2d7   :  { %v3815_v15 = vadd.f32 %v2676_v2, %v4859_v11  ;;  %v3812_v17 = vadd.f32 %v3811_v9, %v2785_v6 }
 0x2d8   :  { %v3814_v18 = vadd.f32 %v3813_v12, %v2787_v34  ;;  %v2820_v0 = vmax.f32 %v3810_v14, 0.0 }
 0x2d9   :  { %v3816_v21 = vadd.f32 %v3815_v15, %v2789_v8  ;;  %v2821_v47 = vmax.f32 %v3812_v17, 0.0 }
 0x2da   :  { %v2822_v46 = vmax.f32 %v3814_v18, 0.0 }
 0x2db   :  { %v2823_v25 = vmax.f32 %v3816_v21, 0.0  ;;  %v2713_v62 = vpop.f32.mrb[32].mxu0 }
 0x2dc   :  { %v4891_v27 = vpack.c.bf16 %v2822_v46, %v2820_v0  ;;  %v3769_v61 = vadd.f32 %v2713_v62, %v4849_v33  ;;  %v2715_v59 = vpop.f32.mrb[33].mxu0 }
 0x2dd   :  { %v4894_v56 = vpack.c.bf16 %v2823_v25, %v2821_v47  ;;  %v3770_v35 = vadd.f32 %v2715_v59, %v4859_v11  ;;  %v2717_v4 = vpop.f32.mrb[34].mxu0 }
 0x2de   :  { %v3771_v16 = vadd.f32 %v2717_v4, %v4849_v33  ;;  %v2719_v36 = vpop.f32.mrb[35].mxu0  ;;  %v2792_v19 = vmax.f32 %v3769_v61, 0.0 }
 0x2df   :  { %v3772_v20 = vadd.f32 %v2719_v36, %v4859_v11  ;;  %v2793_v28 = vmax.f32 %v3770_v35, 0.0 }
 0x2e0   :  { %v2794_v29 = vmax.f32 %v3771_v16, 0.0 }
 0x2e1   :  { %v2795_v58 = vmax.f32 %v3772_v20, 0.0 }
 0x2e2   :  { %v2824_v32 = vpack.c.bf16 %v2794_v29, %v2792_v19 }
 0x2e3   :  { %v2825_v38 = vpack.c.bf16 %v2795_v58, %v2793_v28  ;;  %v2723_v39 = vpop.f32.mrb[36].mxu0 }
 0x2e4   :  { %v3773_v41 = vadd.f32 %v2723_v39, %v4849_v33  ;;  %v2725_v43 = vpop.f32.mrb[37].mxu0  ;;  %v3153_v39 = vpop.permute.xlu0 %3152 }
 0x2e5   :  { %v3774_v37 = vadd.f32 %v2725_v43, %v4859_v11  ;;  %v2727_v44 = vpop.f32.mrb[38].mxu0  ;;  %3007 = vmatprep.mubr.bf16.mxu1 %v2825_v38 }
 0x2e6   :  { %v3775_v48 = vadd.f32 %v2727_v44, %v4849_v33  ;;  %v2729_v53 = vpop.f32.mrb[39].mxu0  ;;  %3008 = vmatmul.mubr.bf16.vlgmr.msra.gmra.mrb[112].mxu1 %v2824_v32  ;;  %v2796_v5 = vmax.f32 %v3773_v41, 0.0 }
 0x2e7   :  { %v3776_v51 = vadd.f32 %v2729_v53, %v4859_v11  ;;  %v2797_v40 = vmax.f32 %v3774_v37, 0.0 }
 0x2e8   :  { %v2798_v60 = vmax.f32 %v3775_v48, 0.0 }
 0x2e9   :  { %v2799_v50 = vmax.f32 %v3776_v51, 0.0 }
 0x2ea   :  { %v2826_v52 = vpack.c.bf16 %v2798_v60, %v2796_v5 }
 0x2eb   :  { %v2827_v26 = vpack.c.bf16 %v2799_v50, %v2797_v40  ;;  %v2733_v10 = vpop.f32.mrb[40].mxu0 }
 0x2ec   :  { %v3777_v31 = vadd.f32 %v2733_v10, %v4849_v33  ;;  %v2735_v30 = vpop.f32.mrb[41].mxu0 }
 0x2ed   :  { %v3778_v57 = vadd.f32 %v2735_v30, %v4859_v11  ;;  %v2737_v3 = vpop.f32.mrb[42].mxu0  ;;  %3015 = vmatprep.mubr.bf16.mxu1 %v2827_v26 }
 0x2ee   :  { %v3779_v49 = vadd.f32 %v2737_v3, %v4849_v33  ;;  %v2739_v13 = vpop.f32.mrb[43].mxu0  ;;  %3016 = vmatmul.mubr.bf16.gmra.mrb[116].mxu1 %v2826_v52  ;;  %v2800_v23 = vmax.f32 %v3777_v31, 0.0  ;;  %v3155_v52 = vpop.permute.xlu0 %3154 }
 0x2ef   :  { %v3780_v54 = vadd.f32 %v2739_v13, %v4859_v11  ;;  %v2801_v6 = vmax.f32 %v3778_v57, 0.0  ;;  %v3157_v57 = vpop.permute.xlu1 %3156 }
 0x2f0   :  { %v2802_v1 = vmax.f32 %v3779_v49, 0.0 }
 0x2f1   :  { %v2803_v9 = vmax.f32 %v3780_v54, 0.0 }
 0x2f2   :  { %v2828_v55 = vpack.c.bf16 %v2802_v1, %v2800_v23 }
 0x2f3   :  { %v2829_v34 = vpack.c.bf16 %v2803_v9, %v2801_v6  ;;  %v2743_v12 = vpop.f32.mrb[44].mxu0 }
 0x2f4   :  { %v3781_v14 = vadd.f32 %v2743_v12, %v4849_v33  ;;  %v2745_v2 = vpop.f32.mrb[45].mxu0 }
 0x2f5   :  { %v3782_v8 = vadd.f32 %v2745_v2, %v4859_v11  ;;  %v2747_v15 = vpop.f32.mrb[46].mxu0  ;;  %3023 = vmatprep.mubr.bf16.mxu1 %v2829_v34  ;;  %v3159_v2 = vpop.permute.xlu1 %3158 }
 0x2f6   :  { %v3783_v17 = vadd.f32 %v2747_v15, %v4849_v33  ;;  %v2749_v18 = vpop.f32.mrb[47].mxu0  ;;  %3024 = vmatmul.mubr.bf16.gmra.mrb[120].mxu1 %v2828_v55  ;;  %v2804_v0 = vmax.f32 %v3781_v14, 0.0 }
 0x2f7   :  { %v3784_v21 = vadd.f32 %v2749_v18, %v4859_v11  ;;  %v2805_v47 = vmax.f32 %v3782_v8, 0.0  ;;  %v4922_v11 = vld [vmem:[%s5186_s6] ss:$0 sm:$0xff] }
 0x2f8   :  { %v2806_v46 = vmax.f32 %v3783_v17, 0.0 }
 0x2f9   :  { %v2807_v25 = vmax.f32 %v3784_v21, 0.0 }
 0x2fa   :  { %v2830_v62 = vpack.c.bf16 %v2806_v46, %v2804_v0 }
 0x2fb   :  { %v2831_v61 = vpack.c.bf16 %v2807_v25, %v2805_v47 }
 0x2fd   :  { %3031 = vmatprep.mubr.bf16.mxu1 %v2831_v61 }
 0x2fe   :  { %3032 = vmatmul.mubr.bf16.gmra.mrb[124].mxu1 %v2830_v62 }
 0x2ff   :  { %3039 = vmatprep.mubr.bf16.mxu1 %v4870_v22 }
 0x306   :  { %3040 = vmatmul.mubr.bf16.gmra.mrb[128].mxu1 %v4867_v24 }
 0x307   :  { %3047 = vmatprep.mubr.bf16.mxu1 %v4878_v45 }
 0x30e   :  { %3048 = vmatmul.mubr.bf16.gmra.mrb[132].mxu1 %v4875_v42 }
 0x30f   :  { %3055 = vmatprep.mubr.bf16.mxu1 %v4886_v7 }
 0x316   :  { %3056 = vmatmul.mubr.bf16.gmra.mrb[136].mxu1 %v4883_v63 }
 0x317   :  { %3063 = vmatprep.mubr.bf16.mxu1 %v4894_v56 }
 0x31e   :  { %3064 = vmatmul.mubr.bf16.gmra.mrb[140].mxu1 %v4891_v27 }
 0x3b9   :  { %v3689_v33 = vpop.f32.mrb[112].mxu1 }
 0x3ba   :  { %v3690_v22 = vpop.f32.mrb[113].mxu1 }
 0x3bb   :  { %v3691_v24 = vadd.f32 %v3690_v22, %v3689_v33  ;;  %v3692_v59 = vpop.f32.mrb[114].mxu1  ;;  %v3161_v22 = vpop.permute.xlu0 %3160 }
 0x3bc   :  { %v3693_v45 = vpop.f32.mrb[115].mxu1 }
 0x3bd   :  { %v4925_v42 = vadd.f32 %v3691_v24, %v4922_v11  ;;  %v3694_v7 = vadd.f32 %v3693_v45, %v3692_v59 }
 0x3bf   :  { %v3072_v63 = vmul.f32 0.5, %v4925_v42  ;;  %3297 = vst.msk [vmem:[%s5188_s8] sm:$0xff] %vm3296_vm0, %v4925_v42  ;;  %v4934_v27 = vadd.f32 %v3694_v7, %v4922_v11 }
 0x3c1   :  { %v3088_v56 = vmul.f32 1.442695, %v3072_v63  ;;  %v3073_v35 = vmul.f32 0.5, %v4934_v27  ;;  %3298 = vst.msk [vmem:[%s5188_s8 + $0x8] sm:$0xff] %vm3296_vm0, %v4934_v27  ;;  %v3695_v4 = vpop.f32.mrb[116].mxu1  ;;  %v3163_v63 = vpop.permute.xlu1 %3162 }
 0x3c2   :  { %v3696_v16 = vpop.f32.mrb[117].mxu1 }
 0x3c3   :  { %4113 = vpow2.f32 %v3088_v56  ;;  %v3090_v36 = vmul.f32 1.442695, %v3073_v35  ;;  %v3697_v20 = vadd.f32 %v3696_v16, %v3695_v4  ;;  %v3698_v19 = vpop.f32.mrb[118].mxu1 }
 0x3c4   :  { %v3699_v29 = vpop.f32.mrb[119].mxu1 }
 0x3c5   :  { %4115 = vpow2.f32 %v3090_v36  ;;  %v4943_v28 = vadd.f32 %v3697_v20, %v4922_v11  ;;  %v3700_v58 = vadd.f32 %v3699_v29, %v3698_v19 }
 0x3c7   :  { %v3074_v32 = vmul.f32 0.5, %v4943_v28  ;;  %3299 = vst.msk [vmem:[%s5188_s8 + $0x10] sm:$0xff] %vm3296_vm0, %v4943_v28  ;;  %v4952_v38 = vadd.f32 %v3700_v58, %v4922_v11 }
 0x3c9   :  { %v3092_v41 = vmul.f32 1.442695, %v3074_v32  ;;  %v3075_v43 = vmul.f32 0.5, %v4952_v38  ;;  %3300 = vst.msk [vmem:[%s5188_s8 + $0x18] sm:$0xff] %vm3296_vm0, %v4952_v38  ;;  %v3701_v37 = vpop.f32.mrb[120].mxu1 }
 0x3ca   :  { %v3702_v44 = vpop.f32.mrb[121].mxu1 }
 0x3cb   :  { %4117 = vpow2.f32 %v3092_v41  ;;  %v3094_v48 = vmul.f32 1.442695, %v3075_v43  ;;  %v3703_v53 = vadd.f32 %v3702_v44, %v3701_v37  ;;  %v3704_v51 = vpop.f32.mrb[122].mxu1  ;;  %v3165_v43 = vpop.permute.xlu0 %3164 }
 0x3cc   :  { %v3705_v5 = vpop.f32.mrb[123].mxu1 }
 0x3cd   :  { %v4114_v60 = vpop.eup %4113  ;;  %4119 = vpow2.f32 %v3094_v48  ;;  %v4961_v40 = vadd.f32 %v3703_v53, %v4922_v11  ;;  %v3706_v50 = vadd.f32 %v3705_v5, %v3704_v51  ;;  %v3167_v51 = vpop.permute.xlu1 %3166 }
 0x3ce   :  { %v3200_v26 = vmul.f32 %v4114_v60, %v3153_v39 }
 0x3cf   :  { %v4116_v10 = vpop.eup %4115  ;;  %v3076_v31 = vmul.f32 0.5, %v4961_v40  ;;  %3301 = vst.msk [vmem:[%s5188_s8 + $0x20] sm:$0xff] %vm3296_vm0, %v4961_v40  ;;  %v4970_v30 = vadd.f32 %v3706_v50, %v4922_v11 }
 0x3d0   :  { %v3201_v3 = vmul.f32 %v4116_v10, %v3155_v52  ;;  %3232 = vrot.lane.b32.xlu0 %v3200_v26, %s4232_s29 }
 0x3d1   :  { %v3096_v49 = vmul.f32 1.442695, %v3076_v31  ;;  %v3077_v13 = vmul.f32 0.5, %v4970_v30  ;;  %3302 = vst.msk [vmem:[%s5188_s8 + $0x28] sm:$0xff] %vm3296_vm0, %v4970_v30  ;;  %v3707_v54 = vpop.f32.mrb[124].mxu1 }
 0x3d2   :  { %v3708_v23 = vpop.f32.mrb[125].mxu1  ;;  %3234 = vrot.lane.b32.xlu1 %v3201_v3, %s4232_s29 }
 0x3d3   :  { %4121 = vpow2.f32 %v3096_v49  ;;  %v3098_v1 = vmul.f32 1.442695, %v3077_v13  ;;  %v3709_v6 = vadd.f32 %v3708_v23, %v3707_v54  ;;  %v3710_v9 = vpop.f32.mrb[126].mxu1  ;;  %v3169_v23 = vpop.permute.xlu0 %3168 }
 0x3d4   :  { %v3711_v55 = vpop.f32.mrb[127].mxu1 }
 0x3d5   :  { %v4118_v34 = vpop.eup %4117  ;;  %4123 = vpow2.f32 %v3098_v1  ;;  %v4981_v12 = vadd.f32 %v3709_v6, %v4922_v11  ;;  %v3712_v14 = vadd.f32 %v3711_v55, %v3710_v9 }
 0x3d6   :  { %v3202_v8 = vmul.f32 %v4118_v34, %v3157_v57  ;;  %v3171_v34 = vpop.permute.xlu1 %3170 }
 0x3d7   :  { %v4120_v15 = vpop.eup %4119  ;;  %v3078_v17 = vmul.f32 0.5, %v4981_v12  ;;  %3303 = vst.msk [vmem:[%s5188_s8 + $0x30] sm:$0xff] %vm3296_vm0, %v4981_v12  ;;  %v4990_v18 = vadd.f32 %v3712_v14, %v4922_v11 }
 0x3d8   :  { %v3203_v21 = vmul.f32 %v4120_v15, %v3159_v2  ;;  %3236 = vrot.lane.b32.xlu0 %v3202_v8, %s4232_s29 }
 0x3d9   :  { %v3100_v0 = vmul.f32 1.442695, %v3078_v17  ;;  %v3079_v46 = vmul.f32 0.5, %v4990_v18  ;;  %3304 = vst.msk [vmem:[%s5188_s8 + $0x38] sm:$0xff] %vm3296_vm0, %v4990_v18  ;;  %v3713_v47 = vpop.f32.mrb[128].mxu1 }
 0x3da   :  { %v3714_v25 = vpop.f32.mrb[129].mxu1  ;;  %3238 = vrot.lane.b32.xlu1 %v3203_v21, %s4232_s29 }
 0x3db   :  { %4125 = vpow2.f32 %v3100_v0  ;;  %v3102_v62 = vmul.f32 1.442695, %v3079_v46  ;;  %v3715_v61 = vadd.f32 %v3714_v25, %v3713_v47  ;;  %v3716_v33 = vpop.f32.mrb[130].mxu1 }
 0x3dc   :  { %v3717_v24 = vpop.f32.mrb[131].mxu1 }
 0x3dd   :  { %v4122_v59 = vpop.eup %4121  ;;  %4127 = vpow2.f32 %v3102_v62  ;;  %v5001_v45 = vadd.f32 %v3715_v61, %v4922_v11  ;;  %v3718_v7 = vadd.f32 %v3717_v24, %v3716_v33  ;;  %v3173_v33 = vpop.permute.xlu0 %3172 }
 0x3de   :  { %v3204_v56 = vmul.f32 %v4122_v59, %v3161_v22 }
 0x3df   :  { %v4124_v35 = vpop.eup %4123  ;;  %v3080_v4 = vmul.f32 0.5, %v5001_v45  ;;  %3305 = vst.msk [vmem:[%s5188_s8 + $0x40] sm:$0xff] %vm3296_vm0, %v5001_v45  ;;  %v5010_v16 = vadd.f32 %v3718_v7, %v4922_v11 }
 0x3e0   :  { %v3205_v36 = vmul.f32 %v4124_v35, %v3163_v63  ;;  %3240 = vrot.lane.b32.xlu0 %v3204_v56, %s4232_s29  ;;  %v3175_v63 = vpop.permute.xlu1 %3174 }
 0x3e1   :  { %v3104_v20 = vmul.f32 1.442695, %v3080_v4  ;;  %v3081_v19 = vmul.f32 0.5, %v5010_v16  ;;  %3306 = vst.msk [vmem:[%s5188_s8 + $0x48] sm:$0xff] %vm3296_vm0, %v5010_v16  ;;  %v3719_v29 = vpop.f32.mrb[132].mxu1 }
 0x3e2   :  { %v3720_v58 = vpop.f32.mrb[133].mxu1  ;;  %3242 = vrot.lane.b32.xlu1 %v3205_v36, %s4232_s29 }
 0x3e3   :  { %4129 = vpow2.f32 %v3104_v20  ;;  %v3106_v32 = vmul.f32 1.442695, %v3081_v19  ;;  %v3721_v39 = vadd.f32 %v3720_v58, %v3719_v29  ;;  %v3722_v41 = vpop.f32.mrb[134].mxu1 }
 0x3e4   :  { %v3723_v37 = vpop.f32.mrb[135].mxu1 }
 0x3e5   :  { %v4126_v44 = vpop.eup %4125  ;;  %4131 = vpow2.f32 %v3106_v32  ;;  %v5021_v48 = vadd.f32 %v3721_v39, %v4922_v11  ;;  %v3724_v53 = vadd.f32 %v3723_v37, %v3722_v41  ;;  %v3177_v32 = vpop.permute.xlu0 %3176 }
 0x3e6   :  { %v3206_v5 = vmul.f32 %v4126_v44, %v3165_v43 }
 0x3e7   :  { %v4128_v60 = vpop.eup %4127  ;;  %v3082_v50 = vmul.f32 0.5, %v5021_v48  ;;  %3307 = vst.msk [vmem:[%s5188_s8 + $0x50] sm:$0xff] %vm3296_vm0, %v5021_v48  ;;  %v5030_v52 = vadd.f32 %v3724_v53, %v4922_v11 }
 0x3e8   :  { %v3207_v26 = vmul.f32 %v4128_v60, %v3167_v51  ;;  %3244 = vrot.lane.b32.xlu0 %v3206_v5, %s4232_s29 }
 0x3e9   :  { %v3108_v10 = vmul.f32 1.442695, %v3082_v50  ;;  %v3083_v31 = vmul.f32 0.5, %v5030_v52  ;;  %3308 = vst.msk [vmem:[%s5188_s8 + $0x58] sm:$0xff] %vm3296_vm0, %v5030_v52  ;;  %v3725_v57 = vpop.f32.mrb[136].mxu1  ;;  %v3181_v44 = vpop.permute.xlu0 %3180 }
 0x3ea   :  { %v3726_v3 = vpop.f32.mrb[137].mxu1  ;;  %3246 = vrot.lane.b32.xlu1 %v3207_v26, %s4232_s29 }
 0x3eb   :  { %4133 = vpow2.f32 %v3108_v10  ;;  %v3110_v49 = vmul.f32 1.442695, %v3083_v31  ;;  %v3727_v13 = vadd.f32 %v3726_v3, %v3725_v57  ;;  %v3728_v54 = vpop.f32.mrb[138].mxu1 }
 0x3ec   :  { %v3729_v1 = vpop.f32.mrb[139].mxu1 }
 0x3ed   :  { %v4130_v6 = vpop.eup %4129  ;;  %4135 = vpow2.f32 %v3110_v49  ;;  %v5041_v9 = vadd.f32 %v3727_v13, %v4922_v11  ;;  %v3730_v55 = vadd.f32 %v3729_v1, %v3728_v54 }
 0x3ee   :  { %v3208_v14 = vmul.f32 %v4130_v6, %v3169_v23 }
 0x3ef   :  { %v4132_v2 = vpop.eup %4131  ;;  %v3084_v8 = vmul.f32 0.5, %v5041_v9  ;;  %3309 = vst.msk [vmem:[%s5188_s8 + $0x60] sm:$0xff] %vm3296_vm0, %v5041_v9  ;;  %v5050_v15 = vadd.f32 %v3730_v55, %v4922_v11 }
 0x3f0   :  { %v3209_v17 = vmul.f32 %v4132_v2, %v3171_v34  ;;  %3248 = vrot.lane.b32.xlu0 %v3208_v14, %s4232_s29 }
 0x3f1   :  { %v3112_v21 = vmul.f32 1.442695, %v3084_v8  ;;  %v3085_v0 = vmul.f32 0.5, %v5050_v15  ;;  %3310 = vst.msk [vmem:[%s5188_s8 + $0x68] sm:$0xff] %vm3296_vm0, %v5050_v15  ;;  %v3731_v46 = vpop.f32.mrb[140].mxu1 }
 0x3f2   :  { %v3732_v47 = vpop.f32.mrb[141].mxu1  ;;  %3250 = vrot.lane.b32.xlu1 %v3209_v17, %s4232_s29 }
 0x3f3   :  { %4137 = vpow2.f32 %v3112_v21  ;;  %v3114_v25 = vmul.f32 1.442695, %v3085_v0  ;;  %v3733_v62 = vadd.f32 %v3732_v47, %v3731_v46  ;;  %v3734_v61 = vpop.f32.mrb[142].mxu1 }
 0x3f4   :  { %v3735_v22 = vpop.f32.mrb[143].mxu1 }
 0x3f5   :  { %v4134_v24 = vpop.eup %4133  ;;  %4139 = vpow2.f32 %v3114_v25  ;;  %v5061_v59 = vadd.f32 %v3733_v62, %v4922_v11  ;;  %v3736_v7 = vadd.f32 %v3735_v22, %v3734_v61 }
 0x3f6   :  { %v3210_v56 = vmul.f32 %v4134_v24, %v3173_v33 }
 0x3f7   :  { %v4136_v35 = vpop.eup %4135  ;;  %v3086_v4 = vmul.f32 0.5, %v5061_v59  ;;  %3311 = vst.msk [vmem:[%s5188_s8 + $0x70] sm:$0xff] %vm3296_vm0, %v5061_v59  ;;  %v5070_v36 = vadd.f32 %v3736_v7, %v4922_v11  ;;  %v3179_v11 = vpop.permute.xlu1 %3178 }
 0x3f8   :  { %v3211_v20 = vmul.f32 %v4136_v35, %v3175_v63  ;;  %3252 = vrot.lane.b32.xlu0 %v3210_v56, %s4232_s29 }
 0x3f9   :  { %v3116_v19 = vmul.f32 1.442695, %v3086_v4  ;;  %v3087_v29 = vmul.f32 0.5, %v5070_v36  ;;  %3312 = vst.msk [vmem:[%s5188_s8 + $0x78] sm:$0xff] %vm3296_vm0, %v5070_v36 }
 0x3fa   :  { %3254 = vrot.lane.b32.xlu1 %v3211_v20, %s4232_s29 }
 0x3fb   :  { %4141 = vpow2.f32 %v3116_v19  ;;  %v3118_v58 = vmul.f32 1.442695, %v3087_v29  ;;  %v3183_v51 = vpop.permute.xlu1 %3182 }
 0x3fd   :  { %v4138_v39 = vpop.eup %4137  ;;  %4143 = vpow2.f32 %v3118_v58 }
 0x3fe   :  { %v3212_v41 = vmul.f32 %v4138_v39, %v3177_v32 }
 0x3ff   :  { %v4140_v43 = vpop.eup %4139 }
 0x400   :  { %v3213_v37 = vmul.f32 %v4140_v43, %v3179_v11  ;;  %3256 = vrot.lane.b32.xlu0 %v3212_v41, %s4232_s29 }
 0x402   :  { %3258 = vrot.lane.b32.xlu1 %v3213_v37, %s4232_s29 }
 0x405   :  { %v4142_v53 = vpop.eup %4141 }
 0x406   :  { %v3214_v5 = vmul.f32 %v4142_v53, %v3181_v44 }
 0x407   :  { %v4144_v60 = vpop.eup %4143 }
 0x408   :  { %v3215_v50 = vmul.f32 %v4144_v60, %v3183_v51  ;;  %3260 = vrot.lane.b32.xlu0 %v3214_v5, %s4232_s29 }
 0x40a   :  { %3262 = vrot.lane.b32.xlu1 %v3215_v50, %s4232_s29 }
 0x442   :  { %v3233_v26 = vpop.permute.xlu0 %3232 }
 0x443   :  { %v3280_v10 = vadd.f32 %v3233_v26, %v4925_v42 }
 0x444   :  { %v3235_v31 = vpop.permute.xlu1 %3234 }
 0x445   :  { %v3281_v57 = vadd.f32 %v3235_v31, %v4934_v27  ;;  %3329 = vrot.lane.b32.xlu0 %v3280_v10, %s4233_s22 }
 0x447   :  { %3331 = vrot.lane.b32.xlu1 %v3281_v57, %s4233_s22 }
 0x44a   :  { %v3237_v3 = vpop.permute.xlu0 %3236 }
 0x44b   :  { %v3282_v49 = vadd.f32 %v3237_v3, %v4943_v28 }
 0x44c   :  { %v3239_v13 = vpop.permute.xlu1 %3238 }
 0x44d   :  { %v3283_v54 = vadd.f32 %v3239_v13, %v4952_v38  ;;  %3333 = vrot.lane.b32.xlu0 %v3282_v49, %s4233_s22 }
 0x44f   :  { %3335 = vrot.lane.b32.xlu1 %v3283_v54, %s4233_s22 }
 0x452   :  { %v3241_v23 = vpop.permute.xlu0 %3240 }
 0x453   :  { %v3284_v42 = vadd.f32 %v3241_v23, %v4961_v40 }
 0x454   :  { %v3243_v1 = vpop.permute.xlu1 %3242 }
 0x455   :  { %v3285_v27 = vadd.f32 %v3243_v1, %v4970_v30  ;;  %3337 = vrot.lane.b32.xlu0 %v3284_v42, %s4233_s22 }
 0x457   :  { %3339 = vrot.lane.b32.xlu1 %v3285_v27, %s4233_s22 }
 0x45a   :  { %v3245_v6 = vpop.permute.xlu0 %3244 }
 0x45b   :  { %v3286_v28 = vadd.f32 %v3245_v6, %v4981_v12 }
 0x45c   :  { %v3247_v55 = vpop.permute.xlu1 %3246 }
 0x45d   :  { %v3287_v38 = vadd.f32 %v3247_v55, %v4990_v18  ;;  %3341 = vrot.lane.b32.xlu0 %v3286_v28, %s4233_s22 }
 0x45f   :  { %3343 = vrot.lane.b32.xlu1 %v3287_v38, %s4233_s22 }
 0x462   :  { %v3249_v34 = vpop.permute.xlu0 %3248 }
 0x463   :  { %v3288_v40 = vadd.f32 %v3249_v34, %v5001_v45 }
 0x464   :  { %v3251_v14 = vpop.permute.xlu1 %3250 }
 0x465   :  { %v3289_v30 = vadd.f32 %v3251_v14, %v5010_v16  ;;  %3345 = vrot.lane.b32.xlu0 %v3288_v40, %s4233_s22 }
 0x467   :  { %3347 = vrot.lane.b32.xlu1 %v3289_v30, %s4233_s22 }
 0x46a   :  { %v3253_v2 = vpop.permute.xlu0 %3252 }
 0x46b   :  { %v3290_v12 = vadd.f32 %v3253_v2, %v5021_v48 }
 0x46c   :  { %v3255_v8 = vpop.permute.xlu1 %3254 }
 0x46d   :  { %v3291_v18 = vadd.f32 %v3255_v8, %v5030_v52  ;;  %3349 = vrot.lane.b32.xlu0 %v3290_v12, %s4233_s22 }
 0x46f   :  { %3351 = vrot.lane.b32.xlu1 %v3291_v18, %s4233_s22 }
 0x472   :  { %v3257_v17 = vpop.permute.xlu0 %3256 }
 0x473   :  { %v3292_v45 = vadd.f32 %v3257_v17, %v5041_v9 }
 0x474   :  { %v3259_v21 = vpop.permute.xlu1 %3258 }
 0x475   :  { %v3293_v16 = vadd.f32 %v3259_v21, %v5050_v15  ;;  %3353 = vrot.lane.b32.xlu0 %v3292_v45, %s4233_s22 }
 0x477   :  { %3355 = vrot.lane.b32.xlu1 %v3293_v16, %s4233_s22 }
 0x47a   :  { %v3261_v0 = vpop.permute.xlu0 %3260 }
 0x47b   :  { %v3294_v48 = vadd.f32 %v3261_v0, %v5061_v59 }
 0x47c   :  { %v3263_v46 = vpop.permute.xlu1 %3262 }
 0x47d   :  { %v3295_v52 = vadd.f32 %v3263_v46, %v5070_v36  ;;  %3357 = vrot.lane.b32.xlu0 %v3294_v48, %s4233_s22 }
 0x47f   :  { %3359 = vrot.lane.b32.xlu1 %v3295_v52, %s4233_s22 }
 0x4b7   :  { %v3330_v47 = vpop.permute.xlu0 %3329 }
 0x4b8   :  { %3378 = vst.msk [vmem:[%s5188_s8] sm:$0xff] %vm3377_vm1, %v3330_v47 }
 0x4b9   :  { %v3332_v9 = vpop.permute.xlu1 %3331 }
 0x4ba   :  { %3379 = vst.msk [vmem:[%s5188_s8 + $0x8] sm:$0xff] %vm3377_vm1, %v3332_v9 }
 0x4bf   :  { %v3334_v15 = vpop.permute.xlu0 %3333 }
 0x4c0   :  { %3380 = vst.msk [vmem:[%s5188_s8 + $0x10] sm:$0xff] %vm3377_vm1, %v3334_v15 }
 0x4c1   :  { %v3336_v25 = vpop.permute.xlu1 %3335 }
 0x4c2   :  { %3381 = vst.msk [vmem:[%s5188_s8 + $0x18] sm:$0xff] %vm3377_vm1, %v3336_v25 }
 0x4c7   :  { %v3338_v62 = vpop.permute.xlu0 %3337 }
 0x4c8   :  { %3382 = vst.msk [vmem:[%s5188_s8 + $0x20] sm:$0xff] %vm3377_vm1, %v3338_v62 }
 0x4c9   :  { %v3340_v61 = vpop.permute.xlu1 %3339 }
 0x4ca   :  { %3383 = vst.msk [vmem:[%s5188_s8 + $0x28] sm:$0xff] %vm3377_vm1, %v3340_v61 }
 0x4cf   :  { %v3342_v33 = vpop.permute.xlu0 %3341 }
 0x4d0   :  { %3384 = vst.msk [vmem:[%s5188_s8 + $0x30] sm:$0xff] %vm3377_vm1, %v3342_v33 }
 0x4d1   :  { %v3344_v22 = vpop.permute.xlu1 %3343 }
 0x4d2   :  { %3385 = vst.msk [vmem:[%s5188_s8 + $0x38] sm:$0xff] %vm3377_vm1, %v3344_v22 }
 0x4d7   :  { %v3346_v24 = vpop.permute.xlu0 %3345 }
 0x4d8   :  { %3386 = vst.msk [vmem:[%s5188_s8 + $0x40] sm:$0xff] %vm3377_vm1, %v3346_v24 }
 0x4d9   :  { %v3348_v59 = vpop.permute.xlu1 %3347 }
 0x4da   :  { %3387 = vst.msk [vmem:[%s5188_s8 + $0x48] sm:$0xff] %vm3377_vm1, %v3348_v59 }
 0x4df   :  { %v3350_v7 = vpop.permute.xlu0 %3349 }
 0x4e0   :  { %3388 = vst.msk [vmem:[%s5188_s8 + $0x50] sm:$0xff] %vm3377_vm1, %v3350_v7 }
 0x4e1   :  { %v3352_v63 = vpop.permute.xlu1 %3351 }
 0x4e2   :  { %3389 = vst.msk [vmem:[%s5188_s8 + $0x58] sm:$0xff] %vm3377_vm1, %v3352_v63 }
 0x4e7   :  { %v3354_v56 = vpop.permute.xlu0 %3353 }
 0x4e8   :  { %3390 = vst.msk [vmem:[%s5188_s8 + $0x60] sm:$0xff] %vm3377_vm1, %v3354_v56 }
 0x4e9   :  { %v3356_v35 = vpop.permute.xlu1 %3355 }
 0x4ea   :  { %3391 = vst.msk [vmem:[%s5188_s8 + $0x68] sm:$0xff] %vm3377_vm1, %v3356_v35 }
 0x4ef   :  { %v3358_v4 = vpop.permute.xlu0 %3357 }
 0x4f0   :  { %3392 = vst.msk [vmem:[%s5188_s8 + $0x70] sm:$0xff] %vm3377_vm1, %v3358_v4 }
 0x4f1   :  { %v3360_v36 = vpop.permute.xlu1 %3359 }
 0x4f2   :  { %3393 = vst.msk [vmem:[%s5188_s8 + $0x78] sm:$0xff] %vm3377_vm1, %v3360_v36 }
 0x4f3   :  { %3398 = vsyncpa [#allocation3], 1 }
 0x4f4   :  { %3399 = vsyncpa [#allocation5], 1 }

</bundles_post_ra>
